<compile_context>
chip_gen: v5e
topology: v5e:2x2
jax: 0.10.0
libtpu: 0.0.40
codegen_flags: <defaults>
</compile_context>

<pallas_src>
import jax
import jax.numpy as jnp
from jax.experimental import pallas as pl
from jax.experimental.pallas import tpu as pltpu


def idcm_kernel(img_ref, txt_ref,
                wi_ref, bi_ref, wt_ref, bt_ref,
                wl_ref, bl_ref, w2_ref, b2_ref,
                v1f_ref, v2f_ref, v1p_ref, v2p_ref):
    """Fused IDCM_NN forward for one batch tile (both modalities)."""
    img = img_ref[...]
    txt = txt_ref[...]

    # ImgNN / TextNN: Linear + ReLU (f32 accumulation on the MXU).
    h_img = jnp.maximum(
        jnp.dot(img, wi_ref[...], preferred_element_type=jnp.float32) + bi_ref[...], 0.0)
    h_txt = jnp.maximum(
        jnp.dot(txt, wt_ref[...], preferred_element_type=jnp.float32) + bt_ref[...], 0.0)

    # Shared linearLayer -> view features.
    v1f = jnp.dot(h_img, wl_ref[...], preferred_element_type=jnp.float32) + bl_ref[...]
    v2f = jnp.dot(h_txt, wl_ref[...], preferred_element_type=jnp.float32) + bl_ref[...]

    # Shared linearLayer2 -> predictions (lane-padded output columns).
    v1p = jnp.dot(v1f, w2_ref[...], preferred_element_type=jnp.float32) + b2_ref[...]
    v2p = jnp.dot(v2f, w2_ref[...], preferred_element_type=jnp.float32) + b2_ref[...]

    v1f_ref[...] = v1f.astype(v1f_ref.dtype)
    v2f_ref[...] = v2f.astype(v2f_ref.dtype)
    v1p_ref[...] = v1p.astype(v1p_ref.dtype)
    v2p_ref[...] = v2p.astype(v2p_ref.dtype)


def idcm_nn_forward(img, text, wi_t, bi, wt_t, bt, wl_t, bl, w2_t, b2,
                    *, batch_tile=512, out_dtype=jnp.float32):
    """img: (B, img_input_dim); text: (B, text_input_dim).

    All weights are pre-transposed to (in_features, out_features); biases are (1, out).
    Returns (view1_feature, view2_feature, view1_predict, view2_predict).
    """
    B = img.shape[0]
    assert text.shape[0] == B
    d_img_in = img.shape[1]
    d_txt_in = text.shape[1]
    d_img_out = wi_t.shape[1]
    d_txt_out = wt_t.shape[1]
    assert d_img_out == d_txt_out, "shared linearLayer requires img/text feature dims to match"
    d_mid = wl_t.shape[1]
    d_out = w2_t.shape[1]

    # Lane-dense predict stores: zero-pad output_dim up to a multiple of 128 columns.
    d_out_pad = max(128, -(-d_out // 128) * 128)
    if d_out_pad != d_out:
        w2_t = jnp.pad(w2_t, ((0, 0), (0, d_out_pad - d_out)))
        b2 = jnp.pad(b2, ((0, 0), (0, d_out_pad - d_out)))

    tb = min(batch_tile, B)
    assert B % tb == 0, "batch size must be a multiple of the batch tile"
    grid = (B // tb,)

    def row_spec(d):  # batch-tiled arrays
        return pl.BlockSpec((tb, d), lambda i: (i, 0))

    def pinned(arr):  # weights/biases: resident in VMEM across all grid steps
        return pl.BlockSpec(arr.shape, lambda i: (0, 0))

    out_shapes = (
        jax.ShapeDtypeStruct((B, d_mid), out_dtype),
        jax.ShapeDtypeStruct((B, d_mid), out_dtype),
        jax.ShapeDtypeStruct((B, d_out_pad), out_dtype),
        jax.ShapeDtypeStruct((B, d_out_pad), out_dtype),
    )

    v1f, v2f, v1p, v2p = pl.pallas_call(
        idcm_kernel,
        out_shape=out_shapes,
        grid=grid,
        in_specs=[
            row_spec(d_img_in),            # img tile
            row_spec(d_txt_in),            # text tile
            pinned(wi_t), pinned(bi),      # ImgNN
            pinned(wt_t), pinned(bt),      # TextNN
            pinned(wl_t), pinned(bl),      # linearLayer
            pinned(w2_t), pinned(b2),      # linearLayer2 (padded)
        ],
        out_specs=[
            row_spec(d_mid), row_spec(d_mid),
            row_spec(d_out_pad), row_spec(d_out_pad),
        ],
        compiler_params=pltpu.CompilerParams(
            dimension_semantics=("parallel",)),   # v7x: shard batch grid across 2 TCs
    )(img, text, wi_t, bi, wt_t, bt, wl_t, bl, w2_t, b2)

    return v1f, v2f, v1p[:, :d_out], v2p[:, :d_out]


def reference(img, text, wi_t, bi, wt_t, bt, wl_t, bl, w2_t, b2):
    hp = jax.lax.Precision.HIGHEST
    dot = lambda a, b: jnp.dot(a, b, precision=hp)
    v1 = jnp.maximum(dot(img, wi_t) + bi, 0.0)
    v2 = jnp.maximum(dot(text, wt_t) + bt, 0.0)
    v1f = dot(v1, wl_t) + bl
    v2f = dot(v2, wl_t) + bl
    v1p = dot(v1f, w2_t) + b2
    v2p = dot(v2f, w2_t) + b2
    return v1f, v2f, v1p, v2p


if __name__ == "__main__":
    # Scaled-down dims consistent with IDCM_NN defaults
    # (img 4096->2048, text 1024->2048, minus_one 1024, output 10).
    B = 256
    D_IMG_IN, D_IMG_OUT = 512, 256
    D_TXT_IN, D_TXT_OUT = 256, 256
    D_MID, D_OUT = 256, 10

    key = jax.random.PRNGKey(0)
    k = jax.random.split(key, 10)
    s = 0.05

    img = jax.random.normal(k[0], (B, D_IMG_IN), dtype=jnp.float32)
    text = jax.random.normal(k[1], (B, D_TXT_IN), dtype=jnp.float32)

    # PyTorch Linear weight is (out, in); we store the transpose (in, out).
    wi_t = jax.random.normal(k[2], (D_IMG_IN, D_IMG_OUT), dtype=jnp.float32) * s
    bi = jax.random.normal(k[3], (1, D_IMG_OUT), dtype=jnp.float32) * s
    wt_t = jax.random.normal(k[4], (D_TXT_IN, D_TXT_OUT), dtype=jnp.float32) * s
    bt = jax.random.normal(k[5], (1, D_TXT_OUT), dtype=jnp.float32) * s
    wl_t = jax.random.normal(k[6], (D_IMG_OUT, D_MID), dtype=jnp.float32) * s
    bl = jax.random.normal(k[7], (1, D_MID), dtype=jnp.float32) * s
    w2_t = jax.random.normal(k[8], (D_MID, D_OUT), dtype=jnp.float32) * s
    b2 = jax.random.normal(k[9], (1, D_OUT), dtype=jnp.float32) * s

    outs = idcm_nn_forward(img, text, wi_t, bi, wt_t, bt, wl_t, bl, w2_t, b2,
                           batch_tile=128)  # grid of 2 -> exercises the pipelined tiling
    outs = jax.block_until_ready(outs)
    v1f, v2f, v1p, v2p = outs

    r1f, r2f, r1p, r2p = reference(img, text, wi_t, bi, wt_t, bt, wl_t, bl, w2_t, b2)

    assert v1f.shape == (B, D_MID), v1f.shape
    assert v2f.shape == (B, D_MID), v2f.shape
    assert v1p.shape == (B, D_OUT), v1p.shape
    assert v2p.shape == (B, D_OUT), v2p.shape
    for got, ref in ((v1f, r1f), (v2f, r2f), (v1p, r1p), (v2p, r2p)):
        assert jnp.allclose(got, ref, atol=2e-2, rtol=2e-2), "mismatch vs reference"

    print("KERNEL_OK")
</pallas_src>

<mosaic_0001>
module attributes {stable_mosaic.version = 11 : i64} {
  func.func @idcm_kernel(%arg0: i32, %arg1: memref<128x512xf32, #tpu.memory_space<vmem>>, %arg2: memref<128x256xf32, #tpu.memory_space<vmem>>, %arg3: memref<512x256xf32, #tpu.memory_space<vmem>>, %arg4: memref<1x256xf32, #tpu.memory_space<vmem>>, %arg5: memref<256x256xf32, #tpu.memory_space<vmem>>, %arg6: memref<1x256xf32, #tpu.memory_space<vmem>>, %arg7: memref<256x256xf32, #tpu.memory_space<vmem>>, %arg8: memref<1x256xf32, #tpu.memory_space<vmem>>, %arg9: memref<256x128xf32, #tpu.memory_space<vmem>>, %arg10: memref<1x128xf32, #tpu.memory_space<vmem>>, %arg11: memref<128x256xf32, #tpu.memory_space<vmem>>, %arg12: memref<128x256xf32, #tpu.memory_space<vmem>>, %arg13: memref<128x128xf32, #tpu.memory_space<vmem>>, %arg14: memref<128x128xf32, #tpu.memory_space<vmem>>) attributes {dimension_semantics = [#tpu.dimension_semantics<parallel>], iteration_bounds = array<i64: 2>, scalar_prefetch = 0 : i64, scratch_operands = 0 : i64, tpu.core_type = #tpu.core_type<tc>, window_params = [{transform_indices = @transform_0, window_bounds = array<i64: 128, 512>}, {transform_indices = @transform_1, window_bounds = array<i64: 128, 256>}, {pipeline_mode = #tpu.pipeline_mode<synchronous>, transform_indices = @transform_2, window_bounds = array<i64: 512, 256>}, {pipeline_mode = #tpu.pipeline_mode<synchronous>, transform_indices = @transform_3, window_bounds = array<i64: 1, 256>}, {pipeline_mode = #tpu.pipeline_mode<synchronous>, transform_indices = @transform_4, window_bounds = array<i64: 256, 256>}, {pipeline_mode = #tpu.pipeline_mode<synchronous>, transform_indices = @transform_5, window_bounds = array<i64: 1, 256>}, {pipeline_mode = #tpu.pipeline_mode<synchronous>, transform_indices = @transform_6, window_bounds = array<i64: 256, 256>}, {pipeline_mode = #tpu.pipeline_mode<synchronous>, transform_indices = @transform_7, window_bounds = array<i64: 1, 256>}, {pipeline_mode = #tpu.pipeline_mode<synchronous>, transform_indices = @transform_8, window_bounds = array<i64: 256, 128>}, {pipeline_mode = #tpu.pipeline_mode<synchronous>, transform_indices = @transform_9, window_bounds = array<i64: 1, 128>}, {transform_indices = @transform_10, window_bounds = array<i64: 128, 256>}, {transform_indices = @transform_11, window_bounds = array<i64: 128, 256>}, {transform_indices = @transform_12, window_bounds = array<i64: 128, 128>}, {transform_indices = @transform_13, window_bounds = array<i64: 128, 128>}]} {
    %c0 = arith.constant 0 : index
    %c0_0 = arith.constant 0 : index
    %0 = vector.load %arg1[%c0, %c0_0] : memref<128x512xf32, #tpu.memory_space<vmem>>, vector<128x512xf32>
    %c0_1 = arith.constant 0 : index
    %c0_2 = arith.constant 0 : index
    %1 = vector.load %arg2[%c0_1, %c0_2] : memref<128x256xf32, #tpu.memory_space<vmem>>, vector<128x256xf32>
    %c0_3 = arith.constant 0 : index
    %c0_4 = arith.constant 0 : index
    %2 = vector.load %arg3[%c0_3, %c0_4] : memref<512x256xf32, #tpu.memory_space<vmem>>, vector<512x256xf32>
    %cst = arith.constant dense<0.000000e+00> : vector<128x256xf32>
    %3 = tpu.matmul %0, %2, %cst {dimension_numbers = #tpu.dot_dimension_numbers<[1], [0], [0], [1], [0, 0, 1, 1], [], []>} : vector<128x512xf32>, vector<512x256xf32>, vector<128x256xf32> -> vector<128x256xf32>
    %c0_5 = arith.constant 0 : index
    %c0_6 = arith.constant 0 : index
    %4 = vector.load %arg4[%c0_5, %c0_6] : memref<1x256xf32, #tpu.memory_space<vmem>>, vector<1x256xf32>
    %5 = vector.broadcast %4 : vector<1x256xf32> to vector<128x256xf32>
    %6 = arith.addf %3, %5 : vector<128x256xf32>
    %cst_7 = arith.constant 0.000000e+00 : f32
    %7 = vector.broadcast %cst_7 : f32 to vector<128x256xf32>
    %8 = arith.maximumf %6, %7 : vector<128x256xf32>
    %c0_8 = arith.constant 0 : index
    %c0_9 = arith.constant 0 : index
    %9 = vector.load %arg5[%c0_8, %c0_9] : memref<256x256xf32, #tpu.memory_space<vmem>>, vector<256x256xf32>
    %cst_10 = arith.constant dense<0.000000e+00> : vector<128x256xf32>
    %10 = tpu.matmul %1, %9, %cst_10 {dimension_numbers = #tpu.dot_dimension_numbers<[1], [0], [0], [1], [0, 0, 1, 1], [], []>} : vector<128x256xf32>, vector<256x256xf32>, vector<128x256xf32> -> vector<128x256xf32>
    %c0_11 = arith.constant 0 : index
    %c0_12 = arith.constant 0 : index
    %11 = vector.load %arg6[%c0_11, %c0_12] : memref<1x256xf32, #tpu.memory_space<vmem>>, vector<1x256xf32>
    %12 = vector.broadcast %11 : vector<1x256xf32> to vector<128x256xf32>
    %13 = arith.addf %10, %12 : vector<128x256xf32>
    %cst_13 = arith.constant 0.000000e+00 : f32
    %14 = vector.broadcast %cst_13 : f32 to vector<128x256xf32>
    %15 = arith.maximumf %13, %14 : vector<128x256xf32>
    %c0_14 = arith.constant 0 : index
    %c0_15 = arith.constant 0 : index
    %16 = vector.load %arg7[%c0_14, %c0_15] : memref<256x256xf32, #tpu.memory_space<vmem>>, vector<256x256xf32>
    %cst_16 = arith.constant dense<0.000000e+00> : vector<128x256xf32>
    %17 = tpu.matmul %8, %16, %cst_16 {dimension_numbers = #tpu.dot_dimension_numbers<[1], [0], [0], [1], [0, 0, 1, 1], [], []>} : vector<128x256xf32>, vector<256x256xf32>, vector<128x256xf32> -> vector<128x256xf32>
    %c0_17 = arith.constant 0 : index
    %c0_18 = arith.constant 0 : index
    %18 = vector.load %arg8[%c0_17, %c0_18] : memref<1x256xf32, #tpu.memory_space<vmem>>, vector<1x256xf32>
    %19 = vector.broadcast %18 : vector<1x256xf32> to vector<128x256xf32>
    %20 = arith.addf %17, %19 : vector<128x256xf32>
    %c0_19 = arith.constant 0 : index
    %c0_20 = arith.constant 0 : index
    %21 = vector.load %arg7[%c0_19, %c0_20] : memref<256x256xf32, #tpu.memory_space<vmem>>, vector<256x256xf32>
    %cst_21 = arith.constant dense<0.000000e+00> : vector<128x256xf32>
    %22 = tpu.matmul %15, %21, %cst_21 {dimension_numbers = #tpu.dot_dimension_numbers<[1], [0], [0], [1], [0, 0, 1, 1], [], []>} : vector<128x256xf32>, vector<256x256xf32>, vector<128x256xf32> -> vector<128x256xf32>
    %c0_22 = arith.constant 0 : index
    %c0_23 = arith.constant 0 : index
    %23 = vector.load %arg8[%c0_22, %c0_23] : memref<1x256xf32, #tpu.memory_space<vmem>>, vector<1x256xf32>
    %24 = vector.broadcast %23 : vector<1x256xf32> to vector<128x256xf32>
    %25 = arith.addf %22, %24 : vector<128x256xf32>
    %c0_24 = arith.constant 0 : index
    %c0_25 = arith.constant 0 : index
    %26 = vector.load %arg9[%c0_24, %c0_25] : memref<256x128xf32, #tpu.memory_space<vmem>>, vector<256x128xf32>
    %cst_26 = arith.constant dense<0.000000e+00> : vector<128x128xf32>
    %27 = tpu.matmul %20, %26, %cst_26 {dimension_numbers = #tpu.dot_dimension_numbers<[1], [0], [0], [1], [0, 0, 1, 1], [], []>} : vector<128x256xf32>, vector<256x128xf32>, vector<128x128xf32> -> vector<128x128xf32>
    %c0_27 = arith.constant 0 : index
    %c0_28 = arith.constant 0 : index
    %28 = vector.load %arg10[%c0_27, %c0_28] : memref<1x128xf32, #tpu.memory_space<vmem>>, vector<1x128xf32>
    %29 = vector.broadcast %28 : vector<1x128xf32> to vector<128x128xf32>
    %30 = arith.addf %27, %29 : vector<128x128xf32>
    %c0_29 = arith.constant 0 : index
    %c0_30 = arith.constant 0 : index
    %31 = vector.load %arg9[%c0_29, %c0_30] : memref<256x128xf32, #tpu.memory_space<vmem>>, vector<256x128xf32>
    %cst_31 = arith.constant dense<0.000000e+00> : vector<128x128xf32>
    %32 = tpu.matmul %25, %31, %cst_31 {dimension_numbers = #tpu.dot_dimension_numbers<[1], [0], [0], [1], [0, 0, 1, 1], [], []>} : vector<128x256xf32>, vector<256x128xf32>, vector<128x128xf32> -> vector<128x128xf32>
    %c0_32 = arith.constant 0 : index
    %c0_33 = arith.constant 0 : index
    %33 = vector.load %arg10[%c0_32, %c0_33] : memref<1x128xf32, #tpu.memory_space<vmem>>, vector<1x128xf32>
    %34 = vector.broadcast %33 : vector<1x128xf32> to vector<128x128xf32>
    %35 = arith.addf %32, %34 : vector<128x128xf32>
    %c0_34 = arith.constant 0 : index
    %c0_35 = arith.constant 0 : index
    %36 = vector.load %arg11[%c0_34, %c0_35] : memref<128x256xf32, #tpu.memory_space<vmem>>, vector<128x256xf32>
    tpu.vector_store %arg11[%c0_34, %c0_35], %20 {strides = array<i32>} : memref<128x256xf32, #tpu.memory_space<vmem>>, vector<128x256xf32>,
    %c0_36 = arith.constant 0 : index
    %c0_37 = arith.constant 0 : index
    %37 = vector.load %arg12[%c0_36, %c0_37] : memref<128x256xf32, #tpu.memory_space<vmem>>, vector<128x256xf32>
    tpu.vector_store %arg12[%c0_36, %c0_37], %25 {strides = array<i32>} : memref<128x256xf32, #tpu.memory_space<vmem>>, vector<128x256xf32>,
    %c0_38 = arith.constant 0 : index
    %c0_39 = arith.constant 0 : index
    %38 = vector.load %arg13[%c0_38, %c0_39] : memref<128x128xf32, #tpu.memory_space<vmem>>, vector<128x128xf32>
    tpu.vector_store %arg13[%c0_38, %c0_39], %30 {strides = array<i32>} : memref<128x128xf32, #tpu.memory_space<vmem>>, vector<128x128xf32>,
    %c0_40 = arith.constant 0 : index
    %c0_41 = arith.constant 0 : index
    %39 = vector.load %arg14[%c0_40, %c0_41] : memref<128x128xf32, #tpu.memory_space<vmem>>, vector<128x128xf32>
    tpu.vector_store %arg14[%c0_40, %c0_41], %35 {strides = array<i32>} : memref<128x128xf32, #tpu.memory_space<vmem>>, vector<128x128xf32>,
    return
  }
  func.func @transform_0(%arg0: i32) -> (i32, i32) {
    %c0_i32 = arith.constant 0 : i32
    %c0_i32_0 = arith.constant 0 : i32
    return %arg0, %c0_i32 : i32, i32
  }
  func.func @transform_1(%arg0: i32) -> (i32, i32) {
    %c0_i32 = arith.constant 0 : i32
    %c0_i32_0 = arith.constant 0 : i32
    return %arg0, %c0_i32 : i32, i32
  }
  func.func @transform_2(%arg0: i32) -> (i32, i32) {
    %c0_i32 = arith.constant 0 : i32
    %c0_i32_0 = arith.constant 0 : i32
    %c0_i32_1 = arith.constant 0 : i32
    return %c0_i32, %c0_i32_0 : i32, i32
  }
  func.func @transform_3(%arg0: i32) -> (i32, i32) {
    %c0_i32 = arith.constant 0 : i32
    %c0_i32_0 = arith.constant 0 : i32
    %c0_i32_1 = arith.constant 0 : i32
    return %c0_i32, %c0_i32_0 : i32, i32
  }
  func.func @transform_4(%arg0: i32) -> (i32, i32) {
    %c0_i32 = arith.constant 0 : i32
    %c0_i32_0 = arith.constant 0 : i32
    %c0_i32_1 = arith.constant 0 : i32
    return %c0_i32, %c0_i32_0 : i32, i32
  }
  func.func @transform_5(%arg0: i32) -> (i32, i32) {
    %c0_i32 = arith.constant 0 : i32
    %c0_i32_0 = arith.constant 0 : i32
    %c0_i32_1 = arith.constant 0 : i32
    return %c0_i32, %c0_i32_0 : i32, i32
  }
  func.func @transform_6(%arg0: i32) -> (i32, i32) {
    %c0_i32 = arith.constant 0 : i32
    %c0_i32_0 = arith.constant 0 : i32
    %c0_i32_1 = arith.constant 0 : i32
    return %c0_i32, %c0_i32_0 : i32, i32
  }
  func.func @transform_7(%arg0: i32) -> (i32, i32) {
    %c0_i32 = arith.constant 0 : i32
    %c0_i32_0 = arith.constant 0 : i32
    %c0_i32_1 = arith.constant 0 : i32
    return %c0_i32, %c0_i32_0 : i32, i32
  }
  func.func @transform_8(%arg0: i32) -> (i32, i32) {
    %c0_i32 = arith.constant 0 : i32
    %c0_i32_0 = arith.constant 0 : i32
    %c0_i32_1 = arith.constant 0 : i32
    return %c0_i32, %c0_i32_0 : i32, i32
  }
  func.func @transform_9(%arg0: i32) -> (i32, i32) {
    %c0_i32 = arith.constant 0 : i32
    %c0_i32_0 = arith.constant 0 : i32
    %c0_i32_1 = arith.constant 0 : i32
    return %c0_i32, %c0_i32_0 : i32, i32
  }
  func.func @transform_10(%arg0: i32) -> (i32, i32) {
    %c0_i32 = arith.constant 0 : i32
    %c0_i32_0 = arith.constant 0 : i32
    return %arg0, %c0_i32 : i32, i32
  }
  func.func @transform_11(%arg0: i32) -> (i32, i32) {
    %c0_i32 = arith.constant 0 : i32
    %c0_i32_0 = arith.constant 0 : i32
    return %arg0, %c0_i32 : i32, i32
  }
  func.func @transform_12(%arg0: i32) -> (i32, i32) {
    %c0_i32 = arith.constant 0 : i32
    %c0_i32_0 = arith.constant 0 : i32
    return %arg0, %c0_i32 : i32, i32
  }
  func.func @transform_13(%arg0: i32) -> (i32, i32) {
    %c0_i32 = arith.constant 0 : i32
    %c0_i32_0 = arith.constant 0 : i32
    return %arg0, %c0_i32 : i32, i32
  }
}

</mosaic_0001>

<bundles_post_ra>
// kernel: tpu_custom_call.1
= control target key start
LH: loop header
LB: loop body
LE: loop exit
PB: predicated region body
PF: predicated region fallthrough
CT: control target
= control target key end

     0   :  { %s5229_s0 = inlined_call_operand.hbm [shape: f32[256,512], index: 0, kind: input, shape index: {}]   ;;  %s5230_s1 = inlined_call_operand.hbm [shape: f32[256,256], index: 1, kind: input, shape index: {}]   ;;  %s5231_s2 = inlined_call_operand.hbm [shape: f32[512,256], index: 2, kind: input, shape index: {}]   ;;  %s5232_s3 = inlined_call_operand.vmem [shape: f32[1,256], index: 3, kind: input, shape index: {}]   ;;  %s5233_s4 = inlined_call_operand.hbm [shape: f32[256,256], index: 4, kind: input, shape index: {}]   ;;  %s5234_s5 = inlined_call_operand.vmem [shape: f32[1,256], index: 5, kind: input, shape index: {}]   ;;  %s5235_s6 = inlined_call_operand.hbm [shape: f32[256,256], index: 6, kind: input, shape index: {}]   ;;  %s5236_s7 = inlined_call_operand.vmem [shape: f32[1,256], index: 7, kind: input, shape index: {}]   ;;  %s5237_s8 = inlined_call_operand.hbm [shape: f32[256,128], index: 8, kind: input, shape index: {}]   ;;  %s5238_s9 = inlined_call_operand.vmem [shape: f32[1,128], index: 9, kind: input, shape index: {}]   ;;  %s5239_s10 = inlined_call_operand.hbm [shape: f32[256,256], index: 10, kind: output, shape index: {0}]   ;;  %s5240_s11 = inlined_call_operand.hbm [shape: f32[256,256], index: 11, kind: output, shape index: {1}]   ;;  %s5241_s12 = inlined_call_operand.hbm [shape: f32[256,128], index: 12, kind: output, shape index: {2}]   ;;  %s5242_s13 = inlined_call_operand.hbm [shape: f32[256,128], index: 13, kind: output, shape index: {3}]  }
   0x1   :  { %5280 = sst [smem:[#allocation70_spill]] %s5229_s0 }
   0x2   :  { %5281 = sst [smem:[#allocation71_spill]] %s5231_s2 }
   0x3   :  { %5282 = sst [smem:[#allocation72_spill]] %s5233_s4 }
   0x4   :  { %5283 = sst [smem:[#allocation73_spill]] %s5235_s6 }
   0x5   :  { %5284 = sst [smem:[#allocation74_spill]] %s5237_s8 }
   0x6   :  { %5285 = sst [smem:[#allocation75_spill]] %s5239_s10 }
   0x7   :  { %5286 = sst [smem:[#allocation76_spill]] %s5241_s12 }
   0x8   :  { %5287 = sst [smem:[#allocation77_spill]] %s5242_s13 }
   0x9   :  { %19 = vsyncpa [#allocation3], 0 }
   0xa   :  { %21 = vsyncpa [#allocation3 + $0x1], 0 }
   0xb   :  { %22 = vsyncpa [#allocation6], 0 }
   0xc   :  { %24 = vsyncpa [#allocation6 + $0x1], 0 }
   0xd   :  { %25 = vsyncpa [#allocation9], 0 }
   0xe   :  { %26 = vsyncpa [#allocation12], 0 }
   0xf   :  { %27 = vsyncpa [#allocation4], 0 }
  0x10   :  { %29 = vsyncpa [#allocation4 + $0x1], 0 }
  0x11   :  { %30 = vsyncpa [#allocation15], 0 }
  0x12   :  { %32 = vsyncpa [#allocation15 + $0x1], 0 }
  0x13   :  { %33 = vsyncpa [#allocation18], 0 }
  0x14   :  { %35 = vsyncpa [#allocation18 + $0x1], 0  ;;  %s3655_s25 = smov 0   ;;  %s3657_s26 = smov 0  }
  0x15   :  { %s3659_s27 = smov 0   ;;  %s3661_s28 = smov 0  }
  0x16 LB: > { %5288 = sst [smem:[#allocation27_spill]] %s3557_s25  ;;  %s3676_s29 = sadd.s32 4294967295, %s3569_s28   ;;  %s3569_s28 = sphi %s3661_s28, %s5415_s28   ;;  %s3565_s27 = sphi %s3659_s27, %s5417_s27   ;;  %s3561_s26 = sphi %s3657_s26, %s5419_s26   ;;  %s3557_s25 = sphi %s3655_s25, %s5418_s25  }
  0x17   : > { %5289 = sst [smem:[#allocation28_spill]] %s3565_s27  ;;  %s5243_s30 = sadd.s32 4294967294, %s3569_s28  }
  0x18   : > { %p61_p0 = scmp.ne.s32.totalorder %s3561_s26, %s3557_s25  ;;  %p62_p1 = scmp.eq.s32.totalorder %s3676_s29, 0 }
  0x19   : > { %p279_p2 = scmp.eq.s32.totalorder %s3676_s29, 1  ;;  %p285_p3 = scmp.eq.s32.totalorder %s5243_s30, 1 }
  0x1a   : > { %p3687_p4 = por %p62_p1, %p61_p0  ;;  %p3046_p5 = scmp.ge.s32.totalorder %s3569_s28, 1 }
  0x1b   : > { %p3692_p6 = por %p285_p3, %p61_p0  ;;  %p370_p7 = scmp.lt.s32.totalorder %s3569_s28, 3 }
  0x1c   : > { %s5293_s2 = sld [smem:[#allocation71_spill]]  ;;  %s3571_s20 = smov [#allocation7]  }
  0x1d   : > { %s5291_s15 = scalar_select %p3692_p6, 1, 0 }
  0x1e   : > { %p3700_p8 = pnand %p3046_p5, %p370_p7  ;;  %s383_s21 = sshll.u32 %s3571_s20, 4  ;;  %s384_s21 = int_to_ptr.vmem [resolvable:$true] %s383_s21 }
  0x1f   : > { %5292 = sst [smem:[#allocation29_spill]] %s5291_s15  ;;  %s5247_s17 = smov 256  }
  0x20   : > { %p3125_p9 = pneg %p3700_p8  ;;  %s5296_s4 = sld [smem:[#allocation72_spill]] }
  0x21   : > { %s5248_s30 = smov 16   ;;  %s3574_s20 = smov [#allocation8]  }
  0x22   : > { %s381_s18 = sshll.u32 %s5293_s2, 4  ;;  %p3708_p10 = pnand %p3125_p9, %p62_p1  ;;  %s382_s18 = int_to_ptr.hbm [resolvable:$true] %s381_s18 }
  0x23   : > { %s400_s2 = sshll.u32 %s3574_s20, 4  ;;  %s5297_s6 = sld [smem:[#allocation73_spill]]  ;;  %s401_s2 = int_to_ptr.vmem [resolvable:$true] %s400_s2 }
  0x24   : > { %3128 = dma.hbm_to_vmem [thread:$0]  (!%p3708_p10), %s382_s18, 16384, %s384_s21, [#allocation6], %s5247_s17, %s5247_s17, %s5248_s30  }
  0x25   : > { %s5298_s8 = sld [smem:[#allocation74_spill]]  ;;  %s3575_s21 = smov [#allocation10]  }
  0x26   : > { %s398_s16 = sshll.u32 %s5296_s4, 4  ;;  %s417_s25 = sshll.u32 %s3575_s21, 4  ;;  %s399_s16 = int_to_ptr.hbm [resolvable:$true] %s398_s16  ;;  %s418_s25 = int_to_ptr.vmem [resolvable:$true] %s417_s25 }
  0x27   : > { %3131 = dma.hbm_to_vmem [thread:$0]  (!%p3708_p10), %s399_s16, 8192, %s401_s2, [#allocation9], %s5247_s17, %s5247_s17, %s5248_s30  }
  0x28   : > { %s3576_s2 = smov [#allocation11]   ;;  %s3577_s16 = smov 128  }
  0x29   : > { %s415_s13 = sshll.u32 %s5297_s6, 4  ;;  %s434_s15 = sshll.u32 %s3576_s2, 4  ;;  %s416_s13 = int_to_ptr.hbm [resolvable:$true] %s415_s13  ;;  %s435_s15 = int_to_ptr.vmem [resolvable:$true] %s434_s15 }
  0x2a   : > { %3134 = dma.hbm_to_vmem [thread:$0]  (!%p3708_p10), %s416_s13, 8192, %s418_s25, [#allocation9], %s5247_s17, %s5247_s17, %s5248_s30  }
  0x2b   : > { %s432_s18 = sshll.u32 %s5298_s8, 4  ;;  %s3578_s20 = smov 8   ;;  %s433_s18 = int_to_ptr.hbm [resolvable:$true] %s432_s18 }
  0x2c   : > { %3137 = dma.hbm_to_vmem [thread:$0]  (!%p3708_p10), %s433_s18, 4096, %s435_s15, [#allocation12], %s3577_s16, %s3577_s16, %s3578_s20  }
  0x2d   : > { %s3740_s23 = sadd.s32 1, %s3569_s28   ;;  %s48_s21 = sadd.s32 1, %s3565_s27 }
  0x2e   : > { %5299 = sst [smem:[#allocation30_spill]] %s3740_s23  ;;  %s45_s24 = ssub.s32 %s3569_s28, %s3740_s23 }
  0x2f   : > { %p46_p12 = scmp.eq.s32.totalorder %s45_s24, 0  ;;  %p55_p13 = scmp.ne.s32.totalorder %s3565_s27, %s3561_s26 }
  0x30   : > { %p56_p0 = scmp.eq.s32.totalorder %s3569_s28, 0  ;;  %p3162_p7 = scmp.lt.s32.totalorder %s3569_s28, 2 }
  0x31   : > { %s3749_s13 = scalar_select %p46_p12, %s3565_s27, %s48_s21  }
  0x32   : > { %p57_p3 = por %p56_p0, %p55_p13  ;;  %p3753_p5 = por %p279_p2, %p55_p13 }
  0x33   : > { %5300 = sst [smem:[#allocation31_spill]] %s3749_s13  ;;  %s3759_s22 = sand.u32 1, %s3565_s27  }
  0x34   : > { %s3052_s18 = sshll.u32 %s3759_s22, 9  ;;  %s3088_s2 = sshll.u32 %s3569_s28, 9 }
  0x35   : > { %s5302_s0 = sld [smem:[#allocation70_spill]]  ;;  %s455_s24 = scalar_lea.vmem [#allocation2], %s3052_s18 }
  0x36   : > { %s464_s21 = sshll.u32 %s455_s24, 4  ;;  %p3766_p2 = pnand %p3162_p7, %p57_p3  ;;  %s465_s21 = int_to_ptr.vmem [resolvable:$true] %s464_s21 }
  0x37   : > { %s474_s4 = sand.u32 1, %s3569_s28   ;;  %s452_s6 = scalar_lea.sflag [#allocation3], %s3759_s22 }
  0x38   : > { %p3339_p10 = pneg %p3766_p2 }
  0x3b   : > { %s461_s20 = scalar_lea.hbm %s5302_s0, %s3088_s2  ;;  %s3342_s15 = scalar_lea.hbm %s5302_s0, 1024 }
  0x3c   : > { %s462_s17 = sshll.u32 %s461_s20, 4  ;;  %s463_s17 = int_to_ptr.hbm [resolvable:$true] %s462_s17 }
  0x3d   : > { %s3335_s8 = sshra.s32 %s463_s17, 4  ;;  %s3336_s8 = int_to_ptr.hbm [resolvable:$true] %s3335_s8 }
  0x3e   : > { %s3337_s13 = scalar_lea.hbm %s3336_s8, 512  ;;  %p3343_p0 = scmp.lt.s32.totalorder %s3336_s8, %s5302_s0 }
  0x3f   : > { %p3338_p9 = scmp.ne.s32.totalorder %s3336_s8, %s3337_s13  ;;  %p3344_p3 = scmp.lt.s32.totalorder %s3342_s15, %s3337_s13 }
  0x41   : > { %p3340_p12 = pnand %p3339_p10, %p3338_p9  ;;  %p3345_p7 = por %p3344_p3, %p3343_p0 }
  0x43   : > { %p3341_p13 = pneg %p3340_p12 }
  0x45   : > { %p3346_p11 = pnand %p3345_p7, %p3341_p13 }
  0x47   : > { %3349 = shalt.err (!%p3346_p11)
}
  0x48   : > { %s3579_s24 = smov 512   ;;  %s3580_s27 = smov 32  }
  0x49   : > { %3141 = dma.hbm_to_vmem [thread:$0]  (!%p3766_p2), %s463_s17, 8192, %s465_s21, %s452_s6, %s3579_s24, %s3579_s24, %s3580_s27  }
  0x4a   : > { %s3056_s23 = sshll.u32 %s3759_s22, 8  ;;  %s3090_s12 = sshll.u32 %s3569_s28, 8 }
  0x4b   : > { %s484_s10 = scalar_lea.hbm %s5230_s1, %s3090_s12  ;;  %s478_s16 = scalar_lea.vmem [#allocation5], %s3056_s23 }
  0x4c   : > { %s487_s8 = sshll.u32 %s478_s16, 4  ;;  %s485_s13 = sshll.u32 %s484_s10, 4  ;;  %s488_s8 = int_to_ptr.vmem [resolvable:$true] %s487_s8  ;;  %s486_s13 = int_to_ptr.hbm [resolvable:$true] %s485_s13 }
  0x4d   : > { %s475_s15 = scalar_lea.sflag [#allocation6], %s474_s4  ;;  %s3365_s20 = sshra.s32 %s486_s13, 4  ;;  %s3366_s20 = int_to_ptr.hbm [resolvable:$true] %s3365_s20 }
  0x4e   : > { %s3367_s0 = scalar_lea.hbm %s3366_s20, 256  ;;  %s3372_s17 = scalar_lea.hbm %s5230_s1, 512 }
  0x4f   : > { %p3368_p11 = scmp.ne.s32.totalorder %s3366_s20, %s3367_s0  ;;  %p3373_p13 = scmp.lt.s32.totalorder %s3366_s20, %s5230_s1 }
  0x50   : > { %p3374_p0 = scmp.lt.s32.totalorder %s3372_s17, %s3367_s0 }
  0x51   : > { %p3370_p9 = pnand %p3368_p11, %p3339_p10 }
  0x52   : > { %p3375_p3 = por %p3374_p0, %p3373_p13 }
  0x53   : > { %p3371_p12 = pneg %p3370_p9 }
  0x55   : > { %p3376_p7 = pnand %p3375_p3, %p3371_p12 }
  0x57   : > { %3379 = shalt.err (!%p3376_p7)
}
  0x58   : > { %s5304_s4 = smov 16   ;;  %s5305_s10 = smov 256  }
  0x59   : > { %3144 = dma.hbm_to_vmem [thread:$0]  (!%p3766_p2), %s486_s13, 4096, %s488_s8, %s475_s15, %s5305_s10, %s5305_s10, %s5304_s4  }
  0x5a   : > { %499 = sbr.rel (%p3700_p8) target bundleno = 1070 (0x42e), region = 60 }
  0x5f   : > { %s3807_s23 = sand.u32 1, %s3561_s26  }
  0x60   : > { %s3061_s21 = sshll.u32 %s3807_s23, 9  ;;  %s502_s0 = scalar_lea.sflag [#allocation3], %s3807_s23 }
  0x61   : > { %s3811_s24 = scalar_lea.vmem [#allocation2], %s3061_s21 }
  0x62   : > { %3524 = dma.done.wait (%p3687_p4), %s502_s0, 8192  }
  0x63   : > { %3526 = vsyncadd (%p3687_p4), %s502_s0, 4294959104  ;;  %s511_s30 = sand.u32 1, %s3676_s29   ;;  %s3819_s19 = sshll.u32 %s3807_s23, 8 }
  0x64   : > { %s512_s18 = scalar_lea.sflag [#allocation6], %s511_s30  ;;  %s3824_s2 = scalar_lea.vmem [#allocation5], %s3819_s19 }
  0x65   : > { %3528 = dma.done.wait (%p3687_p4), %s512_s18, 4096  }
  0x66   : > { %3530 = vsyncadd (%p3687_p4), %s512_s18, 4294963200 }
  0x67   : > { %3532 = dma.done.wait (%p62_p1), [#allocation6], 16384  }
  0x68   : > { %3534 = vsyncadd (%p62_p1), [#allocation6], 4294950912 }
  0x69   : > { %3536 = dma.done.wait (%p62_p1), [#allocation9], 16384  }
  0x6a   : > { %3538 = vsyncadd (%p62_p1), [#allocation9], 4294950912 }
  0x6b   : > { %3540 = dma.done.wait (%p62_p1), [#allocation12], 4096  }
  0x6c   : > { %3542 = vsyncadd (%p62_p1), [#allocation12], 4294963200  ;;  %v731_v0 = vld [vmem:[#allocation7 + $0xf0] sm:$0xff]  ;;  %v729_v4 = vld [vmem:[#allocation7 + $0xe0] sm:$0xff]  ;;  %s4730_s6 = scalar_lea.vmem [#allocation13], %s3819_s19  ;;  %s4950_s27 = scalar_lea.vmem [#allocation14], %s3819_s19 }
  0x6d   : > { %v763_v1 = vld [vmem:[#allocation7 + $0x1f0] sm:$0xff]  ;;  %835 = vmatpush.msra.mxu0 %v731_v0  ;;  %v761_v5 = vld [vmem:[#allocation7 + $0x1e0] sm:$0xff]  ;;  %s3069_s12 = sshll.u32 %s3807_s23, 7  ;;  %s3092_s10 = sshll.u32 %s3676_s29, 8 }
  0x6e   : > { %v795_v2 = vld [vmem:[#allocation7 + $0x2f0] sm:$0xff]  ;;  %900 = vmatpush.msra.mxu1 %v763_v1  ;;  %v793_v6 = vld [vmem:[#allocation7 + $0x2e0] sm:$0xff]  ;;  %v3846_v1 = vld [vmem:[%s3811_s24 + $0x8] sm:$0xff]  ;;  %s5054_s4 = scalar_lea.vmem [#allocation16], %s3069_s12  ;;  %s2778_s19 = sshll.u32 %s4950_s27, 4  ;;  %s2779_s19 = int_to_ptr.vmem [resolvable:$true] %s2778_s19 }
  0x6f   : > { %v827_v3 = vld [vmem:[#allocation7 + $0x3f0] sm:$0xff]  ;;  %965 = vmatpush.msra.mxu2 %v795_v2  ;;  %v825_v7 = vld [vmem:[#allocation7 + $0x3e0] sm:$0xff]  ;;  %836 = vmatpush.msra.mxu0 %v729_v4  ;;  %v796_v4 = vld [vmem:[#allocation7 + $0x2f8] sm:$0xff]  ;;  %s3415_s15 = scalar_lea.hbm %s5240_s11, 512 }
  0x70   : > { %1030 = vmatpush.msra.mxu3 %v827_v3  ;;  %v727_v8 = vld [vmem:[#allocation7 + $0xd0] sm:$0xff]  ;;  %901 = vmatpush.msra.mxu1 %v761_v5  ;;  %v725_v12 = vld [vmem:[#allocation7 + $0xc0] sm:$0xff]  ;;  %v3852_v3 = vld [vmem:[%s3811_s24 + $0x18] sm:$0xff] }
  0x71   : > { %v759_v9 = vld [vmem:[#allocation7 + $0x1d0] sm:$0xff]  ;;  %966 = vmatpush.msra.mxu2 %v793_v6  ;;  %v757_v13 = vld [vmem:[#allocation7 + $0x1c0] sm:$0xff]  ;;  %837 = vmatpush.msra.mxu0 %v727_v8  ;;  %v828_v5 = vld [vmem:[#allocation7 + $0x3f8] sm:$0xff] }
  0x72   : > { %v791_v10 = vld [vmem:[#allocation7 + $0x2d0] sm:$0xff]  ;;  %1031 = vmatpush.msra.mxu3 %v825_v7  ;;  %902 = vmatpush.msra.mxu1 %v759_v9  ;;  %v789_v14 = vld [vmem:[#allocation7 + $0x2c0] sm:$0xff]  ;;  %v732_v6 = vld [vmem:[#allocation7 + $0xf8] sm:$0xff] }
  0x73   : > { %v823_v11 = vld [vmem:[#allocation7 + $0x3d0] sm:$0xff]  ;;  %v821_v15 = vld [vmem:[#allocation7 + $0x3c0] sm:$0xff]  ;;  %967 = vmatpush.msra.mxu2 %v791_v10  ;;  %838 = vmatpush.msra.mxu0 %v725_v12  ;;  %v764_v7 = vld [vmem:[#allocation7 + $0x1f8] sm:$0xff] }
  0x74   : > { %1032 = vmatpush.msra.mxu3 %v823_v11  ;;  %v723_v16 = vld [vmem:[#allocation7 + $0xb0] sm:$0xff]  ;;  %903 = vmatpush.msra.mxu1 %v757_v13  ;;  %v721_v20 = vld [vmem:[#allocation7 + $0xa0] sm:$0xff]  ;;  %v794_v8 = vld [vmem:[#allocation7 + $0x2e8] sm:$0xff] }
  0x75   : > { %v755_v17 = vld [vmem:[#allocation7 + $0x1b0] sm:$0xff]  ;;  %968 = vmatpush.msra.mxu2 %v789_v14  ;;  %v753_v21 = vld [vmem:[#allocation7 + $0x1a0] sm:$0xff]  ;;  %839 = vmatpush.msra.mxu0 %v723_v16  ;;  %v826_v9 = vld [vmem:[#allocation7 + $0x3e8] sm:$0xff] }
  0x76   : > { %v787_v18 = vld [vmem:[#allocation7 + $0x2b0] sm:$0xff]  ;;  %1033 = vmatpush.msra.mxu3 %v821_v15  ;;  %904 = vmatpush.msra.mxu1 %v755_v17  ;;  %v785_v22 = vld [vmem:[#allocation7 + $0x2a0] sm:$0xff]  ;;  %v730_v10 = vld [vmem:[#allocation7 + $0xe8] sm:$0xff] }
  0x77   : > { %v819_v19 = vld [vmem:[#allocation7 + $0x3b0] sm:$0xff]  ;;  %v817_v23 = vld [vmem:[#allocation7 + $0x3a0] sm:$0xff]  ;;  %969 = vmatpush.msra.mxu2 %v787_v18  ;;  %840 = vmatpush.msra.mxu0 %v721_v20  ;;  %v762_v11 = vld [vmem:[#allocation7 + $0x1e8] sm:$0xff] }
  0x78   : > { %1034 = vmatpush.msra.mxu3 %v819_v19  ;;  %v719_v24 = vld [vmem:[#allocation7 + $0x90] sm:$0xff]  ;;  %905 = vmatpush.msra.mxu1 %v753_v21  ;;  %v717_v28 = vld [vmem:[#allocation7 + $0x80] sm:$0xff]  ;;  %v792_v12 = vld [vmem:[#allocation7 + $0x2d8] sm:$0xff] }
  0x79   : > { %v751_v25 = vld [vmem:[#allocation7 + $0x190] sm:$0xff]  ;;  %970 = vmatpush.msra.mxu2 %v785_v22  ;;  %v749_v29 = vld [vmem:[#allocation7 + $0x180] sm:$0xff]  ;;  %841 = vmatpush.msra.mxu0 %v719_v24  ;;  %v824_v13 = vld [vmem:[#allocation7 + $0x3d8] sm:$0xff] }
  0x7a   : > { %v783_v26 = vld [vmem:[#allocation7 + $0x290] sm:$0xff]  ;;  %1035 = vmatpush.msra.mxu3 %v817_v23  ;;  %906 = vmatpush.msra.mxu1 %v751_v25  ;;  %v781_v30 = vld [vmem:[#allocation7 + $0x280] sm:$0xff]  ;;  %v728_v14 = vld [vmem:[#allocation7 + $0xd8] sm:$0xff] }
  0x7b   : > { %v815_v27 = vld [vmem:[#allocation7 + $0x390] sm:$0xff]  ;;  %v813_v31 = vld [vmem:[#allocation7 + $0x380] sm:$0xff]  ;;  %971 = vmatpush.msra.mxu2 %v783_v26  ;;  %842 = vmatpush.msra.mxu0 %v717_v28  ;;  %v760_v15 = vld [vmem:[#allocation7 + $0x1d8] sm:$0xff] }
  0x7c   : > { %1036 = vmatpush.msra.mxu3 %v815_v27  ;;  %v715_v32 = vld [vmem:[#allocation7 + $0x70] sm:$0xff]  ;;  %907 = vmatpush.msra.mxu1 %v749_v29  ;;  %v713_v36 = vld [vmem:[#allocation7 + $0x60] sm:$0xff]  ;;  %v3862_v17 = vld [vmem:[%s3811_s24 + $0x28] sm:$0xff] }
  0x7d   : > { %v747_v33 = vld [vmem:[#allocation7 + $0x170] sm:$0xff]  ;;  %972 = vmatpush.msra.mxu2 %v781_v30  ;;  %v745_v37 = vld [vmem:[#allocation7 + $0x160] sm:$0xff]  ;;  %843 = vmatpush.msra.mxu0 %v715_v32  ;;  %v3868_v19 = vld [vmem:[%s3811_s24 + $0x38] sm:$0xff] }
  0x7e   : > { %v779_v34 = vld [vmem:[#allocation7 + $0x270] sm:$0xff]  ;;  %1037 = vmatpush.msra.mxu3 %v813_v31  ;;  %908 = vmatpush.msra.mxu1 %v747_v33  ;;  %v777_v38 = vld [vmem:[#allocation7 + $0x260] sm:$0xff]  ;;  %v790_v20 = vld [vmem:[#allocation7 + $0x2c8] sm:$0xff] }
  0x7f   : > { %v811_v35 = vld [vmem:[#allocation7 + $0x370] sm:$0xff]  ;;  %v809_v39 = vld [vmem:[#allocation7 + $0x360] sm:$0xff]  ;;  %973 = vmatpush.msra.mxu2 %v779_v34  ;;  %844 = vmatpush.msra.mxu0 %v713_v36  ;;  %v822_v21 = vld [vmem:[#allocation7 + $0x3c8] sm:$0xff] }
  0x80   : > { %1038 = vmatpush.msra.mxu3 %v811_v35  ;;  %v711_v40 = vld [vmem:[#allocation7 + $0x50] sm:$0xff]  ;;  %909 = vmatpush.msra.mxu1 %v745_v37  ;;  %v709_v44 = vld [vmem:[#allocation7 + $0x40] sm:$0xff]  ;;  %v726_v22 = vld [vmem:[#allocation7 + $0xc8] sm:$0xff] }
  0x81   : > { %v743_v41 = vld [vmem:[#allocation7 + $0x150] sm:$0xff]  ;;  %974 = vmatpush.msra.mxu2 %v777_v38  ;;  %v741_v45 = vld [vmem:[#allocation7 + $0x140] sm:$0xff]  ;;  %845 = vmatpush.msra.mxu0 %v711_v40  ;;  %v758_v23 = vld [vmem:[#allocation7 + $0x1c8] sm:$0xff] }
  0x82   : > { %v775_v42 = vld [vmem:[#allocation7 + $0x250] sm:$0xff]  ;;  %1039 = vmatpush.msra.mxu3 %v809_v39  ;;  %910 = vmatpush.msra.mxu1 %v743_v41  ;;  %v773_v46 = vld [vmem:[#allocation7 + $0x240] sm:$0xff]  ;;  %v788_v24 = vld [vmem:[#allocation7 + $0x2b8] sm:$0xff] }
  0x83   : > { %v807_v43 = vld [vmem:[#allocation7 + $0x350] sm:$0xff]  ;;  %v805_v47 = vld [vmem:[#allocation7 + $0x340] sm:$0xff]  ;;  %975 = vmatpush.msra.mxu2 %v775_v42  ;;  %846 = vmatpush.msra.mxu0 %v709_v44  ;;  %v820_v25 = vld [vmem:[#allocation7 + $0x3b8] sm:$0xff] }
  0x84   : > { %1040 = vmatpush.msra.mxu3 %v807_v43  ;;  %v707_v48 = vld [vmem:[#allocation7 + $0x30] sm:$0xff]  ;;  %911 = vmatpush.msra.mxu1 %v741_v45  ;;  %v705_v52 = vld [vmem:[#allocation7 + $0x20] sm:$0xff]  ;;  %v724_v26 = vld [vmem:[#allocation7 + $0xb8] sm:$0xff] }
  0x85   : > { %v739_v49 = vld [vmem:[#allocation7 + $0x130] sm:$0xff]  ;;  %976 = vmatpush.msra.mxu2 %v773_v46  ;;  %v737_v53 = vld [vmem:[#allocation7 + $0x120] sm:$0xff]  ;;  %847 = vmatpush.msra.mxu0 %v707_v48  ;;  %v756_v27 = vld [vmem:[#allocation7 + $0x1b8] sm:$0xff] }
  0x86   : > { %v771_v50 = vld [vmem:[#allocation7 + $0x230] sm:$0xff]  ;;  %1041 = vmatpush.msra.mxu3 %v805_v47  ;;  %912 = vmatpush.msra.mxu1 %v739_v49  ;;  %v769_v54 = vld [vmem:[#allocation7 + $0x220] sm:$0xff]  ;;  %v786_v28 = vld [vmem:[#allocation7 + $0x2a8] sm:$0xff] }
  0x87   : > { %v803_v51 = vld [vmem:[#allocation7 + $0x330] sm:$0xff]  ;;  %v801_v55 = vld [vmem:[#allocation7 + $0x320] sm:$0xff]  ;;  %977 = vmatpush.msra.mxu2 %v771_v50  ;;  %848 = vmatpush.msra.mxu0 %v705_v52  ;;  %v818_v29 = vld [vmem:[#allocation7 + $0x3a8] sm:$0xff] }
  0x88   : > { %1042 = vmatpush.msra.mxu3 %v803_v51  ;;  %v703_v56 = vld [vmem:[#allocation7 + $0x10] sm:$0xff]  ;;  %913 = vmatpush.msra.mxu1 %v737_v53  ;;  %v701_v60 = vld [vmem:[#allocation7] sm:$0xff]  ;;  %v722_v30 = vld [vmem:[#allocation7 + $0xa8] sm:$0xff] }
  0x89   : > { %v735_v57 = vld [vmem:[#allocation7 + $0x110] sm:$0xff]  ;;  %978 = vmatpush.msra.mxu2 %v769_v54  ;;  %v733_v61 = vld [vmem:[#allocation7 + $0x100] sm:$0xff]  ;;  %849 = vmatpush.msra.mxu0 %v703_v56  ;;  %v754_v31 = vld [vmem:[#allocation7 + $0x1a8] sm:$0xff] }
  0x8a   : > { %v767_v58 = vld [vmem:[#allocation7 + $0x210] sm:$0xff]  ;;  %1043 = vmatpush.msra.mxu3 %v801_v55  ;;  %914 = vmatpush.msra.mxu1 %v735_v57  ;;  %v765_v62 = vld [vmem:[#allocation7 + $0x200] sm:$0xff]  ;;  %v3878_v33 = vld [vmem:[%s3811_s24 + $0x48] sm:$0xff] }
  0x8b   : > { %v799_v59 = vld [vmem:[#allocation7 + $0x310] sm:$0xff]  ;;  %v797_v63 = vld [vmem:[#allocation7 + $0x300] sm:$0xff]  ;;  %979 = vmatpush.msra.mxu2 %v767_v58  ;;  %850 = vmatpush.msra.mxu0 %v701_v60  ;;  %v3884_v35 = vld [vmem:[%s3811_s24 + $0x58] sm:$0xff] }
  0x8c   : > { %1044 = vmatpush.msra.mxu3 %v799_v59  ;;  %v3843_v0 = vld [vmem:[%s3811_s24] sm:$0xff]  ;;  %915 = vmatpush.msra.mxu1 %v733_v61  ;;  %v3849_v2 = vld [vmem:[%s3811_s24 + $0x10] sm:$0xff]  ;;  %v784_v36 = vld [vmem:[#allocation7 + $0x298] sm:$0xff] }
  0x8d   : > { %980 = vmatpush.msra.mxu2 %v765_v62  ;;  %851 = vmatmul.f32.vlgmr.msra.gmra.mxu0 %v3843_v0  ;;  %v3859_v16 = vld [vmem:[%s3811_s24 + $0x20] sm:$0xff]  ;;  %v3865_v18 = vld [vmem:[%s3811_s24 + $0x30] sm:$0xff]  ;;  %v816_v37 = vld [vmem:[#allocation7 + $0x398] sm:$0xff] }
  0x8e   : > { %1045 = vmatpush.msra.mxu3 %v797_v63  ;;  %916 = vmatmul.f32.vlgmr.msra.gmra.mxu1 %v3846_v1  ;;  %v3875_v32 = vld [vmem:[%s3811_s24 + $0x40] sm:$0xff]  ;;  %v3881_v34 = vld [vmem:[%s3811_s24 + $0x50] sm:$0xff]  ;;  %v720_v38 = vld [vmem:[#allocation7 + $0x98] sm:$0xff] }
  0x8f   : > { %981 = vmatmul.f32.vlgmr.msra.gmra.mxu2 %v3849_v2  ;;  %1046 = vmatmul.f32.vlgmr.msra.gmra.mxu3 %v3852_v3  ;;  %v752_v39 = vld [vmem:[#allocation7 + $0x198] sm:$0xff]  ;;  %v3891_v40 = vld [vmem:[%s3811_s24 + $0x60] sm:$0xff]  ;;  %v3894_v41 = vld [vmem:[%s3811_s24 + $0x68] sm:$0xff] }
  0x90   : > { %1225 = vmatpush.msrb.mxu2 %v796_v4  ;;  %1290 = vmatpush.msrb.mxu3 %v828_v5  ;;  %v3897_v42 = vld [vmem:[%s3811_s24 + $0x70] sm:$0xff]  ;;  %v3900_v43 = vld [vmem:[%s3811_s24 + $0x78] sm:$0xff]  ;;  %v782_v44 = vld [vmem:[#allocation7 + $0x288] sm:$0xff] }
  0x91   : > { %1095 = vmatpush.msrb.mxu0 %v732_v6  ;;  %1160 = vmatpush.msrb.mxu1 %v764_v7  ;;  %v814_v45 = vld [vmem:[#allocation7 + $0x388] sm:$0xff]  ;;  %v3907_v48 = vld [vmem:[%s3811_s24 + $0x80] sm:$0xff]  ;;  %v3913_v50 = vld [vmem:[%s3811_s24 + $0x90] sm:$0xff] }
  0x92   : > { %1226 = vmatpush.msrb.mxu2 %v794_v8  ;;  %1291 = vmatpush.msrb.mxu3 %v826_v9  ;;  %v718_v46 = vld [vmem:[#allocation7 + $0x88] sm:$0xff]  ;;  %v3916_v51 = vld [vmem:[%s3811_s24 + $0x98] sm:$0xff]  ;;  %v3923_v56 = vld [vmem:[%s3811_s24 + $0xa0] sm:$0xff] }
  0x93   : > { %1096 = vmatpush.msrb.mxu0 %v730_v10  ;;  %1161 = vmatpush.msrb.mxu1 %v762_v11  ;;  %v750_v47 = vld [vmem:[#allocation7 + $0x188] sm:$0xff]  ;;  %v780_v52 = vld [vmem:[#allocation7 + $0x278] sm:$0xff]  ;;  %v3929_v58 = vld [vmem:[%s3811_s24 + $0xb0] sm:$0xff] }
  0x94   : > { %1227 = vmatpush.msrb.mxu2 %v792_v12  ;;  %1292 = vmatpush.msrb.mxu3 %v824_v13  ;;  %v3910_v49 = vld [vmem:[%s3811_s24 + $0x88] sm:$0xff]  ;;  %v812_v53 = vld [vmem:[#allocation7 + $0x378] sm:$0xff]  ;;  %v3939_v4 = vld [vmem:[%s3811_s24 + $0xc0] sm:$0xff] }
  0x95   : > { %1097 = vmatpush.msrb.mxu0 %v728_v14  ;;  %1162 = vmatpush.msrb.mxu1 %v760_v15  ;;  %v716_v54 = vld [vmem:[#allocation7 + $0x78] sm:$0xff]  ;;  %v3926_v57 = vld [vmem:[%s3811_s24 + $0xa8] sm:$0xff]  ;;  %v3945_v6 = vld [vmem:[%s3811_s24 + $0xd0] sm:$0xff] }
  0x96   : > { %854 = vmatmul.f32.gmra.mxu0 %v3859_v16  ;;  %919 = vmatmul.f32.gmra.mxu1 %v3862_v17  ;;  %v748_v55 = vld [vmem:[#allocation7 + $0x178] sm:$0xff]  ;;  %v778_v60 = vld [vmem:[#allocation7 + $0x268] sm:$0xff]  ;;  %v3955_v12 = vld [vmem:[%s3811_s24 + $0xe0] sm:$0xff] }
  0x97   : > { %984 = vmatmul.f32.gmra.mxu2 %v3865_v18  ;;  %1049 = vmatmul.f32.gmra.mxu3 %v3868_v19  ;;  %v3932_v59 = vld [vmem:[%s3811_s24 + $0xb8] sm:$0xff]  ;;  %v810_v61 = vld [vmem:[#allocation7 + $0x368] sm:$0xff]  ;;  %v3961_v14 = vld [vmem:[%s3811_s24 + $0xf0] sm:$0xff] }
  0x98   : > { %1228 = vmatpush.msrb.mxu2 %v790_v20  ;;  %1293 = vmatpush.msrb.mxu3 %v822_v21  ;;  %v714_v62 = vld [vmem:[#allocation7 + $0x68] sm:$0xff]  ;;  %v3948_v7 = vld [vmem:[%s3811_s24 + $0xd8] sm:$0xff] }
  0x99   : > { %1098 = vmatpush.msrb.mxu0 %v726_v22  ;;  %1163 = vmatpush.msrb.mxu1 %v758_v23  ;;  %v746_v63 = vld [vmem:[#allocation7 + $0x168] sm:$0xff]  ;;  %v776_v8 = vld [vmem:[#allocation7 + $0x258] sm:$0xff] }
  0x9a   : > { %1229 = vmatpush.msrb.mxu2 %v788_v24  ;;  %1294 = vmatpush.msrb.mxu3 %v820_v25  ;;  %v3942_v5 = vld [vmem:[%s3811_s24 + $0xc8] sm:$0xff]  ;;  %v808_v9 = vld [vmem:[#allocation7 + $0x358] sm:$0xff]  ;;  %v3971_v24 = vld [vmem:[%s3811_s24 + $0x100] sm:$0xff] }
  0x9b   : > { %1099 = vmatpush.msrb.mxu0 %v724_v26  ;;  %1164 = vmatpush.msrb.mxu1 %v756_v27  ;;  %v712_v10 = vld [vmem:[#allocation7 + $0x58] sm:$0xff]  ;;  %v3958_v13 = vld [vmem:[%s3811_s24 + $0xe8] sm:$0xff]  ;;  %v3977_v26 = vld [vmem:[%s3811_s24 + $0x110] sm:$0xff] }
  0x9c   : > { %1230 = vmatpush.msrb.mxu2 %v786_v28  ;;  %1295 = vmatpush.msrb.mxu3 %v818_v29  ;;  %v744_v11 = vld [vmem:[#allocation7 + $0x158] sm:$0xff]  ;;  %v774_v20 = vld [vmem:[#allocation7 + $0x248] sm:$0xff] }
  0x9d   : > { %1100 = vmatpush.msrb.mxu0 %v722_v30  ;;  %1165 = vmatpush.msrb.mxu1 %v754_v31  ;;  %v3964_v15 = vld [vmem:[%s3811_s24 + $0xf8] sm:$0xff]  ;;  %v806_v21 = vld [vmem:[#allocation7 + $0x348] sm:$0xff] }
  0x9e   : > { %857 = vmatmul.f32.gmra.mxu0 %v3875_v32  ;;  %922 = vmatmul.f32.gmra.mxu1 %v3878_v33  ;;  %v710_v22 = vld [vmem:[#allocation7 + $0x48] sm:$0xff]  ;;  %v3980_v27 = vld [vmem:[%s3811_s24 + $0x118] sm:$0xff] }
  0x9f   : > { %987 = vmatmul.f32.gmra.mxu2 %v3881_v34  ;;  %1052 = vmatmul.f32.gmra.mxu3 %v3884_v35  ;;  %v742_v23 = vld [vmem:[#allocation7 + $0x148] sm:$0xff]  ;;  %v772_v28 = vld [vmem:[#allocation7 + $0x238] sm:$0xff] }
  0xa0   : > { %1231 = vmatpush.msrb.mxu2 %v784_v36  ;;  %1296 = vmatpush.msrb.mxu3 %v816_v37  ;;  %v3974_v25 = vld [vmem:[%s3811_s24 + $0x108] sm:$0xff]  ;;  %v804_v29 = vld [vmem:[#allocation7 + $0x338] sm:$0xff]  ;;  %v3987_v36 = vld [vmem:[%s3811_s24 + $0x120] sm:$0xff] }
  0xa1   : > { %1101 = vmatpush.msrb.mxu0 %v720_v38  ;;  %1166 = vmatpush.msrb.mxu1 %v752_v39  ;;  %v708_v30 = vld [vmem:[#allocation7 + $0x38] sm:$0xff]  ;;  %v3990_v37 = vld [vmem:[%s3811_s24 + $0x128] sm:$0xff]  ;;  %v3993_v38 = vld [vmem:[%s3811_s24 + $0x130] sm:$0xff] }
  0xa2   : > { %1232 = vmatpush.msrb.mxu2 %v782_v44  ;;  %1297 = vmatpush.msrb.mxu3 %v814_v45  ;;  %v740_v31 = vld [vmem:[#allocation7 + $0x138] sm:$0xff]  ;;  %v770_v44 = vld [vmem:[#allocation7 + $0x228] sm:$0xff] }
  0xa3   : > { %1102 = vmatpush.msrb.mxu0 %v718_v46  ;;  %1167 = vmatpush.msrb.mxu1 %v750_v47  ;;  %v3996_v39 = vld [vmem:[%s3811_s24 + $0x138] sm:$0xff]  ;;  %v802_v45 = vld [vmem:[#allocation7 + $0x328] sm:$0xff] }
  0xa4   : > { %1233 = vmatpush.msrb.mxu2 %v780_v52  ;;  %1298 = vmatpush.msrb.mxu3 %v812_v53  ;;  %v706_v46 = vld [vmem:[#allocation7 + $0x28] sm:$0xff]  ;;  %v4003_v52 = vld [vmem:[%s3811_s24 + $0x140] sm:$0xff] }
  0xa5   : > { %1103 = vmatpush.msrb.mxu0 %v716_v54  ;;  %1168 = vmatpush.msrb.mxu1 %v748_v55  ;;  %v738_v47 = vld [vmem:[#allocation7 + $0x128] sm:$0xff]  ;;  %v4009_v54 = vld [vmem:[%s3811_s24 + $0x150] sm:$0xff]  ;;  %v4012_v55 = vld [vmem:[%s3811_s24 + $0x158] sm:$0xff] }
  0xa6   : > { %860 = vmatmul.f32.gmra.mxu0 %v3891_v40  ;;  %925 = vmatmul.f32.gmra.mxu1 %v3894_v41  ;;  %v4006_v53 = vld [vmem:[%s3811_s24 + $0x148] sm:$0xff] }
  0xa7   : > { %990 = vmatmul.f32.gmra.mxu2 %v3897_v42  ;;  %1055 = vmatmul.f32.gmra.mxu3 %v3900_v43 }
  0xa8   : > { %1234 = vmatpush.msrb.mxu2 %v778_v60  ;;  %1299 = vmatpush.msrb.mxu3 %v810_v61  ;;  %v768_v60 = vld [vmem:[#allocation7 + $0x218] sm:$0xff] }
  0xa9   : > { %1104 = vmatpush.msrb.mxu0 %v714_v62  ;;  %1169 = vmatpush.msrb.mxu1 %v746_v63  ;;  %v800_v61 = vld [vmem:[#allocation7 + $0x318] sm:$0xff] }
  0xaa   : > { %1235 = vmatpush.msrb.mxu2 %v776_v8  ;;  %1300 = vmatpush.msrb.mxu3 %v808_v9  ;;  %v704_v62 = vld [vmem:[#allocation7 + $0x18] sm:$0xff]  ;;  %v4019_v8 = vld [vmem:[%s3811_s24 + $0x160] sm:$0xff]  ;;  %v4022_v9 = vld [vmem:[%s3811_s24 + $0x168] sm:$0xff] }
  0xab   : > { %1105 = vmatpush.msrb.mxu0 %v712_v10  ;;  %1170 = vmatpush.msrb.mxu1 %v744_v11  ;;  %v736_v63 = vld [vmem:[#allocation7 + $0x118] sm:$0xff]  ;;  %v4025_v10 = vld [vmem:[%s3811_s24 + $0x170] sm:$0xff] }
  0xac   : > { %1236 = vmatpush.msrb.mxu2 %v774_v20  ;;  %1301 = vmatpush.msrb.mxu3 %v806_v21  ;;  %v4028_v11 = vld [vmem:[%s3811_s24 + $0x178] sm:$0xff]  ;;  %v766_v20 = vld [vmem:[#allocation7 + $0x208] sm:$0xff] }
  0xad   : > { %1106 = vmatpush.msrb.mxu0 %v710_v22  ;;  %1171 = vmatpush.msrb.mxu1 %v742_v23  ;;  %v798_v21 = vld [vmem:[#allocation7 + $0x308] sm:$0xff]  ;;  %v4035_v23 = vld [vmem:[%s3811_s24 + $0x180] sm:$0xff] }
  0xae   : > { %863 = vmatmul.f32.gmra.mxu0 %v3907_v48  ;;  %928 = vmatmul.f32.gmra.mxu1 %v3910_v49  ;;  %v702_v22 = vld [vmem:[#allocation7 + $0x8] sm:$0xff] }
  0xaf   : > { %993 = vmatmul.f32.gmra.mxu2 %v3913_v50  ;;  %1058 = vmatmul.f32.gmra.mxu3 %v3916_v51 }
  0xb0   : > { %1237 = vmatpush.msrb.mxu2 %v772_v28  ;;  %1302 = vmatpush.msrb.mxu3 %v804_v29  ;;  %v4038_v28 = vld [vmem:[%s3811_s24 + $0x188] sm:$0xff]  ;;  %v4041_v29 = vld [vmem:[%s3811_s24 + $0x190] sm:$0xff] }
  0xb1   : > { %1107 = vmatpush.msrb.mxu0 %v708_v30  ;;  %1172 = vmatpush.msrb.mxu1 %v740_v31  ;;  %v4044_v30 = vld [vmem:[%s3811_s24 + $0x198] sm:$0xff]  ;;  %v734_v31 = vld [vmem:[#allocation7 + $0x108] sm:$0xff] }
  0xb2   : > { %1238 = vmatpush.msrb.mxu2 %v770_v44  ;;  %1303 = vmatpush.msrb.mxu3 %v802_v45  ;;  %v1418_v44 = vld [vmem:[#allocation8 + $0xf8] sm:$0xff] }
  0xb3   : > { %1108 = vmatpush.msrb.mxu0 %v706_v46  ;;  %1173 = vmatpush.msrb.mxu1 %v738_v47  ;;  %v1450_v45 = vld [vmem:[#allocation8 + $0x1f8] sm:$0xff]  ;;  %v4051_v46 = vld [vmem:[%s3811_s24 + $0x1a0] sm:$0xff]  ;;  %v4054_v47 = vld [vmem:[%s3811_s24 + $0x1a8] sm:$0xff] }
  0xb4   : > { %1239 = vmatpush.msrb.mxu2 %v768_v60  ;;  %1304 = vmatpush.msrb.mxu3 %v800_v61  ;;  %5306 = vst [vmem:[#allocation32_spill] sm:$0xff] %v4051_v46  ;;  %v4057_v60 = vld [vmem:[%s3811_s24 + $0x1b0] sm:$0xff]  ;;  %v4060_v61 = vld [vmem:[%s3811_s24 + $0x1b8] sm:$0xff] }
  0xb5   : > { %1109 = vmatpush.msrb.mxu0 %v704_v62  ;;  %1174 = vmatpush.msrb.mxu1 %v736_v63  ;;  %5307 = vst [vmem:[#allocation33_spill] sm:$0xff] %v4054_v47  ;;  %v1417_v62 = vld [vmem:[#allocation8 + $0xf0] sm:$0xff] }
  0xb6   : > { %866 = vmatmul.f32.gmra.mxu0 %v3923_v56  ;;  %931 = vmatmul.f32.gmra.mxu1 %v3926_v57  ;;  %5308 = vst [vmem:[#allocation34_spill] sm:$0xff] %v4057_v60  ;;  %v1449_v63 = vld [vmem:[#allocation8 + $0x1f0] sm:$0xff] }
  0xb7   : > { %996 = vmatmul.f32.gmra.mxu2 %v3929_v58  ;;  %1061 = vmatmul.f32.gmra.mxu3 %v3932_v59  ;;  %5309 = vst [vmem:[#allocation35_spill] sm:$0xff] %v4060_v61 }
  0xb8   : > { %1240 = vmatpush.msrb.mxu2 %v766_v20  ;;  %1305 = vmatpush.msrb.mxu3 %v798_v21  ;;  %v1416_v20 = vld [vmem:[#allocation8 + $0xe8] sm:$0xff] }
  0xb9   : > { %1110 = vmatpush.msrb.mxu0 %v702_v22  ;;  %1175 = vmatpush.msrb.mxu1 %v734_v31  ;;  %v1448_v21 = vld [vmem:[#allocation8 + $0x1e8] sm:$0xff]  ;;  %v4067_v22 = vld [vmem:[%s3811_s24 + $0x1c0] sm:$0xff] }
  0xba   : > { %1587 = vmatpush.msra.mxu2 %v1418_v44  ;;  %1652 = vmatpush.msra.mxu3 %v1450_v45  ;;  %5310 = vst [vmem:[#allocation36_spill] sm:$0xff] %v4067_v22  ;;  %v4070_v31 = vld [vmem:[%s3811_s24 + $0x1c8] sm:$0xff]  ;;  %v4073_v44 = vld [vmem:[%s3811_s24 + $0x1d0] sm:$0xff]  ;;  %v4076_v45 = vld [vmem:[%s3811_s24 + $0x1d8] sm:$0xff] }
  0xbb   : > { %1457 = vmatpush.msra.mxu0 %v1417_v62  ;;  %1522 = vmatpush.msra.mxu1 %v1449_v63  ;;  %5311 = vst [vmem:[#allocation37_spill] sm:$0xff] %v4070_v31  ;;  %v1415_v62 = vld [vmem:[#allocation8 + $0xe0] sm:$0xff] }
  0xbc   : > { %1588 = vmatpush.msra.mxu2 %v1416_v20  ;;  %1653 = vmatpush.msra.mxu3 %v1448_v21  ;;  %5312 = vst [vmem:[#allocation38_spill] sm:$0xff] %v4073_v44  ;;  %v1447_v63 = vld [vmem:[#allocation8 + $0x1e0] sm:$0xff]  ;;  %v1414_v20 = vld [vmem:[#allocation8 + $0xd8] sm:$0xff] }
  0xbd   : > { %5313 = vst [vmem:[#allocation39_spill] sm:$0xff] %v4076_v45  ;;  %1458 = vmatpush.msra.mxu0 %v1415_v62  ;;  %1523 = vmatpush.msra.mxu1 %v1447_v63  ;;  %v1446_v21 = vld [vmem:[#allocation8 + $0x1d8] sm:$0xff]  ;;  %v1413_v62 = vld [vmem:[#allocation8 + $0xd0] sm:$0xff] }
  0xbe   : > { %869 = vmatmul.f32.gmra.mxu0 %v3939_v4  ;;  %934 = vmatmul.f32.gmra.mxu1 %v3942_v5  ;;  %v1445_v63 = vld [vmem:[#allocation8 + $0x1d0] sm:$0xff] }
  0xbf   : > { %999 = vmatmul.f32.gmra.mxu2 %v3945_v6  ;;  %1064 = vmatmul.f32.gmra.mxu3 %v3948_v7 }
  0xc0   : > { %1589 = vmatpush.msra.mxu2 %v1414_v20  ;;  %1654 = vmatpush.msra.mxu3 %v1446_v21  ;;  %v1412_v20 = vld [vmem:[#allocation8 + $0xc8] sm:$0xff] }
  0xc1   : > { %1459 = vmatpush.msra.mxu0 %v1413_v62  ;;  %1524 = vmatpush.msra.mxu1 %v1445_v63  ;;  %v1410_v62 = vld [vmem:[#allocation8 + $0xb8] sm:$0xff] }
  0xc2   : > { %1590 = vmatpush.msra.mxu2 %v1412_v20  ;;  %v1442_v63 = vld [vmem:[#allocation8 + $0x1b8] sm:$0xff] }
  0xc4   : > { %1591 = vmatpush.msra.mxu2 %v1410_v62 }
  0xc6   : > { %872 = vmatmul.f32.gmra.mxu0 %v3955_v12  ;;  %937 = vmatmul.f32.gmra.mxu1 %v3958_v13 }
  0xc7   : > { %1002 = vmatmul.f32.gmra.mxu2 %v3961_v14  ;;  %1067 = vmatmul.f32.gmra.mxu3 %v3964_v15 }
  0xce   : > { %875 = vmatmul.f32.gmra.mxu0 %v3971_v24  ;;  %940 = vmatmul.f32.gmra.mxu1 %v3974_v25 }
  0xcf   : > { %1005 = vmatmul.f32.gmra.mxu2 %v3977_v26  ;;  %1070 = vmatmul.f32.gmra.mxu3 %v3980_v27 }
  0xd6   : > { %878 = vmatmul.f32.gmra.mxu0 %v3987_v36  ;;  %943 = vmatmul.f32.gmra.mxu1 %v3990_v37 }
  0xd7   : > { %1008 = vmatmul.f32.gmra.mxu2 %v3993_v38  ;;  %1073 = vmatmul.f32.gmra.mxu3 %v3996_v39 }
  0xde   : > { %881 = vmatmul.f32.gmra.mxu0 %v4003_v52  ;;  %946 = vmatmul.f32.gmra.mxu1 %v4006_v53 }
  0xdf   : > { %1011 = vmatmul.f32.gmra.mxu2 %v4009_v54  ;;  %1076 = vmatmul.f32.gmra.mxu3 %v4012_v55 }
  0xe6   : > { %884 = vmatmul.f32.gmra.mxu0 %v4019_v8  ;;  %949 = vmatmul.f32.gmra.mxu1 %v4022_v9 }
  0xe7   : > { %1014 = vmatmul.f32.gmra.mxu2 %v4025_v10  ;;  %1079 = vmatmul.f32.gmra.mxu3 %v4028_v11 }
  0xee   : > { %887 = vmatmul.f32.gmra.mxu0 %v4035_v23  ;;  %952 = vmatmul.f32.gmra.mxu1 %v4038_v28 }
  0xef   : > { %1017 = vmatmul.f32.gmra.mxu2 %v4041_v29  ;;  %1082 = vmatmul.f32.gmra.mxu3 %v4044_v30 }
  0xf6   : > { %890 = vmatmul.f32.gmra.mxu0 %v4051_v46  ;;  %955 = vmatmul.f32.gmra.mxu1 %v4054_v47  ;;  %v4089_v47 = vld [vmem:[%s3811_s24 + $0x1f0] sm:$0xff] }
  0xf7   : > { %1020 = vmatmul.f32.gmra.mxu2 %v4057_v60  ;;  %1085 = vmatmul.f32.gmra.mxu3 %v4060_v61  ;;  %v4083_v61 = vld [vmem:[%s3811_s24 + $0x1e0] sm:$0xff]  ;;  %v4086_v60 = vld [vmem:[%s3811_s24 + $0x1e8] sm:$0xff]  ;;  %5316 = vst [vmem:[#allocation42_spill] sm:$0xff] %v4089_v47 }
  0xf8   : > { %5314 = vst [vmem:[#allocation40_spill] sm:$0xff] %v4083_v61 }
  0xf9   : > { %5315 = vst [vmem:[#allocation41_spill] sm:$0xff] %v4086_v60 }
  0xfe   : > { %893 = vmatmul.f32.gmra.mxu0 %v4067_v22  ;;  %958 = vmatmul.f32.gmra.mxu1 %v4070_v31  ;;  %v4092_v22 = vld [vmem:[%s3811_s24 + $0x1f8] sm:$0xff]  ;;  %s2777_s24 = scalar_lea.hbm %s5240_s11, %s3092_s10 }
  0xff   : > { %1023 = vmatmul.f32.gmra.mxu2 %v4073_v44  ;;  %1088 = vmatmul.f32.gmra.mxu3 %v4076_v45  ;;  %5317 = vst [vmem:[#allocation43_spill] sm:$0xff] %v4092_v22  ;;  %v4097_v45 = vld [vmem:[%s5232_s3] sm:$0x3]  ;;  %v1444_v44 = vld [vmem:[#allocation8 + $0x1c8] sm:$0xff]  ;;  %s2780_s18 = sshll.u32 %s2777_s24, 4  ;;  %s2781_s18 = int_to_ptr.hbm [resolvable:$true] %s2780_s18 }
 0x100   : > { %5318 = vst [vmem:[#allocation44_spill] sm:$0xff] %v4097_v45  ;;  %v4104_v21 = vperm.slane %v4097_v45, 0  ;;  %1655 = vmatpush.msra.mxu3 %v1444_v44  ;;  %v1411_v45 = vld [vmem:[#allocation8 + $0xc0] sm:$0xff]  ;;  %s3409_s14 = sshra.s32 %s2781_s18, 4  ;;  %s3410_s14 = int_to_ptr.hbm [resolvable:$true] %s3409_s14 }
 0x101   : > { %1460 = vmatpush.msra.mxu0 %v1411_v45  ;;  %s3411_s16 = scalar_lea.hbm %s3410_s14, 256  ;;  %p3416_p2 = scmp.lt.s32.totalorder %s3410_s14, %s5240_s11 }
 0x102   : > { %1656 = vmatpush.msra.mxu3 %v1442_v63  ;;  %p3412_p1 = scmp.ne.s32.totalorder %s3410_s14, %s3411_s16  ;;  %p3417_p10 = scmp.lt.s32.totalorder %s3415_s15, %s3411_s16 }
 0x104   : > { %p3413_p4 = pnand %p3412_p1, %p3753_p5  ;;  %p3418_p11 = por %p3417_p10, %p3416_p2 }
 0x106   : > { %896 = vmatmul.f32.gmra.mxu0 %v4083_v61  ;;  %961 = vmatmul.f32.gmra.mxu1 %v4086_v60  ;;  %p3414_p8 = pneg %p3413_p4 }
 0x107   : > { %1026 = vmatmul.f32.gmra.mxu2 %v4089_v47  ;;  %1091 = vmatmul.f32.gmra.mxu3 %v4092_v22  ;;  %v1443_v47 = vld [vmem:[#allocation8 + $0x1c0] sm:$0xff] }
 0x108   : > { %1525 = vmatpush.msra.mxu1 %v1443_v47  ;;  %v1441_v47 = vld [vmem:[#allocation8 + $0x1b0] sm:$0xff]  ;;  %p3419_p9 = pnand %p3418_p11, %p3414_p8 }
 0x10a   : > { %v852_v31 = vpop.f32.mrf.mxu0  ;;  %1526 = vmatpush.msra.mxu1 %v1441_v47 }
 0x10b   : > { %v917_v46 = vpop.f32.mrf.mxu1  ;;  %v853_v61 = vadd.f32 %v852_v31, %v4104_v21 }
 0x10d   : > { %v918_v22 = vadd.f32 %v917_v46, %v853_v61  ;;  %v1408_v61 = vld [vmem:[#allocation8 + $0xa8] sm:$0xff] }
 0x10e   : > { %1111 = vmatmul.f32.vlgmr.msrb.gmra.mxu0 %v3843_v0  ;;  %1176 = vmatmul.f32.vlgmr.msrb.gmra.mxu1 %v3846_v1 }
 0x10f   : > { %1241 = vmatmul.f32.vlgmr.msrb.gmra.mxu2 %v3849_v2  ;;  %1306 = vmatmul.f32.vlgmr.msrb.gmra.mxu3 %v3852_v3  ;;  %v1409_v3 = vld [vmem:[#allocation8 + $0xb0] sm:$0xff] }
 0x110   : > { %1461 = vmatpush.msra.mxu0 %v1409_v3  ;;  %1592 = vmatpush.msra.mxu2 %v1408_v61 }
 0x112   : > { %v982_v44 = vpop.f32.mrf.mxu2  ;;  %v1047_v20 = vpop.f32.mrf.mxu3 }
 0x113   : > { %v983_v31 = vadd.f32 %v982_v44, %v918_v22  ;;  %v855_v60 = vpop.f32.mrf.mxu0  ;;  %v920_v0 = vpop.f32.mrf.mxu1  ;;  %v1440_v22 = vld [vmem:[#allocation8 + $0x1a8] sm:$0xff] }
 0x114   : > { %v856_v1 = vadd.f32 %v855_v60, %v4104_v21  ;;  %1657 = vmatpush.msra.mxu3 %v1440_v22  ;;  %v1437_v22 = vld [vmem:[#allocation8 + $0x190] sm:$0xff] }
 0x115   : > { %v4112_v46 = vadd.f32 %v1047_v20, %v983_v31  ;;  %v1439_v20 = vld [vmem:[#allocation8 + $0x1a0] sm:$0xff]  ;;  %v1406_v31 = vld [vmem:[#allocation8 + $0x98] sm:$0xff] }
 0x116   : > { %1114 = vmatmul.f32.gmra.mxu0 %v3859_v16  ;;  %1179 = vmatmul.f32.gmra.mxu1 %v3862_v17  ;;  %v921_v2 = vadd.f32 %v920_v0, %v856_v1  ;;  %v1438_v0 = vld [vmem:[#allocation8 + $0x198] sm:$0xff] }
 0x117   : > { %1244 = vmatmul.f32.gmra.mxu2 %v3865_v18  ;;  %1309 = vmatmul.f32.gmra.mxu3 %v3868_v19  ;;  %v1407_v19 = vld [vmem:[#allocation8 + $0xa0] sm:$0xff] }
 0x118   : > { %1462 = vmatpush.msra.mxu0 %v1407_v19  ;;  %1527 = vmatpush.msra.mxu1 %v1439_v20  ;;  %v1435_v19 = vld [vmem:[#allocation8 + $0x180] sm:$0xff]  ;;  %v1402_v20 = vld [vmem:[#allocation8 + $0x78] sm:$0xff] }
 0x119   : > { %1593 = vmatpush.msra.mxu2 %v1406_v31  ;;  %1658 = vmatpush.msra.mxu3 %v1438_v0  ;;  %v1434_v31 = vld [vmem:[#allocation8 + $0x178] sm:$0xff] }
 0x11a   : > { %v985_v60 = vpop.f32.mrf.mxu2  ;;  %v1050_v45 = vpop.f32.mrf.mxu3  ;;  %1528 = vmatpush.msra.mxu1 %v1437_v22 }
 0x11b   : > { %v986_v62 = vadd.f32 %v985_v60, %v921_v2  ;;  %v858_v63 = vpop.f32.mrf.mxu0  ;;  %v923_v16 = vpop.f32.mrf.mxu1  ;;  %v1404_v60 = vld [vmem:[#allocation8 + $0x88] sm:$0xff] }
 0x11c   : > { %v859_v17 = vadd.f32 %v858_v63, %v4104_v21  ;;  %1594 = vmatpush.msra.mxu2 %v1404_v60  ;;  %1529 = vmatpush.msra.mxu1 %v1435_v19 }
 0x11d   : > { %v4119_v44 = vadd.f32 %v1050_v45, %v986_v62  ;;  %v1436_v45 = vld [vmem:[#allocation8 + $0x188] sm:$0xff] }
 0x11e   : > { %1117 = vmatmul.f32.gmra.mxu0 %v3875_v32  ;;  %1182 = vmatmul.f32.gmra.mxu1 %v3878_v33  ;;  %v924_v18 = vadd.f32 %v923_v16, %v859_v17 }
 0x11f   : > { %5319 = vst [vmem:[#allocation45_spill] sm:$0xff] %v4119_v44  ;;  %1247 = vmatmul.f32.gmra.mxu2 %v3881_v34  ;;  %1312 = vmatmul.f32.gmra.mxu3 %v3884_v35  ;;  %v1405_v35 = vld [vmem:[#allocation8 + $0x90] sm:$0xff] }
 0x120   : > { %1463 = vmatpush.msra.mxu0 %v1405_v35  ;;  %1659 = vmatpush.msra.mxu3 %v1436_v45 }
 0x121   : > { %1595 = vmatpush.msra.mxu2 %v1402_v20  ;;  %v1429_v20 = vld [vmem:[#allocation8 + $0x150] sm:$0xff] }
 0x122   : > { %v988_v1 = vpop.f32.mrf.mxu2  ;;  %v1053_v2 = vpop.f32.mrf.mxu3  ;;  %1660 = vmatpush.msra.mxu3 %v1434_v31  ;;  %v1396_v31 = vld [vmem:[#allocation8 + $0x48] sm:$0xff] }
 0x123   : > { %v989_v3 = vadd.f32 %v988_v1, %v924_v18  ;;  %v861_v47 = vpop.f32.mrf.mxu0  ;;  %v926_v32 = vpop.f32.mrf.mxu1 }
 0x124   : > { %v862_v33 = vadd.f32 %v861_v47, %v4104_v21 }
 0x125   : > { %v4126_v61 = vadd.f32 %v1053_v2, %v989_v3 }
 0x126   : > { %1120 = vmatmul.f32.gmra.mxu0 %v3891_v40  ;;  %1185 = vmatmul.f32.gmra.mxu1 %v3894_v41  ;;  %v927_v34 = vadd.f32 %v926_v32, %v862_v33  ;;  %v1433_v32 = vld [vmem:[#allocation8 + $0x170] sm:$0xff]  ;;  %v1400_v33 = vld [vmem:[#allocation8 + $0x68] sm:$0xff] }
 0x127   : > { %5320 = vst [vmem:[#allocation46_spill] sm:$0xff] %v4126_v61  ;;  %1250 = vmatmul.f32.gmra.mxu2 %v3897_v42  ;;  %1315 = vmatmul.f32.gmra.mxu3 %v3900_v43  ;;  %v1403_v43 = vld [vmem:[#allocation8 + $0x80] sm:$0xff] }
 0x128   : > { %1464 = vmatpush.msra.mxu0 %v1403_v43  ;;  %1530 = vmatpush.msra.mxu1 %v1433_v32  ;;  %v1426_v32 = vld [vmem:[#allocation8 + $0x138] sm:$0xff]  ;;  %v4404_v61 = vld [vmem:[#allocation10 + $0x140] sm:$0xff] }
 0x129   : > { %1596 = vmatpush.msra.mxu2 %v1400_v33 }
 0x12a   : > { %v991_v62 = vpop.f32.mrf.mxu2  ;;  %v1056_v63 = vpop.f32.mrf.mxu3 }
 0x12b   : > { %v992_v16 = vadd.f32 %v991_v62, %v927_v34  ;;  %v864_v17 = vpop.f32.mrf.mxu0  ;;  %v929_v40 = vpop.f32.mrf.mxu1  ;;  %v1432_v34 = vld [vmem:[#allocation8 + $0x168] sm:$0xff] }
 0x12c   : > { %v865_v41 = vadd.f32 %v864_v17, %v4104_v21  ;;  %1661 = vmatpush.msra.mxu3 %v1432_v34  ;;  %v1430_v17 = vld [vmem:[#allocation8 + $0x158] sm:$0xff] }
 0x12d   : > { %v4133_v18 = vadd.f32 %v1056_v63, %v992_v16  ;;  %v1431_v63 = vld [vmem:[#allocation8 + $0x160] sm:$0xff]  ;;  %v1398_v16 = vld [vmem:[#allocation8 + $0x58] sm:$0xff] }
 0x12e   : > { %1123 = vmatmul.f32.gmra.mxu0 %v3907_v48  ;;  %1188 = vmatmul.f32.gmra.mxu1 %v3910_v49  ;;  %v930_v42 = vadd.f32 %v929_v40, %v865_v41 }
 0x12f   : > { %5321 = vst [vmem:[#allocation47_spill] sm:$0xff] %v4133_v18  ;;  %1253 = vmatmul.f32.gmra.mxu2 %v3913_v50  ;;  %1318 = vmatmul.f32.gmra.mxu3 %v3916_v51  ;;  %v1401_v51 = vld [vmem:[#allocation8 + $0x70] sm:$0xff] }
 0x130   : > { %1465 = vmatpush.msra.mxu0 %v1401_v51  ;;  %1531 = vmatpush.msra.mxu1 %v1431_v63  ;;  %v1394_v51 = vld [vmem:[#allocation8 + $0x38] sm:$0xff] }
 0x131   : > { %1597 = vmatpush.msra.mxu2 %v1398_v16  ;;  %1662 = vmatpush.msra.mxu3 %v1430_v17 }
 0x132   : > { %v994_v0 = vpop.f32.mrf.mxu2  ;;  %v1059_v1 = vpop.f32.mrf.mxu3  ;;  %1532 = vmatpush.msra.mxu1 %v1429_v20  ;;  %v1421_v20 = vld [vmem:[#allocation8 + $0x110] sm:$0xff] }
 0x133   : > { %v995_v2 = vadd.f32 %v994_v0, %v930_v42  ;;  %v867_v3 = vpop.f32.mrf.mxu0  ;;  %v932_v48 = vpop.f32.mrf.mxu1  ;;  %v1428_v0 = vld [vmem:[#allocation8 + $0x148] sm:$0xff]  ;;  %1598 = vmatpush.msra.mxu2 %v1396_v31 }
 0x134   : > { %v868_v49 = vadd.f32 %v867_v3, %v4104_v21  ;;  %1663 = vmatpush.msra.mxu3 %v1428_v0  ;;  %v1388_v31 = vld [vmem:[#allocation8 + $0x8] sm:$0xff] }
 0x135   : > { %v4140_v47 = vadd.f32 %v1059_v1, %v995_v2  ;;  %1599 = vmatpush.msra.mxu2 %v1394_v51  ;;  %v1420_v0 = vld [vmem:[#allocation8 + $0x108] sm:$0xff] }
 0x136   : > { %1126 = vmatmul.f32.gmra.mxu0 %v3923_v56  ;;  %1191 = vmatmul.f32.gmra.mxu1 %v3926_v57  ;;  %v933_v50 = vadd.f32 %v932_v48, %v868_v49 }
 0x137   : > { %5322 = vst [vmem:[#allocation48_spill] sm:$0xff] %v4140_v47  ;;  %1256 = vmatmul.f32.gmra.mxu2 %v3929_v58  ;;  %1321 = vmatmul.f32.gmra.mxu3 %v3932_v59  ;;  %v1399_v59 = vld [vmem:[#allocation8 + $0x60] sm:$0xff]  ;;  %v4387_v47 = vld [vmem:[#allocation10 + $0x150] sm:$0xff] }
 0x138   : > { %1466 = vmatpush.msra.mxu0 %v1399_v59  ;;  %1664 = vmatpush.msra.mxu3 %v1426_v32 }
 0x13a   : > { %v997_v35 = vpop.f32.mrf.mxu2  ;;  %v1062_v22 = vpop.f32.mrf.mxu3 }
 0x13b   : > { %v998_v60 = vadd.f32 %v997_v35, %v933_v50  ;;  %v870_v45 = vpop.f32.mrf.mxu0  ;;  %v935_v56 = vpop.f32.mrf.mxu1  ;;  %v1427_v50 = vld [vmem:[#allocation8 + $0x140] sm:$0xff] }
 0x13c   : > { %v871_v57 = vadd.f32 %v870_v45, %v4104_v21  ;;  %1533 = vmatpush.msra.mxu1 %v1427_v50  ;;  %v1425_v45 = vld [vmem:[#allocation8 + $0x130] sm:$0xff] }
 0x13d   : > { %v4147_v62 = vadd.f32 %v1062_v22, %v998_v60 }
 0x13e   : > { %1129 = vmatmul.f32.gmra.mxu0 %v3939_v4  ;;  %1194 = vmatmul.f32.gmra.mxu1 %v3942_v5  ;;  %v936_v58 = vadd.f32 %v935_v56, %v871_v57  ;;  %v1392_v56 = vld [vmem:[#allocation8 + $0x28] sm:$0xff] }
 0x13f   : > { %5323 = vst [vmem:[#allocation49_spill] sm:$0xff] %v4147_v62  ;;  %1259 = vmatmul.f32.gmra.mxu2 %v3945_v6  ;;  %1324 = vmatmul.f32.gmra.mxu3 %v3948_v7  ;;  %v1397_v7 = vld [vmem:[#allocation8 + $0x50] sm:$0xff]  ;;  %v1424_v57 = vld [vmem:[#allocation8 + $0x128] sm:$0xff] }
 0x140   : > { %1467 = vmatpush.msra.mxu0 %v1397_v7  ;;  %1534 = vmatpush.msra.mxu1 %v1425_v45  ;;  %v4216_v45 = vld [vmem:[#allocation10 + $0x1e8] sm:$0xff] }
 0x141   : > { %1600 = vmatpush.msra.mxu2 %v1392_v56  ;;  %1665 = vmatpush.msra.mxu3 %v1424_v57 }
 0x142   : > { %v1000_v40 = vpop.f32.mrf.mxu2  ;;  %v1065_v41 = vpop.f32.mrf.mxu3 }
 0x143   : > { %v1001_v42 = vadd.f32 %v1000_v40, %v936_v58  ;;  %v873_v43 = vpop.f32.mrf.mxu0  ;;  %v938_v4 = vpop.f32.mrf.mxu1  ;;  %v1423_v40 = vld [vmem:[#allocation8 + $0x120] sm:$0xff] }
 0x144   : > { %v874_v5 = vadd.f32 %v873_v43, %v4104_v21  ;;  %1535 = vmatpush.msra.mxu1 %v1423_v40  ;;  %v5338_v40 = vld [vmem:[#allocation38_spill] sm:$0xff] }
 0x145   : > { %v4154_v19 = vadd.f32 %v1065_v41, %v1001_v42  ;;  %v1390_v41 = vld [vmem:[#allocation8 + $0x18] sm:$0xff] }
 0x146   : > { %1132 = vmatmul.f32.gmra.mxu0 %v3955_v12  ;;  %1197 = vmatmul.f32.gmra.mxu1 %v3958_v13  ;;  %v939_v6 = vadd.f32 %v938_v4, %v874_v5  ;;  %v1422_v42 = vld [vmem:[#allocation8 + $0x118] sm:$0xff] }
 0x147   : > { %5324 = vst [vmem:[#allocation50_spill] sm:$0xff] %v4154_v19  ;;  %1262 = vmatmul.f32.gmra.mxu2 %v3961_v14  ;;  %1327 = vmatmul.f32.gmra.mxu3 %v3964_v15  ;;  %v1395_v15 = vld [vmem:[#allocation8 + $0x40] sm:$0xff] }
 0x148   : > { %1468 = vmatpush.msra.mxu0 %v1395_v15  ;;  %1601 = vmatpush.msra.mxu2 %v1390_v41  ;;  %v4197_v15 = vld [vmem:[#allocation10 + $0x1f8] sm:$0xff] }
 0x149   : > { %1666 = vmatpush.msra.mxu3 %v1422_v42  ;;  %1536 = vmatpush.msra.mxu1 %v1421_v20  ;;  %v5339_v41 = vld [vmem:[#allocation39_spill] sm:$0xff]  ;;  %v4227_v42 = vld [vmem:[#allocation10 + $0xe0] sm:$0xff] }
 0x14a   : > { %v1003_v1 = vpop.f32.mrf.mxu2  ;;  %v1068_v2 = vpop.f32.mrf.mxu3  ;;  %1602 = vmatpush.msra.mxu2 %v1388_v31 }
 0x14b   : > { %v1004_v3 = vadd.f32 %v1003_v1, %v939_v6  ;;  %v876_v48 = vpop.f32.mrf.mxu0  ;;  %v941_v12 = vpop.f32.mrf.mxu1  ;;  %1667 = vmatpush.msra.mxu3 %v1420_v0  ;;  %v5341_v0 = vld [vmem:[#allocation40_spill] sm:$0xff] }
 0x14c   : > { %v877_v13 = vadd.f32 %v876_v48, %v4104_v21 }
 0x14d   : > { %v4161_v49 = vadd.f32 %v1068_v2, %v1004_v3  ;;  %2014 = vmatpush.msrb.mxu3 %v4197_v15 }
 0x14e   : > { %1135 = vmatmul.f32.gmra.mxu0 %v3971_v24  ;;  %1200 = vmatmul.f32.gmra.mxu1 %v3974_v25  ;;  %v942_v14 = vadd.f32 %v941_v12, %v877_v13  ;;  %v1419_v13 = vld [vmem:[#allocation8 + $0x100] sm:$0xff] }
 0x14f   : > { %5325 = vst [vmem:[#allocation51_spill] sm:$0xff] %v4161_v49  ;;  %1265 = vmatmul.f32.gmra.mxu2 %v3977_v26  ;;  %1330 = vmatmul.f32.gmra.mxu3 %v3980_v27  ;;  %v1393_v27 = vld [vmem:[#allocation8 + $0x30] sm:$0xff]  ;;  %v4370_v49 = vld [vmem:[#allocation10 + $0x160] sm:$0xff] }
 0x150   : > { %1469 = vmatpush.msra.mxu0 %v1393_v27  ;;  %1537 = vmatpush.msra.mxu1 %v1419_v13  ;;  %v4212_v27 = vld [vmem:[#allocation10 + $0xe8] sm:$0xff] }
 0x151   : > { %2015 = vmatpush.msrb.mxu3 %v4216_v45 }
 0x152   : > { %v1006_v33 = vpop.f32.mrf.mxu2  ;;  %v1071_v34 = vpop.f32.mrf.mxu3 }
 0x153   : > { %v1007_v35 = vadd.f32 %v1006_v33, %v942_v14  ;;  %v879_v22 = vpop.f32.mrf.mxu0  ;;  %v944_v24 = vpop.f32.mrf.mxu1  ;;  %v4195_v14 = vld [vmem:[#allocation10 + $0xf8] sm:$0xff] }
 0x154   : > { %v880_v25 = vadd.f32 %v879_v22, %v4104_v21  ;;  %1949 = vmatpush.msrb.mxu2 %v4195_v14  ;;  %v5333_v22 = vld [vmem:[#allocation34_spill] sm:$0xff] }
 0x155   : > { %v4168_v60 = vadd.f32 %v1071_v34, %v1007_v35  ;;  %v5332_v34 = vld [vmem:[#allocation33_spill] sm:$0xff] }
 0x156   : > { %1138 = vmatmul.f32.gmra.mxu0 %v3987_v36  ;;  %1203 = vmatmul.f32.gmra.mxu1 %v3990_v37  ;;  %v945_v26 = vadd.f32 %v944_v24, %v880_v25  ;;  %v5334_v24 = vld [vmem:[#allocation35_spill] sm:$0xff]  ;;  %v4208_v25 = vld [vmem:[#allocation10 + $0xf0] sm:$0xff] }
 0x157   : > { %5326 = vst [vmem:[#allocation52_spill] sm:$0xff] %v4168_v60  ;;  %1268 = vmatmul.f32.gmra.mxu2 %v3993_v38  ;;  %1333 = vmatmul.f32.gmra.mxu3 %v3996_v39  ;;  %v1391_v39 = vld [vmem:[#allocation8 + $0x20] sm:$0xff] }
 0x158   : > { %1470 = vmatpush.msra.mxu0 %v1391_v39  ;;  %1950 = vmatpush.msrb.mxu2 %v4212_v27  ;;  %v4368_v60 = vld [vmem:[#allocation10 + $0x60] sm:$0xff] }
 0x15a   : > { %v1009_v58 = vpop.f32.mrf.mxu2  ;;  %v1074_v59 = vpop.f32.mrf.mxu3 }
 0x15b   : > { %v1010_v63 = vadd.f32 %v1009_v58, %v945_v26  ;;  %v882_v16 = vpop.f32.mrf.mxu0  ;;  %v947_v36 = vpop.f32.mrf.mxu1  ;;  %v4210_v26 = vld [vmem:[#allocation10 + $0x1f0] sm:$0xff] }
 0x15c   : > { %v883_v37 = vadd.f32 %v882_v16, %v4104_v21  ;;  %1884 = vmatpush.msrb.mxu1 %v4210_v26 }
 0x15d   : > { %v4175_v17 = vadd.f32 %v1074_v59, %v1010_v63 }
 0x15e   : > { %1141 = vmatmul.f32.gmra.mxu0 %v4003_v52  ;;  %1206 = vmatmul.f32.gmra.mxu1 %v4006_v53  ;;  %v948_v38 = vadd.f32 %v947_v36, %v883_v37  ;;  %v5336_v37 = vld [vmem:[#allocation36_spill] sm:$0xff] }
 0x15f   : > { %5327 = vst [vmem:[#allocation53_spill] sm:$0xff] %v4175_v17  ;;  %1271 = vmatmul.f32.gmra.mxu2 %v4009_v54  ;;  %1336 = vmatmul.f32.gmra.mxu3 %v4012_v55  ;;  %v1389_v55 = vld [vmem:[#allocation8 + $0x10] sm:$0xff] }
 0x160   : > { %1471 = vmatpush.msra.mxu0 %v1389_v55 }
 0x162   : > { %v1012_v43 = vpop.f32.mrf.mxu2  ;;  %v1077_v4 = vpop.f32.mrf.mxu3 }
 0x163   : > { %v1013_v5 = vadd.f32 %v1012_v43, %v948_v38  ;;  %v885_v6 = vpop.f32.mrf.mxu0  ;;  %v950_v52 = vpop.f32.mrf.mxu1  ;;  %v5337_v38 = vld [vmem:[#allocation37_spill] sm:$0xff]  ;;  %v4229_v43 = vld [vmem:[#allocation10 + $0x1e0] sm:$0xff] }
 0x164   : > { %v886_v53 = vadd.f32 %v885_v6, %v4104_v21  ;;  %1885 = vmatpush.msrb.mxu1 %v4229_v43 }
 0x165   : > { %v4182_v7 = vadd.f32 %v1077_v4, %v1013_v5  ;;  %v4231_v4 = vld [vmem:[#allocation10 + $0xd8] sm:$0xff] }
 0x166   : > { %1144 = vmatmul.f32.gmra.mxu0 %v4019_v8  ;;  %1209 = vmatmul.f32.gmra.mxu1 %v4022_v9  ;;  %v951_v54 = vadd.f32 %v950_v52, %v886_v53  ;;  %v4235_v5 = vld [vmem:[#allocation10 + $0x1d8] sm:$0xff] }
 0x167   : > { %5328 = vst [vmem:[#allocation54_spill] sm:$0xff] %v4182_v7  ;;  %1274 = vmatmul.f32.gmra.mxu2 %v4025_v10  ;;  %1339 = vmatmul.f32.gmra.mxu3 %v4028_v11  ;;  %v1387_v10 = vld [vmem:[#allocation8] sm:$0xff] }
 0x168   : > { %1472 = vmatpush.msra.mxu0 %v1387_v10  ;;  %1951 = vmatpush.msrb.mxu2 %v4231_v4  ;;  %v4250_v10 = vld [vmem:[#allocation10 + $0xc8] sm:$0xff] }
 0x169   : > { %2016 = vmatpush.msrb.mxu3 %v4235_v5 }
 0x16a   : > { %v1015_v1 = vpop.f32.mrf.mxu2  ;;  %v1080_v2 = vpop.f32.mrf.mxu3  ;;  %1819 = vmatpush.msrb.mxu0 %v4208_v25  ;;  %1952 = vmatpush.msrb.mxu2 %v4250_v10 }
 0x16b   : > { %v1016_v3 = vadd.f32 %v1015_v1, %v951_v54  ;;  %v888_v48 = vpop.f32.mrf.mxu0  ;;  %v953_v8 = vpop.f32.mrf.mxu1  ;;  %v5342_v1 = vld [vmem:[#allocation41_spill] sm:$0xff] }
 0x16c   : > { %v889_v9 = vadd.f32 %v888_v48, %v4104_v21  ;;  %1820 = vmatpush.msrb.mxu0 %v4227_v42  ;;  %v5344_v48 = vld [vmem:[#allocation43_spill] sm:$0xff] }
 0x16d   : > { %v4189_v12 = vadd.f32 %v1080_v2, %v1016_v3  ;;  %v5343_v3 = vld [vmem:[#allocation42_spill] sm:$0xff] }
 0x16e   : > { %1147 = vmatmul.f32.gmra.mxu0 %v4035_v23  ;;  %1212 = vmatmul.f32.gmra.mxu1 %v4038_v28  ;;  %v954_v11 = vadd.f32 %v953_v8, %v889_v9  ;;  %v4246_v8 = vld [vmem:[#allocation10 + $0xd0] sm:$0xff]  ;;  %5354 = vst [vmem:[#allocation42_spill] sm:$0xff] %v4404_v61 }
 0x16f   : > { %5329 = vst [vmem:[#allocation55_spill] sm:$0xff] %v4189_v12  ;;  %1277 = vmatmul.f32.gmra.mxu2 %v4041_v29  ;;  %1342 = vmatmul.f32.gmra.mxu3 %v4044_v30  ;;  %v5331_v30 = vld [vmem:[#allocation32_spill] sm:$0xff]  ;;  %v4248_v9 = vld [vmem:[#allocation10 + $0x1d0] sm:$0xff] }
 0x170   : > { %1821 = vmatpush.msrb.mxu0 %v4246_v8  ;;  %1886 = vmatpush.msrb.mxu1 %v4248_v9 }
 0x172   : > { %v1018_v50 = vpop.f32.mrf.mxu2  ;;  %v1083_v51 = vpop.f32.mrf.mxu3 }
 0x173   : > { %v1019_v23 = vadd.f32 %v1018_v50, %v954_v11  ;;  %v891_v32 = vpop.f32.mrf.mxu0  ;;  %v956_v28 = vpop.f32.mrf.mxu1  ;;  %v4257_v11 = vld [vmem:[#allocation10 + $0x1c8] sm:$0xff] }
 0x174   : > { %v892_v33 = vadd.f32 %v891_v32, %v4104_v21  ;;  %2017 = vmatpush.msrb.mxu3 %v4257_v11 }
 0x175   : > { %v4202_v29 = vadd.f32 %v1083_v51, %v1019_v23 }
 0x176   : > { %1150 = vmatmul.f32.gmra.mxu0 %v5331_v30  ;;  %1215 = vmatmul.f32.gmra.mxu1 %v5332_v34  ;;  %v957_v35 = vadd.f32 %v956_v28, %v892_v33  ;;  %v669_v33 = vld [vmem:[%s3824_s2] sm:$0xff]  ;;  %v670_v30 = vld [vmem:[%s3824_s2 + $0x8] sm:$0xff] }
 0x177   : > { %5330 = vst [vmem:[#allocation56_spill] sm:$0xff] %v4202_v29  ;;  %1280 = vmatmul.f32.gmra.mxu2 %v5333_v22  ;;  %1345 = vmatmul.f32.gmra.mxu3 %v5334_v24  ;;  %v4266_v24 = vld [vmem:[#allocation10 + $0xc0] sm:$0xff]  ;;  %v4353_v29 = vld [vmem:[#allocation10 + $0x170] sm:$0xff] }
 0x178   : > { %1822 = vmatpush.msrb.mxu0 %v4266_v24 }
 0x17a   : > { %v1021_v56 = vpop.f32.mrf.mxu2  ;;  %v1086_v57 = vpop.f32.mrf.mxu3 }
 0x17b   : > { %v1022_v58 = vadd.f32 %v1021_v56, %v957_v35  ;;  %v894_v59 = vpop.f32.mrf.mxu0  ;;  %v959_v63 = vpop.f32.mrf.mxu1  ;;  %v4268_v56 = vld [vmem:[#allocation10 + $0x1c0] sm:$0xff] }
 0x17c   : > { %v895_v16 = vadd.f32 %v894_v59, %v4104_v21  ;;  %1887 = vmatpush.msrb.mxu1 %v4268_v56 }
 0x17d   : > { %v4221_v36 = vadd.f32 %v1086_v57, %v1022_v58  ;;  %v4270_v57 = vld [vmem:[#allocation10 + $0xb8] sm:$0xff] }
 0x17e   : > { %1153 = vmatmul.f32.gmra.mxu0 %v5336_v37  ;;  %1218 = vmatmul.f32.gmra.mxu1 %v5337_v38  ;;  %v960_v39 = vadd.f32 %v959_v63, %v895_v16  ;;  %v4274_v58 = vld [vmem:[#allocation10 + $0x1b8] sm:$0xff] }
 0x17f   : > { %5335 = vst [vmem:[#allocation32_spill] sm:$0xff] %v4221_v36  ;;  %1283 = vmatmul.f32.gmra.mxu2 %v5338_v40  ;;  %1348 = vmatmul.f32.gmra.mxu3 %v5339_v41  ;;  %v672_v40 = vld [vmem:[%s3824_s2 + $0x18] sm:$0xff]  ;;  %v4351_v36 = vld [vmem:[#allocation10 + $0x70] sm:$0xff] }
 0x180   : > { %1953 = vmatpush.msrb.mxu2 %v4270_v57  ;;  %2018 = vmatpush.msrb.mxu3 %v4274_v58 }
 0x182   : > { %v1024_v6 = vpop.f32.mrf.mxu2  ;;  %v1089_v52 = vpop.f32.mrf.mxu3 }
 0x183   : > { %v1025_v53 = vadd.f32 %v1024_v6, %v960_v39  ;;  %v897_v54 = vpop.f32.mrf.mxu0  ;;  %v962_v55 = vpop.f32.mrf.mxu1  ;;  %v671_v39 = vld [vmem:[%s3824_s2 + $0x10] sm:$0xff] }
 0x184   : > { %v898_v20 = vadd.f32 %v897_v54, %v4104_v21  ;;  %v5345_v21 = vld [vmem:[#allocation44_spill] sm:$0xff]  ;;  %v4285_v54 = vld [vmem:[#allocation10 + $0x1b0] sm:$0xff] }
 0x185   : > { %v4240_v31 = vadd.f32 %v1089_v52, %v1025_v53  ;;  %v4253_v13 = vperm.slane %v5345_v21, 1  ;;  %v4283_v53 = vld [vmem:[#allocation10 + $0xb0] sm:$0xff]  ;;  %1888 = vmatpush.msrb.mxu1 %v4285_v54  ;;  %v673_v21 = vld [vmem:[%s3824_s2 + $0x20] sm:$0xff] }
 0x186   : > { %1156 = vmatmul.f32.gmra.mxu0 %v5341_v0  ;;  %1221 = vmatmul.f32.gmra.mxu1 %v5342_v1  ;;  %v963_v2 = vadd.f32 %v962_v55, %v898_v20  ;;  %v4287_v55 = vld [vmem:[#allocation10 + $0xa8] sm:$0xff] }
 0x187   : > { %5340 = vst [vmem:[#allocation33_spill] sm:$0xff] %v4240_v31  ;;  %1286 = vmatmul.f32.gmra.mxu2 %v5343_v3  ;;  %1351 = vmatmul.f32.gmra.mxu3 %v5344_v48  ;;  %v4291_v20 = vld [vmem:[#allocation10 + $0x1a8] sm:$0xff] }
 0x188   : > { %1823 = vmatpush.msrb.mxu0 %v4283_v53  ;;  %1954 = vmatpush.msrb.mxu2 %v4287_v55 }
 0x189   : > { %2019 = vmatpush.msrb.mxu3 %v4291_v20 }
 0x18a   : > { %v1027_v50 = vpop.f32.mrf.mxu2  ;;  %v1092_v51 = vpop.f32.mrf.mxu3 }
 0x18b   : > { %v1028_v23 = vadd.f32 %v1027_v50, %v963_v2  ;;  %v1112_v32 = vpop.f32.mrf.mxu0  ;;  %v1177_v28 = vpop.f32.mrf.mxu1  ;;  %v674_v50 = vld [vmem:[%s3824_s2 + $0x28] sm:$0xff] }
 0x18c   : > { %v1113_v34 = vadd.f32 %v1112_v32, %v4253_v13 }
 0x18d   : > { %v4264_v35 = vadd.f32 %v1092_v51, %v1028_v23 }
 0x18e   : > { %1473 = vmatmul.f32.vlgmr.msra.gmra.mxu0 %v669_v33  ;;  %1538 = vmatmul.f32.vlgmr.msra.gmra.mxu1 %v670_v30  ;;  %v1178_v22 = vadd.f32 %v1177_v28, %v1113_v34  ;;  %v4300_v28 = vld [vmem:[#allocation10 + $0xa0] sm:$0xff]  ;;  %v4308_v34 = vld [vmem:[#allocation10 + $0x198] sm:$0xff] }
 0x18f   : > { %5346 = vst [vmem:[#allocation34_spill] sm:$0xff] %v4264_v35  ;;  %1603 = vmatmul.f32.vlgmr.msra.gmra.mxu2 %v669_v33  ;;  %1668 = vmatmul.f32.vlgmr.msra.gmra.mxu3 %v670_v30  ;;  %v4302_v33 = vld [vmem:[#allocation10 + $0x1a0] sm:$0xff]  ;;  %v4304_v30 = vld [vmem:[#allocation10 + $0x98] sm:$0xff] }
 0x190   : > { %1824 = vmatpush.msrb.mxu0 %v4300_v28  ;;  %1889 = vmatpush.msrb.mxu1 %v4302_v33 }
 0x191   : > { %1955 = vmatpush.msrb.mxu2 %v4304_v30  ;;  %2020 = vmatpush.msrb.mxu3 %v4308_v34 }
 0x192   : > { %v1242_v59 = vpop.f32.mrf.mxu2  ;;  %v1307_v63 = vpop.f32.mrf.mxu3 }
 0x193   : > { %v1243_v16 = vadd.f32 %v1242_v59, %v1178_v22  ;;  %v1115_v37 = vpop.f32.mrf.mxu0  ;;  %v1180_v38 = vpop.f32.mrf.mxu1 }
 0x194   : > { %v1116_v41 = vadd.f32 %v1115_v37, %v4253_v13 }
 0x195   : > { %v4281_v6 = vadd.f32 %v1307_v63, %v1243_v16 }
 0x196   : > { %1476 = vmatmul.f32.gmra.mxu0 %v671_v39  ;;  %1541 = vmatmul.f32.gmra.mxu1 %v672_v40  ;;  %v1181_v52 = vadd.f32 %v1180_v38, %v1116_v41  ;;  %v675_v38 = vld [vmem:[%s3824_s2 + $0x30] sm:$0xff] }
 0x197   : > { %1606 = vmatmul.f32.gmra.mxu2 %v671_v39  ;;  %1671 = vmatmul.f32.gmra.mxu3 %v672_v40  ;;  %v676_v39 = vld [vmem:[%s3824_s2 + $0x38] sm:$0xff] }
 0x19a   : > { %v1245_v0 = vpop.f32.mrf.mxu2  ;;  %v1310_v1 = vpop.f32.mrf.mxu3 }
 0x19b   : > { %v1246_v2 = vadd.f32 %v1245_v0, %v1181_v52  ;;  %v1118_v3 = vpop.f32.mrf.mxu0  ;;  %v1183_v48 = vpop.f32.mrf.mxu1  ;;  %v4317_v0 = vld [vmem:[#allocation10 + $0x90] sm:$0xff] }
 0x19c   : > { %v1119_v51 = vadd.f32 %v1118_v3, %v4253_v13  ;;  %1825 = vmatpush.msrb.mxu0 %v4317_v0  ;;  %v4325_v3 = vld [vmem:[#allocation10 + $0x188] sm:$0xff] }
 0x19d   : > { %v4298_v23 = vadd.f32 %v1310_v1, %v1246_v2  ;;  %v4319_v1 = vld [vmem:[#allocation10 + $0x190] sm:$0xff]  ;;  %v4321_v2 = vld [vmem:[#allocation10 + $0x88] sm:$0xff]  ;;  %2021 = vmatpush.msrb.mxu3 %v4325_v3 }
 0x19e   : > { %1479 = vmatmul.f32.gmra.mxu0 %v673_v21  ;;  %1544 = vmatmul.f32.gmra.mxu1 %v674_v50  ;;  %v1184_v32 = vadd.f32 %v1183_v48, %v1119_v51 }
 0x19f   : > { %5347 = vst [vmem:[#allocation35_spill] sm:$0xff] %v4298_v23  ;;  %1609 = vmatmul.f32.gmra.mxu2 %v673_v21  ;;  %1674 = vmatmul.f32.gmra.mxu3 %v674_v50 }
 0x1a0   : > { %1890 = vmatpush.msrb.mxu1 %v4319_v1  ;;  %1956 = vmatpush.msrb.mxu2 %v4321_v2 }
 0x1a2   : > { %v1248_v22 = vpop.f32.mrf.mxu2  ;;  %v1313_v59 = vpop.f32.mrf.mxu3 }
 0x1a3   : > { %v1249_v63 = vadd.f32 %v1248_v22, %v1184_v32  ;;  %v1121_v16 = vpop.f32.mrf.mxu0  ;;  %v1186_v37 = vpop.f32.mrf.mxu1  ;;  %v677_v22 = vld [vmem:[%s3824_s2 + $0x40] sm:$0xff] }
 0x1a4   : > { %v1122_v40 = vadd.f32 %v1121_v16, %v4253_v13 }
 0x1a5   : > { %v4315_v41 = vadd.f32 %v1313_v59, %v1249_v63  ;;  %v678_v59 = vld [vmem:[%s3824_s2 + $0x48] sm:$0xff] }
 0x1a6   : > { %1482 = vmatmul.f32.gmra.mxu0 %v675_v38  ;;  %1547 = vmatmul.f32.gmra.mxu1 %v676_v39  ;;  %v1187_v52 = vadd.f32 %v1186_v37, %v1122_v40  ;;  %v4338_v40 = vld [vmem:[#allocation10 + $0x78] sm:$0xff] }
 0x1a7   : > { %5348 = vst [vmem:[#allocation36_spill] sm:$0xff] %v4315_v41  ;;  %1612 = vmatmul.f32.gmra.mxu2 %v675_v38  ;;  %1677 = vmatmul.f32.gmra.mxu3 %v676_v39  ;;  %v4334_v38 = vld [vmem:[#allocation10 + $0x80] sm:$0xff] }
 0x1a8   : > { %v4336_v39 = vld [vmem:[#allocation10 + $0x180] sm:$0xff]  ;;  %1826 = vmatpush.msrb.mxu0 %v4334_v38  ;;  %1957 = vmatpush.msrb.mxu2 %v4338_v40 }
 0x1a9   : > { %1891 = vmatpush.msrb.mxu1 %v4336_v39  ;;  %v4402_v41 = vld [vmem:[#allocation10 + $0x40] sm:$0xff] }
 0x1aa   : > { %v1251_v48 = vpop.f32.mrf.mxu2  ;;  %v1316_v21 = vpop.f32.mrf.mxu3  ;;  %1827 = vmatpush.msrb.mxu0 %v4351_v36 }
 0x1ab   : > { %v1252_v50 = vadd.f32 %v1251_v48, %v1187_v52  ;;  %v1124_v51 = vpop.f32.mrf.mxu0  ;;  %v1189_v32 = vpop.f32.mrf.mxu1  ;;  %v4342_v52 = vld [vmem:[#allocation10 + $0x178] sm:$0xff]  ;;  %1892 = vmatpush.msrb.mxu1 %v4353_v29 }
 0x1ac   : > { %v1125_v63 = vadd.f32 %v1124_v51, %v4253_v13  ;;  %2022 = vmatpush.msrb.mxu3 %v4342_v52  ;;  %1828 = vmatpush.msrb.mxu0 %v4368_v60 }
 0x1ad   : > { %v4332_v16 = vadd.f32 %v1316_v21, %v1252_v50  ;;  %1893 = vmatpush.msrb.mxu1 %v4370_v49 }
 0x1ae   : > { %1485 = vmatmul.f32.gmra.mxu0 %v677_v22  ;;  %1550 = vmatmul.f32.gmra.mxu1 %v678_v59  ;;  %v1190_v37 = vadd.f32 %v1189_v32, %v1125_v63 }
 0x1af   : > { %5349 = vst [vmem:[#allocation37_spill] sm:$0xff] %v4332_v16  ;;  %1615 = vmatmul.f32.gmra.mxu2 %v677_v22  ;;  %1680 = vmatmul.f32.gmra.mxu3 %v678_v59  ;;  %v679_v22 = vld [vmem:[%s3824_s2 + $0x50] sm:$0xff]  ;;  %v680_v59 = vld [vmem:[%s3824_s2 + $0x58] sm:$0xff] }
 0x1b0   : > { %1894 = vmatpush.msrb.mxu1 %v4387_v47 }
 0x1b2   : > { %v1254_v48 = vpop.f32.mrf.mxu2  ;;  %v1319_v21 = vpop.f32.mrf.mxu3  ;;  %1895 = vmatpush.msrb.mxu1 %v4404_v61 }
 0x1b3   : > { %v1255_v50 = vadd.f32 %v1254_v48, %v1190_v37  ;;  %v1127_v51 = vpop.f32.mrf.mxu0  ;;  %v1192_v32 = vpop.f32.mrf.mxu1  ;;  %v4355_v37 = vld [vmem:[#allocation10 + $0x68] sm:$0xff] }
 0x1b4   : > { %v1128_v63 = vadd.f32 %v1127_v51, %v4253_v13  ;;  %v4359_v48 = vld [vmem:[#allocation10 + $0x168] sm:$0xff]  ;;  %1958 = vmatpush.msrb.mxu2 %v4355_v37 }
 0x1b5   : > { %v4349_v35 = vadd.f32 %v1319_v21, %v1255_v50  ;;  %2023 = vmatpush.msrb.mxu3 %v4359_v48 }
 0x1b6   : > { %1488 = vmatmul.f32.gmra.mxu0 %v679_v22  ;;  %1553 = vmatmul.f32.gmra.mxu1 %v680_v59  ;;  %v1193_v31 = vadd.f32 %v1192_v32, %v1128_v63  ;;  %v682_v63 = vld [vmem:[%s3824_s2 + $0x68] sm:$0xff] }
 0x1b7   : > { %5350 = vst [vmem:[#allocation38_spill] sm:$0xff] %v4349_v35  ;;  %1618 = vmatmul.f32.gmra.mxu2 %v679_v22  ;;  %1683 = vmatmul.f32.gmra.mxu3 %v680_v59  ;;  %v681_v59 = vld [vmem:[%s3824_s2 + $0x60] sm:$0xff]  ;;  %v4385_v35 = vld [vmem:[#allocation10 + $0x50] sm:$0xff] }
 0x1b8   : > { %1829 = vmatpush.msrb.mxu0 %v4385_v35 }
 0x1ba   : > { %v1257_v21 = vpop.f32.mrf.mxu2  ;;  %v1322_v50 = vpop.f32.mrf.mxu3  ;;  %1830 = vmatpush.msrb.mxu0 %v4402_v41 }
 0x1bb   : > { %v1258_v51 = vadd.f32 %v1257_v21, %v1193_v31  ;;  %v1130_v32 = vpop.f32.mrf.mxu0  ;;  %v1195_v22 = vpop.f32.mrf.mxu1  ;;  %v4372_v31 = vld [vmem:[#allocation10 + $0x58] sm:$0xff] }
 0x1bc   : > { %v1131_v12 = vadd.f32 %v1130_v32, %v4253_v13  ;;  %v4376_v21 = vld [vmem:[#allocation10 + $0x158] sm:$0xff]  ;;  %1959 = vmatpush.msrb.mxu2 %v4372_v31 }
 0x1bd   : > { %v4366_v7 = vadd.f32 %v1322_v50, %v1258_v51  ;;  %2024 = vmatpush.msrb.mxu3 %v4376_v21 }
 0x1be   : > { %1491 = vmatmul.f32.gmra.mxu0 %v681_v59  ;;  %1556 = vmatmul.f32.gmra.mxu1 %v682_v63  ;;  %v1196_v17 = vadd.f32 %v1195_v22, %v1131_v12 }
 0x1bf   : > { %5351 = vst [vmem:[#allocation39_spill] sm:$0xff] %v4366_v7  ;;  %1621 = vmatmul.f32.gmra.mxu2 %v681_v59  ;;  %1686 = vmatmul.f32.gmra.mxu3 %v682_v63  ;;  %v683_v59 = vld [vmem:[%s3824_s2 + $0x70] sm:$0xff]  ;;  %v684_v63 = vld [vmem:[%s3824_s2 + $0x78] sm:$0xff] }
 0x1c2   : > { %v1260_v12 = vpop.f32.mrf.mxu2  ;;  %v1325_v50 = vpop.f32.mrf.mxu3 }
 0x1c3   : > { %v1261_v51 = vadd.f32 %v1260_v12, %v1196_v17  ;;  %v1133_v32 = vpop.f32.mrf.mxu0  ;;  %v1198_v22 = vpop.f32.mrf.mxu1  ;;  %v4389_v17 = vld [vmem:[#allocation10 + $0x48] sm:$0xff] }
 0x1c4   : > { %v1134_v19 = vadd.f32 %v1133_v32, %v4253_v13  ;;  %v4393_v12 = vld [vmem:[#allocation10 + $0x148] sm:$0xff]  ;;  %1960 = vmatpush.msrb.mxu2 %v4389_v17 }
 0x1c5   : > { %v4383_v7 = vadd.f32 %v1325_v50, %v1261_v51  ;;  %2025 = vmatpush.msrb.mxu3 %v4393_v12 }
 0x1c6   : > { %1494 = vmatmul.f32.gmra.mxu0 %v683_v59  ;;  %1559 = vmatmul.f32.gmra.mxu1 %v684_v63  ;;  %v1199_v62 = vadd.f32 %v1198_v22, %v1134_v19 }
 0x1c7   : > { %5352 = vst [vmem:[#allocation40_spill] sm:$0xff] %v4383_v7  ;;  %1624 = vmatmul.f32.gmra.mxu2 %v683_v59  ;;  %1689 = vmatmul.f32.gmra.mxu3 %v684_v63  ;;  %v685_v59 = vld [vmem:[%s3824_s2 + $0x80] sm:$0xff]  ;;  %v686_v63 = vld [vmem:[%s3824_s2 + $0x88] sm:$0xff] }
 0x1ca   : > { %v1263_v19 = vpop.f32.mrf.mxu2  ;;  %v1328_v50 = vpop.f32.mrf.mxu3 }
 0x1cb   : > { %v1264_v51 = vadd.f32 %v1263_v19, %v1199_v62  ;;  %v1136_v32 = vpop.f32.mrf.mxu0  ;;  %v1201_v22 = vpop.f32.mrf.mxu1  ;;  %v4406_v62 = vld [vmem:[#allocation10 + $0x38] sm:$0xff] }
 0x1cc   : > { %v1137_v7 = vadd.f32 %v1136_v32, %v4253_v13  ;;  %5355 = vst [vmem:[#allocation43_spill] sm:$0xff] %v4406_v62  ;;  %v4410_v19 = vld [vmem:[#allocation10 + $0x138] sm:$0xff]  ;;  %1961 = vmatpush.msrb.mxu2 %v4406_v62  ;;  %v4419_v62 = vld [vmem:[#allocation10 + $0x30] sm:$0xff] }
 0x1cd   : > { %v4400_v16 = vadd.f32 %v1328_v50, %v1264_v51  ;;  %5356 = vst [vmem:[#allocation44_spill] sm:$0xff] %v4410_v19  ;;  %2026 = vmatpush.msrb.mxu3 %v4410_v19  ;;  %v4421_v19 = vld [vmem:[#allocation10 + $0x130] sm:$0xff]  ;;  %1831 = vmatpush.msrb.mxu0 %v4419_v62 }
 0x1ce   : > { %1497 = vmatmul.f32.gmra.mxu0 %v685_v59  ;;  %1562 = vmatmul.f32.gmra.mxu1 %v686_v63  ;;  %v1202_v18 = vadd.f32 %v1201_v22, %v1137_v7  ;;  %5358 = vst [vmem:[#allocation58_spill] sm:$0xff] %v4419_v62 }
 0x1cf   : > { %5353 = vst [vmem:[#allocation41_spill] sm:$0xff] %v4400_v16  ;;  %1627 = vmatmul.f32.gmra.mxu2 %v685_v59  ;;  %1692 = vmatmul.f32.gmra.mxu3 %v686_v63  ;;  %v687_v59 = vld [vmem:[%s3824_s2 + $0x90] sm:$0xff]  ;;  %v688_v63 = vld [vmem:[%s3824_s2 + $0x98] sm:$0xff] }
 0x1d0   : > { %5359 = vst [vmem:[#allocation59_spill] sm:$0xff] %v4421_v19  ;;  %1896 = vmatpush.msrb.mxu1 %v4421_v19 }
 0x1d2   : > { %v1266_v7 = vpop.f32.mrf.mxu2  ;;  %v1331_v50 = vpop.f32.mrf.mxu3 }
 0x1d3   : > { %v1267_v51 = vadd.f32 %v1266_v7, %v1202_v18  ;;  %v1139_v32 = vpop.f32.mrf.mxu0  ;;  %v1204_v22 = vpop.f32.mrf.mxu1  ;;  %v4423_v18 = vld [vmem:[#allocation10 + $0x28] sm:$0xff] }
 0x1d4   : > { %v1140_v16 = vadd.f32 %v1139_v32, %v4253_v13  ;;  %5360 = vst [vmem:[#allocation60_spill] sm:$0xff] %v4423_v18  ;;  %v4427_v7 = vld [vmem:[#allocation10 + $0x128] sm:$0xff]  ;;  %1962 = vmatpush.msrb.mxu2 %v4423_v18  ;;  %v4436_v18 = vld [vmem:[#allocation10 + $0x20] sm:$0xff] }
 0x1d5   : > { %v4417_v23 = vadd.f32 %v1331_v50, %v1267_v51  ;;  %5361 = vst [vmem:[#allocation61_spill] sm:$0xff] %v4427_v7  ;;  %2027 = vmatpush.msrb.mxu3 %v4427_v7  ;;  %v4438_v7 = vld [vmem:[#allocation10 + $0x120] sm:$0xff]  ;;  %1832 = vmatpush.msrb.mxu0 %v4436_v18 }
 0x1d6   : > { %1500 = vmatmul.f32.gmra.mxu0 %v687_v59  ;;  %1565 = vmatmul.f32.gmra.mxu1 %v688_v63  ;;  %v1205_v44 = vadd.f32 %v1204_v22, %v1140_v16  ;;  %5363 = vst [vmem:[#allocation63_spill] sm:$0xff] %v4438_v7 }
 0x1d7   : > { %5357 = vst [vmem:[#allocation57_spill] sm:$0xff] %v4417_v23  ;;  %1630 = vmatmul.f32.gmra.mxu2 %v687_v59  ;;  %1695 = vmatmul.f32.gmra.mxu3 %v688_v63  ;;  %v689_v59 = vld [vmem:[%s3824_s2 + $0xa0] sm:$0xff]  ;;  %v690_v63 = vld [vmem:[%s3824_s2 + $0xa8] sm:$0xff] }
 0x1d8   : > { %1897 = vmatpush.msrb.mxu1 %v4438_v7 }
 0x1da   : > { %v1269_v16 = vpop.f32.mrf.mxu2  ;;  %v1334_v50 = vpop.f32.mrf.mxu3 }
 0x1db   : > { %v1270_v51 = vadd.f32 %v1269_v16, %v1205_v44  ;;  %v1142_v32 = vpop.f32.mrf.mxu0  ;;  %v1207_v22 = vpop.f32.mrf.mxu1  ;;  %v4440_v44 = vld [vmem:[#allocation10 + $0x18] sm:$0xff] }
 0x1dc   : > { %v1143_v23 = vadd.f32 %v1142_v32, %v4253_v13  ;;  %5364 = vst [vmem:[#allocation64_spill] sm:$0xff] %v4440_v44  ;;  %v4444_v16 = vld [vmem:[#allocation10 + $0x118] sm:$0xff]  ;;  %1963 = vmatpush.msrb.mxu2 %v4440_v44  ;;  %v4453_v44 = vld [vmem:[#allocation10 + $0x10] sm:$0xff] }
 0x1dd   : > { %v4434_v61 = vadd.f32 %v1334_v50, %v1270_v51  ;;  %5365 = vst [vmem:[#allocation65_spill] sm:$0xff] %v4444_v16  ;;  %2028 = vmatpush.msrb.mxu3 %v4444_v16  ;;  %v4455_v16 = vld [vmem:[#allocation10 + $0x110] sm:$0xff]  ;;  %1833 = vmatpush.msrb.mxu0 %v4453_v44 }
 0x1de   : > { %1503 = vmatmul.f32.gmra.mxu0 %v689_v59  ;;  %1568 = vmatmul.f32.gmra.mxu1 %v690_v63  ;;  %v1208_v19 = vadd.f32 %v1207_v22, %v1143_v23  ;;  %5367 = vst [vmem:[#allocation67_spill] sm:$0xff] %v4455_v16 }
 0x1df   : > { %5362 = vst [vmem:[#allocation62_spill] sm:$0xff] %v4434_v61  ;;  %1633 = vmatmul.f32.gmra.mxu2 %v689_v59  ;;  %1698 = vmatmul.f32.gmra.mxu3 %v690_v63  ;;  %v691_v59 = vld [vmem:[%s3824_s2 + $0xb0] sm:$0xff]  ;;  %v692_v63 = vld [vmem:[%s3824_s2 + $0xb8] sm:$0xff] }
 0x1e0   : > { %1898 = vmatpush.msrb.mxu1 %v4455_v16  ;;  %v4476_v16 = vld [vmem:[#allocation10 + $0x100] sm:$0xff] }
 0x1e2   : > { %v1272_v23 = vpop.f32.mrf.mxu2  ;;  %v1337_v50 = vpop.f32.mrf.mxu3  ;;  %1899 = vmatpush.msrb.mxu1 %v4476_v16 }
 0x1e3   : > { %v1273_v51 = vadd.f32 %v1272_v23, %v1208_v19  ;;  %v1145_v32 = vpop.f32.mrf.mxu0  ;;  %v1210_v22 = vpop.f32.mrf.mxu1  ;;  %v4457_v19 = vld [vmem:[#allocation10 + $0x8] sm:$0xff] }
 0x1e4   : > { %v1146_v61 = vadd.f32 %v1145_v32, %v4253_v13  ;;  %5368 = vst [vmem:[#allocation68_spill] sm:$0xff] %v4457_v19  ;;  %v4461_v23 = vld [vmem:[#allocation10 + $0x108] sm:$0xff]  ;;  %1964 = vmatpush.msrb.mxu2 %v4457_v19  ;;  %2144 = vmatpush.msra.mxu1 %v4210_v26 }
 0x1e5   : > { %v4451_v62 = vadd.f32 %v1337_v50, %v1273_v51  ;;  %5369 = vst [vmem:[#allocation69_spill] sm:$0xff] %v4461_v23  ;;  %2029 = vmatpush.msrb.mxu3 %v4461_v23  ;;  %v4474_v23 = vld [vmem:[#allocation10] sm:$0xff] }
 0x1e6   : > { %1506 = vmatmul.f32.gmra.mxu0 %v691_v59  ;;  %1571 = vmatmul.f32.gmra.mxu1 %v692_v63  ;;  %v1211_v7 = vadd.f32 %v1210_v22, %v1146_v61 }
 0x1e7   : > { %5366 = vst [vmem:[#allocation66_spill] sm:$0xff] %v4451_v62  ;;  %1636 = vmatmul.f32.gmra.mxu2 %v691_v59  ;;  %1701 = vmatmul.f32.gmra.mxu3 %v692_v63  ;;  %v693_v59 = vld [vmem:[%s3824_s2 + $0xc0] sm:$0xff]  ;;  %v694_v63 = vld [vmem:[%s3824_s2 + $0xc8] sm:$0xff] }
 0x1e8   : > { %2209 = vmatpush.msra.mxu2 %v4195_v14  ;;  %2274 = vmatpush.msra.mxu3 %v4197_v15 }
 0x1e9   : > { %1834 = vmatpush.msrb.mxu0 %v4474_v23  ;;  %2145 = vmatpush.msra.mxu1 %v4229_v43 }
 0x1ea   : > { %v1275_v61 = vpop.f32.mrf.mxu2  ;;  %v1340_v50 = vpop.f32.mrf.mxu3  ;;  %2210 = vmatpush.msra.mxu2 %v4212_v27  ;;  %2275 = vmatpush.msra.mxu3 %v4216_v45 }
 0x1eb   : > { %v1276_v51 = vadd.f32 %v1275_v61, %v1211_v7  ;;  %v1148_v32 = vpop.f32.mrf.mxu0  ;;  %v1213_v22 = vpop.f32.mrf.mxu1  ;;  %2079 = vmatpush.msra.mxu0 %v4208_v25  ;;  %2146 = vmatpush.msra.mxu1 %v4248_v9  ;;  %v697_v9 = vld [vmem:[%s3824_s2 + $0xe0] sm:$0xff] }
 0x1ec   : > { %v1149_v62 = vadd.f32 %v1148_v32, %v4253_v13  ;;  %2211 = vmatpush.msra.mxu2 %v4231_v4  ;;  %2276 = vmatpush.msra.mxu3 %v4235_v5  ;;  %v5379_v32 = vld [vmem:[#allocation65_spill] sm:$0xff] }
 0x1ed   : > { %v4472_v19 = vadd.f32 %v1340_v50, %v1276_v51  ;;  %v696_v50 = vld [vmem:[%s3824_s2 + $0xd8] sm:$0xff]  ;;  %2080 = vmatpush.msra.mxu0 %v4227_v42  ;;  %2147 = vmatpush.msra.mxu1 %v4268_v56 }
 0x1ee   : > { %1509 = vmatmul.f32.gmra.mxu0 %v693_v59  ;;  %1574 = vmatmul.f32.gmra.mxu1 %v694_v63  ;;  %v1214_v14 = vadd.f32 %v1213_v22, %v1149_v62  ;;  %v695_v62 = vld [vmem:[%s3824_s2 + $0xd0] sm:$0xff]  ;;  %v5380_v22 = vld [vmem:[#allocation45_spill] sm:$0xff] }
 0x1ef   : > { %1639 = vmatmul.f32.gmra.mxu2 %v693_v59  ;;  %1704 = vmatmul.f32.gmra.mxu3 %v694_v63  ;;  %v1357_v59 = vmax.f32 %v5380_v22, 0.0  ;;  %v5381_v63 = vld [vmem:[#allocation35_spill] sm:$0xff]  ;;  %v5393_v22 = vld [vmem:[#allocation50_spill] sm:$0xff] }
 0x1f0   : > { %2212 = vmatpush.msra.mxu2 %v4250_v10  ;;  %2277 = vmatpush.msra.mxu3 %v4257_v11  ;;  %v698_v10 = vld [vmem:[%s3824_s2 + $0xe8] sm:$0xff] }
 0x1f1   : > { %2081 = vmatpush.msra.mxu0 %v4246_v8  ;;  %2148 = vmatpush.msra.mxu1 %v4285_v54 }
 0x1f2   : > { %v1278_v15 = vpop.f32.mrf.mxu2  ;;  %v1343_v27 = vpop.f32.mrf.mxu3  ;;  %2213 = vmatpush.msra.mxu2 %v4270_v57  ;;  %2278 = vmatpush.msra.mxu3 %v4274_v58 }
 0x1f3   : > { %v1279_v45 = vadd.f32 %v1278_v15, %v1214_v14  ;;  %v1151_v7 = vpop.f32.mrf.mxu0  ;;  %v1216_v61 = vpop.f32.mrf.mxu1  ;;  %2082 = vmatpush.msra.mxu0 %v4266_v24  ;;  %2149 = vmatpush.msra.mxu1 %v4302_v33  ;;  %v1358_v14 = vmax.f32 %v5381_v63, 0.0  ;;  %v5382_v15 = vld [vmem:[#allocation67_spill] sm:$0xff]  ;;  %v5394_v63 = vld [vmem:[#allocation40_spill] sm:$0xff] }
 0x1f4   : > { %v1152_v51 = vadd.f32 %v1151_v7, %v4253_v13  ;;  %2214 = vmatpush.msra.mxu2 %v4287_v55  ;;  %2279 = vmatpush.msra.mxu3 %v4291_v20  ;;  %v699_v20 = vld [vmem:[%s3824_s2 + $0xf0] sm:$0xff] }
 0x1f5   : > { %v4491_v25 = vadd.f32 %v1343_v27, %v1279_v45  ;;  %2083 = vmatpush.msra.mxu0 %v4283_v53  ;;  %2150 = vmatpush.msra.mxu1 %v4319_v1  ;;  %v5383_v27 = vld [vmem:[#allocation68_spill] sm:$0xff]  ;;  %v5384_v45 = vld [vmem:[#allocation69_spill] sm:$0xff] }
 0x1f6   : > { %1512 = vmatmul.f32.gmra.mxu0 %v695_v62  ;;  %1577 = vmatmul.f32.gmra.mxu1 %v696_v50  ;;  %v1217_v26 = vadd.f32 %v1216_v61, %v1152_v51  ;;  %v5385_v51 = vld [vmem:[#allocation46_spill] sm:$0xff] }
 0x1f7   : > { %1642 = vmatmul.f32.gmra.mxu2 %v695_v62  ;;  %1707 = vmatmul.f32.gmra.mxu3 %v696_v50 }
 0x1f8   : > { %2084 = vmatpush.msra.mxu0 %v4300_v28  ;;  %2215 = vmatpush.msra.mxu2 %v4304_v30  ;;  %v700_v28 = vld [vmem:[%s3824_s2 + $0xf8] sm:$0xff]  ;;  %s5067_s2 = scalar_lea.sflag [#allocation15], %s511_s30 }
 0x1f9   : > { %2280 = vmatpush.msra.mxu3 %v4308_v34  ;;  %2151 = vmatpush.msra.mxu1 %v4336_v39  ;;  %v5375_v39 = vld [vmem:[#allocation60_spill] sm:$0xff] }
 0x1fa   : > { %v1281_v42 = vpop.f32.mrf.mxu2  ;;  %v1346_v43 = vpop.f32.mrf.mxu3  ;;  %2085 = vmatpush.msra.mxu0 %v4317_v0  ;;  %2216 = vmatpush.msra.mxu2 %v4321_v2  ;;  %v5370_v2 = vld [vmem:[#allocation42_spill] sm:$0xff] }
 0x1fb   : > { %v1282_v4 = vadd.f32 %v1281_v42, %v1217_v26  ;;  %v1154_v5 = vpop.f32.mrf.mxu0  ;;  %v1219_v8 = vpop.f32.mrf.mxu1  ;;  %2281 = vmatpush.msra.mxu3 %v4325_v3  ;;  %2152 = vmatpush.msra.mxu1 %v4353_v29  ;;  %v5372_v3 = vld [vmem:[#allocation44_spill] sm:$0xff]  ;;  %v1359_v26 = vmax.f32 %v5385_v51, 0.0  ;;  %v5395_v51 = vld [vmem:[#allocation51_spill] sm:$0xff] }
 0x1fc   : > { %v1155_v11 = vadd.f32 %v1154_v5, %v4253_v13  ;;  %2086 = vmatpush.msra.mxu0 %v4334_v38  ;;  %2217 = vmatpush.msra.mxu2 %v4338_v40  ;;  %v4552_v38 = vld [vmem:[%s5234_s5] sm:$0x3]  ;;  %v5376_v40 = vld [vmem:[#allocation61_spill] sm:$0xff] }
 0x1fd   : > { %v4508_v24 = vadd.f32 %v1346_v43, %v1282_v4  ;;  %2282 = vmatpush.msra.mxu3 %v4342_v52  ;;  %2153 = vmatpush.msra.mxu1 %v4370_v49  ;;  %v1355_v49 = vmax.f32 %v4112_v46, 0.0  ;;  %v4555_v46 = vperm.slane %v4552_v38, 1  ;;  %v5386_v42 = vld [vmem:[#allocation36_spill] sm:$0xff] }
 0x1fe   : > { %1515 = vmatmul.f32.gmra.mxu0 %v697_v9  ;;  %1580 = vmatmul.f32.gmra.mxu1 %v698_v10  ;;  %v1220_v56 = vadd.f32 %v1219_v8, %v1155_v11  ;;  %v1360_v43 = vmax.f32 %v5386_v42, 0.0  ;;  %v5396_v42 = vld [vmem:[#allocation41_spill] sm:$0xff] }
 0x1ff   : > { %1645 = vmatmul.f32.gmra.mxu2 %v697_v9  ;;  %1710 = vmatmul.f32.gmra.mxu3 %v698_v10  ;;  %v5387_v10 = vld [vmem:[#allocation47_spill] sm:$0xff] }
 0x200   : > { %2087 = vmatpush.msra.mxu0 %v4351_v36  ;;  %2218 = vmatpush.msra.mxu2 %v4355_v37  ;;  %v1361_v11 = vmax.f32 %v5387_v10, 0.0 }
 0x201   : > { %2283 = vmatpush.msra.mxu3 %v4359_v48  ;;  %2154 = vmatpush.msra.mxu1 %v4387_v47  ;;  %v5371_v47 = vld [vmem:[#allocation43_spill] sm:$0xff] }
 0x202   : > { %v1284_v57 = vpop.f32.mrf.mxu2  ;;  %v1349_v58 = vpop.f32.mrf.mxu3  ;;  %2088 = vmatpush.msra.mxu0 %v4368_v60  ;;  %2219 = vmatpush.msra.mxu2 %v4372_v31  ;;  %v1356_v60 = vmax.f32 %v4281_v6, 0.0  ;;  %v5373_v6 = vld [vmem:[#allocation58_spill] sm:$0xff]  ;;  %v5377_v48 = vld [vmem:[#allocation63_spill] sm:$0xff] }
 0x203   : > { %v1285_v53 = vadd.f32 %v1284_v57, %v1220_v56  ;;  %v1157_v54 = vpop.f32.mrf.mxu0  ;;  %v1222_v55 = vpop.f32.mrf.mxu1  ;;  %2284 = vmatpush.msra.mxu3 %v4376_v21  ;;  %2155 = vmatpush.msra.mxu1 %v5370_v2  ;;  %v5388_v56 = vld [vmem:[#allocation37_spill] sm:$0xff] }
 0x204   : > { %v1158_v33 = vadd.f32 %v1157_v54, %v4253_v13  ;;  %2089 = vmatpush.msra.mxu0 %v4385_v35  ;;  %2220 = vmatpush.msra.mxu2 %v4389_v17  ;;  %v1362_v57 = vmax.f32 %v5388_v56, 0.0 }
 0x205   : > { %v4525_v30 = vadd.f32 %v1349_v58, %v1285_v53  ;;  %2285 = vmatpush.msra.mxu3 %v4393_v12  ;;  %v5378_v12 = vld [vmem:[#allocation64_spill] sm:$0xff] }
 0x206   : > { %1518 = vmatmul.f32.gmra.mxu0 %v699_v20  ;;  %1583 = vmatmul.f32.gmra.mxu1 %v700_v28  ;;  %v1223_v34 = vadd.f32 %v1222_v55, %v1158_v33  ;;  %v5389_v33 = vld [vmem:[#allocation48_spill] sm:$0xff] }
 0x207   : > { %1648 = vmatmul.f32.gmra.mxu2 %v699_v20  ;;  %1713 = vmatmul.f32.gmra.mxu3 %v700_v28 }
 0x208   : > { %2090 = vmatpush.msra.mxu0 %v4402_v41  ;;  %2221 = vmatpush.msra.mxu2 %v5371_v47  ;;  %v5374_v41 = vld [vmem:[#allocation59_spill] sm:$0xff] }
 0x209   : > { %2286 = vmatpush.msra.mxu3 %v5372_v3  ;;  %2156 = vmatpush.msra.mxu1 %v5374_v41 }
 0x20a   : > { %v1287_v29 = vpop.f32.mrf.mxu2  ;;  %v1352_v36 = vpop.f32.mrf.mxu3  ;;  %2091 = vmatpush.msra.mxu0 %v5373_v6  ;;  %2222 = vmatpush.msra.mxu2 %v5375_v39  ;;  %v5391_v6 = vld [vmem:[#allocation49_spill] sm:$0xff]  ;;  %v5392_v39 = vld [vmem:[#allocation39_spill] sm:$0xff] }
 0x20b   : > { %v1288_v13 = vadd.f32 %v1287_v29, %v1223_v34  ;;  %v4535_v0 = vpop.f32.mrf.mxu0  ;;  %v4537_v1 = vpop.f32.mrf.mxu1  ;;  %2287 = vmatpush.msra.mxu3 %v5376_v40  ;;  %2157 = vmatpush.msra.mxu1 %v5377_v48  ;;  %v1363_v34 = vmax.f32 %v5389_v33, 0.0  ;;  %v5390_v29 = vld [vmem:[#allocation38_spill] sm:$0xff]  ;;  %v1365_v41 = vmax.f32 %v5391_v6, 0.0  ;;  %v1366_v40 = vmax.f32 %v5392_v39, 0.0 }
 0x20c   : > { %2092 = vmatpush.msra.mxu0 %v4436_v18  ;;  %2223 = vmatpush.msra.mxu2 %v5378_v12 }
 0x20d   : > { %v4545_v35 = vadd.f32 %v1352_v36, %v1288_v13  ;;  %2288 = vmatpush.msra.mxu3 %v5379_v32  ;;  %2158 = vmatpush.msra.mxu1 %v5382_v15  ;;  %v1364_v36 = vmax.f32 %v5390_v29, 0.0 }
 0x20e   : > { %1835 = vmatmul.f32.vlgmr.msrb.gmra.mxu0 %v1355_v49  ;;  %1900 = vmatmul.f32.vlgmr.msrb.gmra.mxu1 %v1356_v60 }
 0x20f   : > { %1965 = vmatmul.f32.vlgmr.msrb.gmra.mxu2 %v1355_v49  ;;  %2030 = vmatmul.f32.vlgmr.msrb.gmra.mxu3 %v1356_v60 }
 0x210   : > { %2093 = vmatpush.msra.mxu0 %v4453_v44  ;;  %2224 = vmatpush.msra.mxu2 %v5383_v27 }
 0x211   : > { %2289 = vmatpush.msra.mxu3 %v5384_v45  ;;  %2159 = vmatpush.msra.mxu1 %v4476_v16 }
 0x212   : > { %v1604_v52 = vpop.f32.mrf.mxu2  ;;  %v1669_v37 = vpop.f32.mrf.mxu3  ;;  %2094 = vmatpush.msra.mxu0 %v4474_v23 }
 0x213   : > { %v1605_v31 = vadd.f32 %v1604_v52, %v4555_v46  ;;  %v4564_v21 = vpop.f32.mrf.mxu0  ;;  %v4566_v17 = vpop.f32.mrf.mxu1 }
 0x215   : > { %v4574_v18 = vadd.f32 %v1669_v37, %v1605_v31 }
 0x216   : > { %1838 = vmatmul.f32.gmra.mxu0 %v1357_v59  ;;  %1903 = vmatmul.f32.gmra.mxu1 %v1358_v14 }
 0x217   : > { %1968 = vmatmul.f32.gmra.mxu2 %v1357_v59  ;;  %2033 = vmatmul.f32.gmra.mxu3 %v1358_v14  ;;  %v1367_v59 = vmax.f32 %v5393_v22, 0.0  ;;  %v1368_v14 = vmax.f32 %v5394_v63, 0.0  ;;  %v5401_v63 = vld [vmem:[#allocation54_spill] sm:$0xff] }
 0x21a   : > { %v1607_v7 = vpop.f32.mrf.mxu2  ;;  %v1672_v61 = vpop.f32.mrf.mxu3 }
 0x21b   : > { %v1608_v44 = vadd.f32 %v1607_v7, %v4555_v46  ;;  %v4581_v62 = vpop.f32.mrf.mxu0  ;;  %v4583_v50 = vpop.f32.mrf.mxu1 }
 0x21d   : > { %v4587_v4 = vadd.f32 %v1672_v61, %v1608_v44 }
 0x21e   : > { %1841 = vmatmul.f32.gmra.mxu0 %v1359_v26  ;;  %1906 = vmatmul.f32.gmra.mxu1 %v1360_v43 }
 0x21f   : > { %1971 = vmatmul.f32.gmra.mxu2 %v1359_v26  ;;  %2036 = vmatmul.f32.gmra.mxu3 %v1360_v43  ;;  %v1369_v26 = vmax.f32 %v5395_v51, 0.0  ;;  %v1370_v43 = vmax.f32 %v5396_v42, 0.0 }
 0x222   : > { %v1610_v23 = vpop.f32.mrf.mxu2  ;;  %v1675_v16 = vpop.f32.mrf.mxu3 }
 0x223   : > { %v1611_v5 = vadd.f32 %v1610_v23, %v4555_v46  ;;  %v4590_v8 = vpop.f32.mrf.mxu0  ;;  %v4592_v9 = vpop.f32.mrf.mxu1 }
 0x225   : > { %v4596_v58 = vadd.f32 %v1675_v16, %v1611_v5 }
 0x226   : > { %1844 = vmatmul.f32.gmra.mxu0 %v1361_v11  ;;  %1909 = vmatmul.f32.gmra.mxu1 %v1362_v57 }
 0x227   : > { %1974 = vmatmul.f32.gmra.mxu2 %v1361_v11  ;;  %2039 = vmatmul.f32.gmra.mxu3 %v1362_v57  ;;  %v5397_v57 = vld [vmem:[#allocation52_spill] sm:$0xff] }
 0x22a   : > { %v1613_v53 = vpop.f32.mrf.mxu2  ;;  %v1678_v54 = vpop.f32.mrf.mxu3 }
 0x22b   : > { %v1614_v55 = vadd.f32 %v1613_v53, %v4555_v46  ;;  %v4599_v20 = vpop.f32.mrf.mxu0  ;;  %v4601_v28 = vpop.f32.mrf.mxu1  ;;  %v1371_v53 = vmax.f32 %v5397_v57, 0.0  ;;  %v1378_v57 = vmax.f32 %v4472_v19, 0.0 }
 0x22d   : > { %v4605_v13 = vadd.f32 %v1678_v54, %v1614_v55  ;;  %v5398_v54 = vld [vmem:[#allocation57_spill] sm:$0xff] }
 0x22e   : > { %1847 = vmatmul.f32.gmra.mxu0 %v1363_v34  ;;  %1912 = vmatmul.f32.gmra.mxu1 %v1364_v36  ;;  %v1372_v55 = vmax.f32 %v5398_v54, 0.0 }
 0x22f   : > { %1977 = vmatmul.f32.gmra.mxu2 %v1363_v34  ;;  %2042 = vmatmul.f32.gmra.mxu3 %v1364_v36 }
 0x232   : > { %v1616_v49 = vpop.f32.mrf.mxu2  ;;  %v1681_v60 = vpop.f32.mrf.mxu3 }
 0x233   : > { %v1617_v2 = vadd.f32 %v1616_v49, %v4555_v46  ;;  %v4608_v47 = vpop.f32.mrf.mxu0  ;;  %v4610_v3 = vpop.f32.mrf.mxu1 }
 0x235   : > { %v4614_v52 = vadd.f32 %v1681_v60, %v1617_v2  ;;  %v5399_v2 = vld [vmem:[#allocation53_spill] sm:$0xff] }
 0x236   : > { %1850 = vmatmul.f32.gmra.mxu0 %v1365_v41  ;;  %1915 = vmatmul.f32.gmra.mxu1 %v1366_v40  ;;  %v1373_v6 = vmax.f32 %v5399_v2, 0.0  ;;  %v5404_v2 = vld [vmem:[#allocation56_spill] sm:$0xff] }
 0x237   : > { %1980 = vmatmul.f32.gmra.mxu2 %v1365_v41  ;;  %2045 = vmatmul.f32.gmra.mxu3 %v1366_v40  ;;  %v5400_v41 = vld [vmem:[#allocation62_spill] sm:$0xff] }
 0x238   : > { %v1374_v39 = vmax.f32 %v5400_v41, 0.0  ;;  %v1380_v41 = vmax.f32 %v4491_v25, 0.0  ;;  %v2354_v25 = vld [vmem:[#allocation11 + $0x78] sm:$0xff] }
 0x239   : > { %2505 = vmatpush.msrb.mxu2 %v2354_v25  ;;  %2375 = vmatpush.msrb.mxu0 %v2354_v25 }
 0x23a   : > { %v1619_v37 = vpop.f32.mrf.mxu2  ;;  %v1684_v48 = vpop.f32.mrf.mxu3 }
 0x23b   : > { %v1620_v31 = vadd.f32 %v1619_v37, %v4555_v46  ;;  %v4617_v12 = vpop.f32.mrf.mxu0  ;;  %v4619_v32 = vpop.f32.mrf.mxu1 }
 0x23d   : > { %v4623_v15 = vadd.f32 %v1684_v48, %v1620_v31 }
 0x23e   : > { %1853 = vmatmul.f32.gmra.mxu0 %v1367_v59  ;;  %1918 = vmatmul.f32.gmra.mxu1 %v1368_v14 }
 0x23f   : > { %1983 = vmatmul.f32.gmra.mxu2 %v1367_v59  ;;  %2048 = vmatmul.f32.gmra.mxu3 %v1368_v14  ;;  %v1375_v14 = vmax.f32 %v5401_v63, 0.0 }
 0x242   : > { %v1622_v27 = vpop.f32.mrf.mxu2  ;;  %v1687_v45 = vpop.f32.mrf.mxu3 }
 0x243   : > { %v1623_v7 = vadd.f32 %v1622_v27, %v4555_v46  ;;  %v4626_v61 = vpop.f32.mrf.mxu0  ;;  %v4628_v44 = vpop.f32.mrf.mxu1  ;;  %v5402_v27 = vld [vmem:[#allocation66_spill] sm:$0xff] }
 0x245   : > { %v4632_v23 = vadd.f32 %v1687_v45, %v1623_v7  ;;  %v1376_v45 = vmax.f32 %v5402_v27, 0.0 }
 0x246   : > { %1856 = vmatmul.f32.gmra.mxu0 %v1369_v26  ;;  %1921 = vmatmul.f32.gmra.mxu1 %v1370_v43 }
 0x247   : > { %1986 = vmatmul.f32.gmra.mxu2 %v1369_v26  ;;  %2051 = vmatmul.f32.gmra.mxu3 %v1370_v43 }
 0x24a   : > { %v1625_v16 = vpop.f32.mrf.mxu2  ;;  %v1690_v5 = vpop.f32.mrf.mxu3 }
 0x24b   : > { %v1626_v10 = vadd.f32 %v1625_v16, %v4555_v46  ;;  %v4635_v11 = vpop.f32.mrf.mxu0  ;;  %v4637_v56 = vpop.f32.mrf.mxu1 }
 0x24d   : > { %v4641_v33 = vadd.f32 %v1690_v5, %v1626_v10  ;;  %v5403_v5 = vld [vmem:[#allocation55_spill] sm:$0xff] }
 0x24e   : > { %1859 = vmatmul.f32.gmra.mxu0 %v1371_v53  ;;  %1924 = vmatmul.f32.gmra.mxu1 %v1372_v55  ;;  %v1377_v10 = vmax.f32 %v5403_v5, 0.0 }
 0x24f   : > { %1989 = vmatmul.f32.gmra.mxu2 %v1371_v53  ;;  %2054 = vmatmul.f32.gmra.mxu3 %v1372_v55 }
 0x252   : > { %v1628_v34 = vpop.f32.mrf.mxu2  ;;  %v1693_v29 = vpop.f32.mrf.mxu3 }
 0x253   : > { %v1629_v36 = vadd.f32 %v1628_v34, %v4555_v46  ;;  %v4644_v49 = vpop.f32.mrf.mxu0  ;;  %v4646_v60 = vpop.f32.mrf.mxu1 }
 0x255   : > { %v4650_v40 = vadd.f32 %v1693_v29, %v1629_v36 }
 0x256   : > { %1862 = vmatmul.f32.gmra.mxu0 %v1373_v6  ;;  %1927 = vmatmul.f32.gmra.mxu1 %v1374_v39 }
 0x257   : > { %1992 = vmatmul.f32.gmra.mxu2 %v1373_v6  ;;  %2057 = vmatmul.f32.gmra.mxu3 %v1374_v39  ;;  %v1379_v6 = vmax.f32 %v5404_v2, 0.0 }
 0x25a   : > { %v1631_v37 = vpop.f32.mrf.mxu2  ;;  %v1696_v48 = vpop.f32.mrf.mxu3 }
 0x25b   : > { %v1632_v31 = vadd.f32 %v1631_v37, %v4555_v46  ;;  %v4653_v22 = vpop.f32.mrf.mxu0  ;;  %v4655_v59 = vpop.f32.mrf.mxu1 }
 0x25d   : > { %v4659_v7 = vadd.f32 %v1696_v48, %v1632_v31 }
 0x25e   : > { %1865 = vmatmul.f32.gmra.mxu0 %v1375_v14  ;;  %1930 = vmatmul.f32.gmra.mxu1 %v1376_v45 }
 0x25f   : > { %1995 = vmatmul.f32.gmra.mxu2 %v1375_v14  ;;  %2060 = vmatmul.f32.gmra.mxu3 %v1376_v45  ;;  %v5405_v14 = vld [vmem:[#allocation32_spill] sm:$0xff]  ;;  %v1382_v45 = vmax.f32 %v4508_v24, 0.0  ;;  %v5406_v24 = vld [vmem:[#allocation33_spill] sm:$0xff] }
 0x260   : > { %v1381_v27 = vmax.f32 %v5405_v14, 0.0 }
 0x262   : > { %v1634_v51 = vpop.f32.mrf.mxu2  ;;  %v1699_v26 = vpop.f32.mrf.mxu3 }
 0x263   : > { %v1635_v42 = vadd.f32 %v1634_v51, %v4555_v46  ;;  %v4662_v43 = vpop.f32.mrf.mxu0  ;;  %v4664_v16 = vpop.f32.mrf.mxu1 }
 0x265   : > { %v4668_v53 = vadd.f32 %v1699_v26, %v1635_v42  ;;  %v2370_v26 = vld [vmem:[#allocation11 + $0xf8] sm:$0xff] }
 0x266   : > { %1868 = vmatmul.f32.gmra.mxu0 %v1377_v10  ;;  %1933 = vmatmul.f32.gmra.mxu1 %v1378_v57 }
 0x267   : > { %1998 = vmatmul.f32.gmra.mxu2 %v1377_v10  ;;  %2063 = vmatmul.f32.gmra.mxu3 %v1378_v57 }
 0x268   : > { %2570 = vmatpush.msrb.mxu3 %v2370_v26  ;;  %2440 = vmatpush.msrb.mxu1 %v2370_v26  ;;  %v1386_v26 = vmax.f32 %v4545_v35, 0.0 }
 0x26a   : > { %v1637_v54 = vpop.f32.mrf.mxu2  ;;  %v1702_v55 = vpop.f32.mrf.mxu3 }
 0x26b   : > { %v1638_v34 = vadd.f32 %v1637_v54, %v4555_v46  ;;  %v4671_v29 = vpop.f32.mrf.mxu0  ;;  %v4673_v36 = vpop.f32.mrf.mxu1 }
 0x26d   : > { %v4677_v39 = vadd.f32 %v1702_v55, %v1638_v34  ;;  %v1383_v55 = vmax.f32 %v5406_v24, 0.0  ;;  %v1384_v34 = vmax.f32 %v4525_v30, 0.0 }
 0x26e   : > { %1871 = vmatmul.f32.gmra.mxu0 %v1379_v6  ;;  %1936 = vmatmul.f32.gmra.mxu1 %v1380_v41 }
 0x26f   : > { %2001 = vmatmul.f32.gmra.mxu2 %v1379_v6  ;;  %2066 = vmatmul.f32.gmra.mxu3 %v1380_v41  ;;  %v4698_v6 = vperm.slane %v4552_v38, 0  ;;  %v2353_v41 = vld [vmem:[#allocation11 + $0x70] sm:$0xff] }
 0x270   : > { %2506 = vmatpush.msrb.mxu2 %v2353_v41  ;;  %2376 = vmatpush.msrb.mxu0 %v2353_v41 }
 0x271   : > { %v1475_v38 = vadd.f32 %v4535_v0, %v4698_v6 }
 0x272   : > { %v1640_v19 = vpop.f32.mrf.mxu2  ;;  %v1705_v37 = vpop.f32.mrf.mxu3 }
 0x273   : > { %v1641_v48 = vadd.f32 %v1640_v19, %v4555_v46  ;;  %v4680_v31 = vpop.f32.mrf.mxu0  ;;  %v4682_v63 = vpop.f32.mrf.mxu1  ;;  %v2369_v19 = vld [vmem:[#allocation11 + $0xf0] sm:$0xff] }
 0x274   : > { %2571 = vmatpush.msrb.mxu3 %v2369_v19  ;;  %2441 = vmatpush.msrb.mxu1 %v2369_v19 }
 0x275   : > { %v4686_v51 = vadd.f32 %v1705_v37, %v1641_v48 }
 0x276   : > { %1874 = vmatmul.f32.gmra.mxu0 %v1381_v27  ;;  %1939 = vmatmul.f32.gmra.mxu1 %v1382_v45 }
 0x277   : > { %2004 = vmatmul.f32.gmra.mxu2 %v1381_v27  ;;  %2069 = vmatmul.f32.gmra.mxu3 %v1382_v45  ;;  %v5407_v45 = vld [vmem:[#allocation34_spill] sm:$0xff] }
 0x278   : > { %v1385_v25 = vmax.f32 %v5407_v45, 0.0 }
 0x27a   : > { %v1643_v42 = vpop.f32.mrf.mxu2  ;;  %v1708_v5 = vpop.f32.mrf.mxu3 }
 0x27b   : > { %v1644_v10 = vadd.f32 %v1643_v42, %v4555_v46  ;;  %v4689_v57 = vpop.f32.mrf.mxu0  ;;  %v4691_v54 = vpop.f32.mrf.mxu1 }
 0x27d   : > { %v4695_v2 = vadd.f32 %v1708_v5, %v1644_v10  ;;  %v1813_v5 = vld [vmem:[%s5236_s7] sm:$0x3]  ;;  %v1540_v10 = vadd.f32 %v4537_v1, %v1475_v38  ;;  %v1478_v1 = vadd.f32 %v4564_v21, %v4698_v6 }
 0x27e   : > { %1877 = vmatmul.f32.gmra.mxu0 %v1383_v55  ;;  %1942 = vmatmul.f32.gmra.mxu1 %v1384_v34  ;;  %v4715_v24 = vperm.slane %v1813_v5, 0  ;;  %v4726_v38 = vperm.slane %v1813_v5, 1  ;;  %v2351_v21 = vld [vmem:[#allocation11 + $0x60] sm:$0xff] }
 0x27f   : > { %2007 = vmatmul.f32.gmra.mxu2 %v1383_v55  ;;  %2072 = vmatmul.f32.gmra.mxu3 %v1384_v34  ;;  %v2352_v55 = vld [vmem:[#allocation11 + $0x68] sm:$0xff] }
 0x280   : > { %v2368_v34 = vld [vmem:[#allocation11 + $0xe8] sm:$0xff]  ;;  %2507 = vmatpush.msrb.mxu2 %v2352_v55  ;;  %2377 = vmatpush.msrb.mxu0 %v2352_v55 }
 0x281   : > { %2572 = vmatpush.msrb.mxu3 %v2368_v34  ;;  %2442 = vmatpush.msrb.mxu1 %v2368_v34 }
 0x282   : > { %v1646_v37 = vpop.f32.mrf.mxu2  ;;  %v1711_v48 = vpop.f32.mrf.mxu3  ;;  %2508 = vmatpush.msrb.mxu2 %v2351_v21  ;;  %2378 = vmatpush.msrb.mxu0 %v2351_v21 }
 0x283   : > { %v1647_v14 = vadd.f32 %v1646_v37, %v4555_v46  ;;  %v4701_v30 = vpop.f32.mrf.mxu0  ;;  %v4703_v27 = vpop.f32.mrf.mxu1 }
 0x285   : > { %v4709_v42 = vadd.f32 %v1711_v48, %v1647_v14  ;;  %v1717_v48 = vmax.f32 %v1540_v10, 0.0  ;;  %v1718_v14 = vmax.f32 %v4574_v18, 0.0  ;;  %v2367_v18 = vld [vmem:[#allocation11 + $0xe0] sm:$0xff] }
 0x286   : > { %1880 = vmatmul.f32.gmra.mxu0 %v1385_v25  ;;  %1945 = vmatmul.f32.gmra.mxu1 %v1386_v26 }
 0x287   : > { %2010 = vmatmul.f32.gmra.mxu2 %v1385_v25  ;;  %2075 = vmatmul.f32.gmra.mxu3 %v1386_v26 }
 0x288   : > { %2573 = vmatpush.msrb.mxu3 %v2367_v18  ;;  %2443 = vmatpush.msrb.mxu1 %v2367_v18 }
 0x28a   : > { %v1649_v35 = vpop.f32.mrf.mxu2  ;;  %v1714_v0 = vpop.f32.mrf.mxu3 }
 0x28b   : > { %v1650_v41 = vadd.f32 %v1649_v35, %v4555_v46  ;;  %v1836_v19 = vpop.f32.mrf.mxu0  ;;  %v1901_v37 = vpop.f32.mrf.mxu1  ;;  %v1543_v46 = vadd.f32 %v4566_v17, %v1478_v1  ;;  %v2366_v1 = vld [vmem:[#allocation11 + $0xd8] sm:$0xff] }
 0x28c   : > { %v1837_v45 = vadd.f32 %v1836_v19, %v4715_v24  ;;  %2574 = vmatpush.msrb.mxu3 %v2366_v1  ;;  %2444 = vmatpush.msrb.mxu1 %v2366_v1 }
 0x28d   : > { %v4722_v25 = vadd.f32 %v1714_v0, %v1650_v41  ;;  %v1719_v17 = vmax.f32 %v1543_v46, 0.0  ;;  %v1720_v0 = vmax.f32 %v4587_v4, 0.0  ;;  %v1481_v41 = vadd.f32 %v4581_v62, %v4698_v6  ;;  %v2350_v4 = vld [vmem:[#allocation11 + $0x58] sm:$0xff] }
 0x28e   : > { %v4724_v26 = vadd.f32 %v1901_v37, %v1837_v45  ;;  %2095 = vmatmul.f32.vlgmr.msra.gmra.mxu0 %v1717_v48  ;;  %2160 = vmatmul.f32.vlgmr.msra.gmra.mxu1 %v1718_v14 }
 0x28f   : > { %2225 = vmatmul.f32.vlgmr.msra.gmra.mxu2 %v1717_v48  ;;  %2290 = vmatmul.f32.vlgmr.msra.gmra.mxu3 %v1718_v14  ;;  %v1546_v14 = vadd.f32 %v4583_v50, %v1481_v41  ;;  %v1484_v50 = vadd.f32 %v4590_v8, %v4698_v6 }
 0x290   : > { %2635 = vst [vmem:[%s4730_s6] sm:$0xff] %v4724_v26  ;;  %2509 = vmatpush.msrb.mxu2 %v2350_v4  ;;  %2379 = vmatpush.msrb.mxu0 %v2350_v4 }
 0x292   : > { %v1966_v10 = vpop.f32.mrf.mxu2  ;;  %v2031_v55 = vpop.f32.mrf.mxu3 }
 0x293   : > { %v1967_v5 = vadd.f32 %v1966_v10, %v4726_v38  ;;  %v1839_v34 = vpop.f32.mrf.mxu0  ;;  %v1904_v35 = vpop.f32.mrf.mxu1  ;;  %v1721_v10 = vmax.f32 %v1546_v14, 0.0 }
 0x294   : > { %v1840_v19 = vadd.f32 %v1839_v34, %v4715_v24 }
 0x295   : > { %v4739_v37 = vadd.f32 %v2031_v55, %v1967_v5  ;;  %v1722_v55 = vmax.f32 %v4596_v58, 0.0  ;;  %v2349_v58 = vld [vmem:[#allocation11 + $0x50] sm:$0xff] }
 0x296   : > { %v4741_v48 = vadd.f32 %v1904_v35, %v1840_v19  ;;  %2098 = vmatmul.f32.gmra.mxu0 %v1719_v17  ;;  %2163 = vmatmul.f32.gmra.mxu1 %v1720_v0 }
 0x297   : > { %2636 = vst [vmem:[%s4730_s6 + $0x8] sm:$0xff] %v4739_v37  ;;  %2228 = vmatmul.f32.gmra.mxu2 %v1719_v17  ;;  %2293 = vmatmul.f32.gmra.mxu3 %v1720_v0  ;;  %v1549_v17 = vadd.f32 %v4592_v9, %v1484_v50  ;;  %v2365_v0 = vld [vmem:[#allocation11 + $0xd0] sm:$0xff]  ;;  %v1487_v9 = vadd.f32 %v4599_v20, %v4698_v6 }
 0x298   : > { %2637 = vst [vmem:[%s4730_s6 + $0x10] sm:$0xff] %v4741_v48  ;;  %2510 = vmatpush.msrb.mxu2 %v2349_v58  ;;  %2575 = vmatpush.msrb.mxu3 %v2365_v0 }
 0x299   : > { %2380 = vmatpush.msrb.mxu0 %v2349_v58  ;;  %2445 = vmatpush.msrb.mxu1 %v2365_v0  ;;  %v1723_v1 = vmax.f32 %v1549_v17, 0.0  ;;  %v1726_v0 = vmax.f32 %v4614_v52, 0.0  ;;  %v2347_v52 = vld [vmem:[#allocation11 + $0x40] sm:$0xff] }
 0x29a   : > { %v1969_v62 = vpop.f32.mrf.mxu2  ;;  %v2034_v45 = vpop.f32.mrf.mxu3 }
 0x29b   : > { %v1970_v46 = vadd.f32 %v1969_v62, %v4726_v38  ;;  %v1842_v21 = vpop.f32.mrf.mxu0  ;;  %v1907_v18 = vpop.f32.mrf.mxu1  ;;  %v1724_v62 = vmax.f32 %v4605_v13, 0.0  ;;  %v2348_v13 = vld [vmem:[#allocation11 + $0x48] sm:$0xff] }
 0x29c   : > { %v1843_v5 = vadd.f32 %v1842_v21, %v4715_v24  ;;  %2511 = vmatpush.msrb.mxu2 %v2348_v13  ;;  %2381 = vmatpush.msrb.mxu0 %v2348_v13  ;;  %v1728_v13 = vmax.f32 %v4623_v15, 0.0  ;;  %v2346_v15 = vld [vmem:[#allocation11 + $0x38] sm:$0xff] }
 0x29d   : > { %v4753_v34 = vadd.f32 %v2034_v45, %v1970_v46 }
 0x29e   : > { %v4755_v35 = vadd.f32 %v1907_v18, %v1843_v5  ;;  %2101 = vmatmul.f32.gmra.mxu0 %v1721_v10  ;;  %2166 = vmatmul.f32.gmra.mxu1 %v1722_v55  ;;  %v1552_v18 = vadd.f32 %v4601_v28, %v1487_v9  ;;  %v1490_v28 = vadd.f32 %v4608_v47, %v4698_v6 }
 0x29f   : > { %2638 = vst [vmem:[%s4730_s6 + $0x18] sm:$0xff] %v4753_v34  ;;  %2231 = vmatmul.f32.gmra.mxu2 %v1721_v10  ;;  %2296 = vmatmul.f32.gmra.mxu3 %v1722_v55  ;;  %v2364_v10 = vld [vmem:[#allocation11 + $0xc8] sm:$0xff] }
 0x2a0   : > { %2639 = vst [vmem:[%s4730_s6 + $0x20] sm:$0xff] %v4755_v35  ;;  %2576 = vmatpush.msrb.mxu3 %v2364_v10  ;;  %2446 = vmatpush.msrb.mxu1 %v2364_v10  ;;  %v1725_v58 = vmax.f32 %v1552_v18, 0.0 }
 0x2a1   : > { %2512 = vmatpush.msrb.mxu2 %v2347_v52  ;;  %2382 = vmatpush.msrb.mxu0 %v2347_v52 }
 0x2a2   : > { %v1972_v8 = vpop.f32.mrf.mxu2  ;;  %v2037_v41 = vpop.f32.mrf.mxu3 }
 0x2a3   : > { %v1973_v19 = vadd.f32 %v1972_v8, %v4726_v38  ;;  %v1845_v14 = vpop.f32.mrf.mxu0  ;;  %v1910_v4 = vpop.f32.mrf.mxu1  ;;  %2513 = vmatpush.msrb.mxu2 %v2346_v15  ;;  %2383 = vmatpush.msrb.mxu0 %v2346_v15 }
 0x2a4   : > { %v1846_v45 = vadd.f32 %v1845_v14, %v4715_v24  ;;  %v1555_v14 = vadd.f32 %v4610_v3, %v1490_v28  ;;  %v1493_v3 = vadd.f32 %v4617_v12, %v4698_v6 }
 0x2a5   : > { %v4767_v46 = vadd.f32 %v2037_v41, %v1973_v19 }
 0x2a6   : > { %v4769_v21 = vadd.f32 %v1910_v4, %v1846_v45  ;;  %2104 = vmatmul.f32.gmra.mxu0 %v1723_v1  ;;  %2169 = vmatmul.f32.gmra.mxu1 %v1724_v62  ;;  %v2363_v4 = vld [vmem:[#allocation11 + $0xc0] sm:$0xff]  ;;  %v1727_v18 = vmax.f32 %v1555_v14, 0.0  ;;  %v1730_v14 = vmax.f32 %v4632_v23, 0.0  ;;  %v2345_v23 = vld [vmem:[#allocation11 + $0x30] sm:$0xff] }
 0x2a7   : > { %2640 = vst [vmem:[%s4730_s6 + $0x28] sm:$0xff] %v4767_v46  ;;  %2234 = vmatmul.f32.gmra.mxu2 %v1723_v1  ;;  %2299 = vmatmul.f32.gmra.mxu3 %v1724_v62 }
 0x2a8   : > { %2641 = vst [vmem:[%s4730_s6 + $0x30] sm:$0xff] %v4769_v21  ;;  %2577 = vmatpush.msrb.mxu3 %v2363_v4  ;;  %2447 = vmatpush.msrb.mxu1 %v2363_v4 }
 0x2a9   : > { %2514 = vmatpush.msrb.mxu2 %v2345_v23  ;;  %2384 = vmatpush.msrb.mxu0 %v2345_v23 }
 0x2aa   : > { %v1975_v20 = vpop.f32.mrf.mxu2  ;;  %v2040_v55 = vpop.f32.mrf.mxu3 }
 0x2ab   : > { %v1976_v50 = vadd.f32 %v1975_v20, %v4726_v38  ;;  %v1848_v5 = vpop.f32.mrf.mxu0  ;;  %v1913_v17 = vpop.f32.mrf.mxu1 }
 0x2ac   : > { %v1849_v8 = vadd.f32 %v1848_v5, %v4715_v24  ;;  %v2362_v5 = vld [vmem:[#allocation11 + $0xb8] sm:$0xff] }
 0x2ad   : > { %v4781_v41 = vadd.f32 %v2040_v55, %v1976_v50  ;;  %v1558_v50 = vadd.f32 %v4619_v32, %v1493_v3  ;;  %2578 = vmatpush.msrb.mxu3 %v2362_v5  ;;  %2448 = vmatpush.msrb.mxu1 %v2362_v5  ;;  %v1496_v32 = vadd.f32 %v4626_v61, %v4698_v6 }
 0x2ae   : > { %v4783_v19 = vadd.f32 %v1913_v17, %v1849_v8  ;;  %2107 = vmatmul.f32.gmra.mxu0 %v1725_v58  ;;  %2172 = vmatmul.f32.gmra.mxu1 %v1726_v0 }
 0x2af   : > { %2642 = vst [vmem:[%s4730_s6 + $0x38] sm:$0xff] %v4781_v41  ;;  %2237 = vmatmul.f32.gmra.mxu2 %v1725_v58  ;;  %2302 = vmatmul.f32.gmra.mxu3 %v1726_v0  ;;  %v1729_v8 = vmax.f32 %v1558_v50, 0.0 }
 0x2b0   : > { %2643 = vst [vmem:[%s4730_s6 + $0x40] sm:$0xff] %v4783_v19 }
 0x2b2   : > { %v1978_v47 = vpop.f32.mrf.mxu2  ;;  %v2043_v1 = vpop.f32.mrf.mxu3 }
 0x2b3   : > { %v1979_v62 = vadd.f32 %v1978_v47, %v4726_v38  ;;  %v1851_v9 = vpop.f32.mrf.mxu0  ;;  %v1916_v45 = vpop.f32.mrf.mxu1 }
 0x2b4   : > { %v1852_v10 = vadd.f32 %v1851_v9, %v4715_v24 }
 0x2b5   : > { %v4795_v20 = vadd.f32 %v2043_v1, %v1979_v62  ;;  %v1561_v1 = vadd.f32 %v4628_v44, %v1496_v32  ;;  %v2361_v62 = vld [vmem:[#allocation11 + $0xb0] sm:$0xff]  ;;  %v1499_v44 = vadd.f32 %v4635_v11, %v4698_v6  ;;  %v1734_v32 = vmax.f32 %v4650_v40, 0.0  ;;  %v2343_v40 = vld [vmem:[#allocation11 + $0x20] sm:$0xff] }
 0x2b6   : > { %v4797_v55 = vadd.f32 %v1916_v45, %v1852_v10  ;;  %2110 = vmatmul.f32.gmra.mxu0 %v1727_v18  ;;  %2175 = vmatmul.f32.gmra.mxu1 %v1728_v13  ;;  %v1732_v10 = vmax.f32 %v4641_v33, 0.0  ;;  %v2344_v33 = vld [vmem:[#allocation11 + $0x28] sm:$0xff] }
 0x2b7   : > { %2644 = vst [vmem:[%s4730_s6 + $0x48] sm:$0xff] %v4795_v20  ;;  %2240 = vmatmul.f32.gmra.mxu2 %v1727_v18  ;;  %2305 = vmatmul.f32.gmra.mxu3 %v1728_v13  ;;  %v1731_v3 = vmax.f32 %v1561_v1, 0.0 }
 0x2b8   : > { %2645 = vst [vmem:[%s4730_s6 + $0x50] sm:$0xff] %v4797_v55  ;;  %2579 = vmatpush.msrb.mxu3 %v2361_v62  ;;  %2449 = vmatpush.msrb.mxu1 %v2361_v62 }
 0x2b9   : > { %2515 = vmatpush.msrb.mxu2 %v2344_v33  ;;  %2385 = vmatpush.msrb.mxu0 %v2344_v33 }
 0x2ba   : > { %v1981_v12 = vpop.f32.mrf.mxu2  ;;  %v2046_v17 = vpop.f32.mrf.mxu3 }
 0x2bb   : > { %v1982_v58 = vadd.f32 %v1981_v12, %v4726_v38  ;;  %v1854_v0 = vpop.f32.mrf.mxu0  ;;  %v1919_v28 = vpop.f32.mrf.mxu1  ;;  %v1564_v12 = vadd.f32 %v4637_v56, %v1499_v44  ;;  %v1502_v56 = vadd.f32 %v4644_v49, %v4698_v6  ;;  %2516 = vmatpush.msrb.mxu2 %v2343_v40  ;;  %2386 = vmatpush.msrb.mxu0 %v2343_v40  ;;  %v2357_v40 = vld [vmem:[#allocation11 + $0x90] sm:$0xff] }
 0x2bc   : > { %v1855_v52 = vadd.f32 %v1854_v0, %v4715_v24 }
 0x2bd   : > { %v4809_v4 = vadd.f32 %v2046_v17, %v1982_v58  ;;  %v2360_v17 = vld [vmem:[#allocation11 + $0xa8] sm:$0xff]  ;;  %v1567_v62 = vadd.f32 %v4646_v60, %v1502_v56  ;;  %v1505_v60 = vadd.f32 %v4653_v22, %v4698_v6 }
 0x2be   : > { %v4811_v47 = vadd.f32 %v1919_v28, %v1855_v52  ;;  %2113 = vmatmul.f32.gmra.mxu0 %v1729_v8  ;;  %2178 = vmatmul.f32.gmra.mxu1 %v1730_v14 }
 0x2bf   : > { %2646 = vst [vmem:[%s4730_s6 + $0x58] sm:$0xff] %v4809_v4  ;;  %2243 = vmatmul.f32.gmra.mxu2 %v1729_v8  ;;  %2308 = vmatmul.f32.gmra.mxu3 %v1730_v14  ;;  %v1733_v14 = vmax.f32 %v1564_v12, 0.0  ;;  %v1570_v33 = vadd.f32 %v4655_v59, %v1505_v60  ;;  %v1508_v59 = vadd.f32 %v4662_v43, %v4698_v6 }
 0x2c0   : > { %2647 = vst [vmem:[%s4730_s6 + $0x60] sm:$0xff] %v4811_v47  ;;  %2580 = vmatpush.msrb.mxu3 %v2360_v17  ;;  %2450 = vmatpush.msrb.mxu1 %v2360_v17  ;;  %v2358_v17 = vld [vmem:[#allocation11 + $0x98] sm:$0xff] }
 0x2c2   : > { %v1984_v61 = vpop.f32.mrf.mxu2  ;;  %v2049_v9 = vpop.f32.mrf.mxu3 }
 0x2c3   : > { %v1985_v45 = vadd.f32 %v1984_v61, %v4726_v38  ;;  %v1857_v18 = vpop.f32.mrf.mxu0  ;;  %v1922_v13 = vpop.f32.mrf.mxu1  ;;  %v2359_v61 = vld [vmem:[#allocation11 + $0xa0] sm:$0xff] }
 0x2c4   : > { %v1858_v50 = vadd.f32 %v1857_v18, %v4715_v24  ;;  %2581 = vmatpush.msrb.mxu3 %v2359_v61  ;;  %2451 = vmatpush.msrb.mxu1 %v2359_v61 }
 0x2c5   : > { %v4823_v15 = vadd.f32 %v2049_v9, %v1985_v45 }
 0x2c6   : > { %v4825_v5 = vadd.f32 %v1922_v13, %v1858_v50  ;;  %2116 = vmatmul.f32.gmra.mxu0 %v1731_v3  ;;  %2181 = vmatmul.f32.gmra.mxu1 %v1732_v10 }
 0x2c7   : > { %2648 = vst [vmem:[%s4730_s6 + $0x68] sm:$0xff] %v4823_v15  ;;  %2246 = vmatmul.f32.gmra.mxu2 %v1731_v3  ;;  %2311 = vmatmul.f32.gmra.mxu3 %v1732_v10  ;;  %v1735_v3 = vmax.f32 %v1567_v62, 0.0  ;;  %v1736_v10 = vmax.f32 %v4659_v7, 0.0  ;;  %v2342_v7 = vld [vmem:[#allocation11 + $0x18] sm:$0xff]  ;;  %v1573_v62 = vadd.f32 %v4664_v16, %v1508_v59  ;;  %v1511_v16 = vadd.f32 %v4671_v29, %v4698_v6 }
 0x2c8   : > { %2649 = vst [vmem:[%s4730_s6 + $0x70] sm:$0xff] %v4825_v5  ;;  %2517 = vmatpush.msrb.mxu2 %v2342_v7  ;;  %2582 = vmatpush.msrb.mxu3 %v2358_v17 }
 0x2c9   : > { %2387 = vmatpush.msrb.mxu0 %v2342_v7  ;;  %2452 = vmatpush.msrb.mxu1 %v2358_v17 }
 0x2ca   : > { %v1987_v11 = vpop.f32.mrf.mxu2  ;;  %v2052_v58 = vpop.f32.mrf.mxu3  ;;  %2583 = vmatpush.msrb.mxu3 %v2357_v40 }
 0x2cb   : > { %v1988_v0 = vadd.f32 %v1987_v11, %v4726_v38  ;;  %v1860_v28 = vpop.f32.mrf.mxu0  ;;  %v1925_v8 = vpop.f32.mrf.mxu1  ;;  %2453 = vmatpush.msrb.mxu1 %v2357_v40 }
 0x2cc   : > { %v1861_v52 = vadd.f32 %v1860_v28, %v4715_v24 }
 0x2cd   : > { %v4837_v1 = vadd.f32 %v2052_v58, %v1988_v0 }
 0x2ce   : > { %v4839_v23 = vadd.f32 %v1925_v8, %v1861_v52  ;;  %2119 = vmatmul.f32.gmra.mxu0 %v1733_v14  ;;  %2184 = vmatmul.f32.gmra.mxu1 %v1734_v32  ;;  %v1737_v8 = vmax.f32 %v1570_v33, 0.0  ;;  %v2356_v33 = vld [vmem:[#allocation11 + $0x88] sm:$0xff] }
 0x2cf   : > { %2650 = vst [vmem:[%s4730_s6 + $0x78] sm:$0xff] %v4837_v1  ;;  %2249 = vmatmul.f32.gmra.mxu2 %v1733_v14  ;;  %2314 = vmatmul.f32.gmra.mxu3 %v1734_v32  ;;  %v1738_v14 = vmax.f32 %v4668_v53, 0.0  ;;  %v2341_v53 = vld [vmem:[#allocation11 + $0x10] sm:$0xff] }
 0x2d0   : > { %2651 = vst [vmem:[%s4730_s6 + $0x80] sm:$0xff] %v4839_v23  ;;  %2518 = vmatpush.msrb.mxu2 %v2341_v53  ;;  %2388 = vmatpush.msrb.mxu0 %v2341_v53 }
 0x2d1   : > { %2584 = vmatpush.msrb.mxu3 %v2356_v33  ;;  %2454 = vmatpush.msrb.mxu1 %v2356_v33  ;;  %v1746_v33 = vmax.f32 %v4709_v42, 0.0 }
 0x2d2   : > { %v1990_v49 = vpop.f32.mrf.mxu2  ;;  %v2055_v9 = vpop.f32.mrf.mxu3 }
 0x2d3   : > { %v1991_v45 = vadd.f32 %v1990_v49, %v4726_v38  ;;  %v1863_v18 = vpop.f32.mrf.mxu0  ;;  %v1928_v13 = vpop.f32.mrf.mxu1 }
 0x2d4   : > { %v1864_v44 = vadd.f32 %v1863_v18, %v4715_v24  ;;  %v1739_v18 = vmax.f32 %v1573_v62, 0.0 }
 0x2d5   : > { %v4851_v50 = vadd.f32 %v2055_v9, %v1991_v45 }
 0x2d6   : > { %v4853_v12 = vadd.f32 %v1928_v13, %v1864_v44  ;;  %2122 = vmatmul.f32.gmra.mxu0 %v1735_v3  ;;  %2187 = vmatmul.f32.gmra.mxu1 %v1736_v10  ;;  %v1740_v13 = vmax.f32 %v4677_v39, 0.0  ;;  %v1576_v44 = vadd.f32 %v4673_v36, %v1511_v16  ;;  %v2340_v39 = vld [vmem:[#allocation11 + $0x8] sm:$0xff]  ;;  %v1514_v36 = vadd.f32 %v4680_v31, %v4698_v6 }
 0x2d7   : > { %2652 = vst [vmem:[%s4730_s6 + $0x88] sm:$0xff] %v4851_v50  ;;  %2252 = vmatmul.f32.gmra.mxu2 %v1735_v3  ;;  %2317 = vmatmul.f32.gmra.mxu3 %v1736_v10 }
 0x2d8   : > { %2653 = vst [vmem:[%s4730_s6 + $0x90] sm:$0xff] %v4853_v12  ;;  %2519 = vmatpush.msrb.mxu2 %v2340_v39  ;;  %2389 = vmatpush.msrb.mxu0 %v2340_v39  ;;  %v1579_v62 = vadd.f32 %v4682_v63, %v1514_v36  ;;  %v1517_v63 = vadd.f32 %v4689_v57, %v4698_v6  ;;  %v1748_v36 = vmax.f32 %v4722_v25, 0.0 }
 0x2da   : > { %v1993_v22 = vpop.f32.mrf.mxu2  ;;  %v2058_v11 = vpop.f32.mrf.mxu3 }
 0x2db   : > { %v1994_v58 = vadd.f32 %v1993_v22, %v4726_v38  ;;  %v1866_v0 = vpop.f32.mrf.mxu0  ;;  %v1931_v28 = vpop.f32.mrf.mxu1 }
 0x2dc   : > { %v1867_v32 = vadd.f32 %v1866_v0, %v4715_v24  ;;  %v1742_v0 = vmax.f32 %v4686_v51, 0.0 }
 0x2dd   : > { %v4865_v56 = vadd.f32 %v2058_v11, %v1994_v58  ;;  %v1741_v58 = vmax.f32 %v1576_v44, 0.0 }
 0x2de   : > { %v4867_v52 = vadd.f32 %v1931_v28, %v1867_v32  ;;  %2125 = vmatmul.f32.gmra.mxu0 %v1737_v8  ;;  %2190 = vmatmul.f32.gmra.mxu1 %v1738_v14  ;;  %v2355_v32 = vld [vmem:[#allocation11 + $0x80] sm:$0xff] }
 0x2df   : > { %2654 = vst [vmem:[%s4730_s6 + $0x98] sm:$0xff] %v4865_v56  ;;  %2255 = vmatmul.f32.gmra.mxu2 %v1737_v8  ;;  %2320 = vmatmul.f32.gmra.mxu3 %v1738_v14  ;;  %v2339_v14 = vld [vmem:[#allocation11] sm:$0xff] }
 0x2e0   : > { %2655 = vst [vmem:[%s4730_s6 + $0xa0] sm:$0xff] %v4867_v52  ;;  %2520 = vmatpush.msrb.mxu2 %v2339_v14  ;;  %2390 = vmatpush.msrb.mxu0 %v2339_v14 }
 0x2e1   : > { %2455 = vmatpush.msrb.mxu1 %v2355_v32  ;;  %2585 = vmatpush.msrb.mxu3 %v2355_v32 }
 0x2e2   : > { %v1996_v43 = vpop.f32.mrf.mxu2  ;;  %v2061_v61 = vpop.f32.mrf.mxu3 }
 0x2e3   : > { %v1997_v49 = vadd.f32 %v1996_v43, %v4726_v38  ;;  %v1869_v9 = vpop.f32.mrf.mxu0  ;;  %v1934_v45 = vpop.f32.mrf.mxu1 }
 0x2e4   : > { %v1870_v3 = vadd.f32 %v1869_v9, %v4715_v24 }
 0x2e5   : > { %v4879_v10 = vadd.f32 %v2061_v61, %v1997_v49  ;;  %v1743_v61 = vmax.f32 %v1579_v62, 0.0  ;;  %v1744_v49 = vmax.f32 %v4695_v2, 0.0 }
 0x2e6   : > { %v4881_v60 = vadd.f32 %v1934_v45, %v1870_v3  ;;  %2128 = vmatmul.f32.gmra.mxu0 %v1739_v18  ;;  %2193 = vmatmul.f32.gmra.mxu1 %v1740_v13 }
 0x2e7   : > { %2656 = vst [vmem:[%s4730_s6 + $0xa8] sm:$0xff] %v4879_v10  ;;  %2258 = vmatmul.f32.gmra.mxu2 %v1739_v18  ;;  %2323 = vmatmul.f32.gmra.mxu3 %v1740_v13  ;;  %v1582_v13 = vadd.f32 %v4691_v54, %v1517_v63 }
 0x2e8   : > { %2657 = vst [vmem:[%s4730_s6 + $0xb0] sm:$0xff] %v4881_v60 }
 0x2e9   : > { %v1745_v39 = vmax.f32 %v1582_v13, 0.0 }
 0x2ea   : > { %v1999_v29 = vpop.f32.mrf.mxu2  ;;  %v2064_v7 = vpop.f32.mrf.mxu3 }
 0x2eb   : > { %v2000_v17 = vadd.f32 %v1999_v29, %v4726_v38  ;;  %v1872_v22 = vpop.f32.mrf.mxu0  ;;  %v1937_v11 = vpop.f32.mrf.mxu1  ;;  %v1520_v29 = vadd.f32 %v4701_v30, %v4698_v6 }
 0x2ec   : > { %v1873_v28 = vadd.f32 %v1872_v22, %v4715_v24 }
 0x2ed   : > { %v4893_v8 = vadd.f32 %v2064_v7, %v2000_v17  ;;  %v1585_v22 = vadd.f32 %v4703_v27, %v1520_v29 }
 0x2ee   : > { %v4895_v59 = vadd.f32 %v1937_v11, %v1873_v28  ;;  %2131 = vmatmul.f32.gmra.mxu0 %v1741_v58  ;;  %2196 = vmatmul.f32.gmra.mxu1 %v1742_v0 }
 0x2ef   : > { %2658 = vst [vmem:[%s4730_s6 + $0xb8] sm:$0xff] %v4893_v8  ;;  %2261 = vmatmul.f32.gmra.mxu2 %v1741_v58  ;;  %2326 = vmatmul.f32.gmra.mxu3 %v1742_v0  ;;  %v1747_v0 = vmax.f32 %v1585_v22, 0.0 }
 0x2f0   : > { %2659 = vst [vmem:[%s4730_s6 + $0xc0] sm:$0xff] %v4895_v59 }
 0x2f2   : > { %v2002_v31 = vpop.f32.mrf.mxu2  ;;  %v2067_v51 = vpop.f32.mrf.mxu3 }
 0x2f3   : > { %v2003_v53 = vadd.f32 %v2002_v31, %v4726_v38  ;;  %v1875_v40 = vpop.f32.mrf.mxu0  ;;  %v1940_v43 = vpop.f32.mrf.mxu1 }
 0x2f4   : > { %v1876_v9 = vadd.f32 %v1875_v40, %v4715_v24 }
 0x2f5   : > { %v4907_v45 = vadd.f32 %v2067_v51, %v2003_v53 }
 0x2f6   : > { %v4909_v18 = vadd.f32 %v1940_v43, %v1876_v9  ;;  %2134 = vmatmul.f32.gmra.mxu0 %v1743_v61  ;;  %2199 = vmatmul.f32.gmra.mxu1 %v1744_v49 }
 0x2f7   : > { %2660 = vst [vmem:[%s4730_s6 + $0xc8] sm:$0xff] %v4907_v45  ;;  %2264 = vmatmul.f32.gmra.mxu2 %v1743_v61  ;;  %2329 = vmatmul.f32.gmra.mxu3 %v1744_v49 }
 0x2f8   : > { %2661 = vst [vmem:[%s4730_s6 + $0xd0] sm:$0xff] %v4909_v18 }
 0x2fa   : > { %v2005_v2 = vpop.f32.mrf.mxu2  ;;  %v2070_v16 = vpop.f32.mrf.mxu3 }
 0x2fb   : > { %v2006_v57 = vadd.f32 %v2005_v2, %v4726_v38  ;;  %v1878_v3 = vpop.f32.mrf.mxu0  ;;  %v1943_v44 = vpop.f32.mrf.mxu1 }
 0x2fc   : > { %v1879_v7 = vadd.f32 %v1878_v3, %v4715_v24 }
 0x2fd   : > { %v4921_v17 = vadd.f32 %v2070_v16, %v2006_v57 }
 0x2fe   : > { %v4923_v54 = vadd.f32 %v1943_v44, %v1879_v7  ;;  %2137 = vmatmul.f32.gmra.mxu0 %v1745_v39  ;;  %2202 = vmatmul.f32.gmra.mxu1 %v1746_v33 }
 0x2ff   : > { %2662 = vst [vmem:[%s4730_s6 + $0xd8] sm:$0xff] %v4921_v17  ;;  %2267 = vmatmul.f32.gmra.mxu2 %v1745_v39  ;;  %2332 = vmatmul.f32.gmra.mxu3 %v1746_v33 }
 0x300   : > { %2663 = vst [vmem:[%s4730_s6 + $0xe0] sm:$0xff] %v4923_v54 }
 0x302   : > { %v2008_v42 = vpop.f32.mrf.mxu2  ;;  %v2073_v6 = vpop.f32.mrf.mxu3 }
 0x303   : > { %v2009_v30 = vadd.f32 %v2008_v42, %v4726_v38  ;;  %v1881_v11 = vpop.f32.mrf.mxu0  ;;  %v1946_v58 = vpop.f32.mrf.mxu1 }
 0x304   : > { %v1882_v28 = vadd.f32 %v1881_v11, %v4715_v24 }
 0x305   : > { %v4933_v14 = vadd.f32 %v2073_v6, %v2009_v30 }
 0x306   : > { %v4935_v32 = vadd.f32 %v1946_v58, %v1882_v28  ;;  %2140 = vmatmul.f32.gmra.mxu0 %v1747_v0  ;;  %2205 = vmatmul.f32.gmra.mxu1 %v1748_v36 }
 0x307   : > { %2664 = vst [vmem:[%s4730_s6 + $0xe8] sm:$0xff] %v4933_v14  ;;  %2270 = vmatmul.f32.gmra.mxu2 %v1747_v0  ;;  %2335 = vmatmul.f32.gmra.mxu3 %v1748_v36 }
 0x308   : > { %2665 = vst [vmem:[%s4730_s6 + $0xf0] sm:$0xff] %v4935_v32 }
 0x30a   : > { %v2011_v27 = vpop.f32.mrf.mxu2  ;;  %v2076_v62 = vpop.f32.mrf.mxu3 }
 0x30b   : > { %v2012_v25 = vadd.f32 %v2011_v27, %v4726_v38  ;;  %v2096_v31 = vpop.f32.mrf.mxu0  ;;  %v2161_v51 = vpop.f32.mrf.mxu1 }
 0x30c   : > { %v2097_v53 = vadd.f32 %v2096_v31, %v4715_v24 }
 0x30d   : > { %v4943_v40 = vadd.f32 %v2076_v62, %v2012_v25 }
 0x30e   : > { %v2162_v43 = vadd.f32 %v2161_v51, %v2097_v53  ;;  %2391 = vmatmul.f32.vlgmr.msrb.gmra.mxu0 %v4724_v26  ;;  %2456 = vmatmul.f32.vlgmr.msrb.gmra.mxu1 %v4739_v37 }
 0x30f   : > { %2666 = vst [vmem:[%s4730_s6 + $0xf8] sm:$0xff] %v4943_v40 }
 0x310   : > { %2667 = vst [vmem:[%s4950_s27] sm:$0xff] %v2162_v43  ;;  %2521 = vmatmul.f32.vlgmr.msrb.gmra.mxu2 %v2162_v43 }
 0x312   : > { %v2226_v61 = vpop.f32.mrf.mxu2  ;;  %v2291_v49 = vpop.f32.mrf.mxu3 }
 0x313   : > { %v2227_v63 = vadd.f32 %v2226_v61, %v4726_v38  ;;  %v2099_v9 = vpop.f32.mrf.mxu0  ;;  %v2164_v13 = vpop.f32.mrf.mxu1 }
 0x314   : > { %v2100_v2 = vadd.f32 %v2099_v9, %v4715_v24 }
 0x315   : > { %v2292_v26 = vadd.f32 %v2291_v49, %v2227_v63 }
 0x316   : > { %v2165_v16 = vadd.f32 %v2164_v13, %v2100_v2  ;;  %2394 = vmatmul.f32.gmra.mxu0 %v4741_v48  ;;  %2459 = vmatmul.f32.gmra.mxu1 %v4753_v34 }
 0x317   : > { %2668 = vst [vmem:[%s4950_s27 + $0x8] sm:$0xff] %v2292_v26  ;;  %2586 = vmatmul.f32.vlgmr.msrb.gmra.mxu3 %v2292_v26 }
 0x318   : > { %2669 = vst [vmem:[%s4950_s27 + $0x10] sm:$0xff] %v2165_v16  ;;  %2524 = vmatmul.f32.gmra.mxu2 %v2165_v16 }
 0x31a   : > { %v2229_v37 = vpop.f32.mrf.mxu2  ;;  %v2294_v57 = vpop.f32.mrf.mxu3 }
 0x31b   : > { %v2230_v3 = vadd.f32 %v2229_v37, %v4726_v38  ;;  %v2102_v44 = vpop.f32.mrf.mxu0  ;;  %v2167_v39 = vpop.f32.mrf.mxu1 }
 0x31c   : > { %v2103_v33 = vadd.f32 %v2102_v44, %v4715_v24 }
 0x31d   : > { %v2295_v29 = vadd.f32 %v2294_v57, %v2230_v3 }
 0x31e   : > { %v2168_v7 = vadd.f32 %v2167_v39, %v2103_v33  ;;  %2397 = vmatmul.f32.gmra.mxu0 %v4755_v35  ;;  %2462 = vmatmul.f32.gmra.mxu1 %v4767_v46 }
 0x31f   : > { %2670 = vst [vmem:[%s4950_s27 + $0x18] sm:$0xff] %v2295_v29  ;;  %2589 = vmatmul.f32.gmra.mxu3 %v2295_v29 }
 0x320   : > { %2671 = vst [vmem:[%s4950_s27 + $0x20] sm:$0xff] %v2168_v7  ;;  %2527 = vmatmul.f32.gmra.mxu2 %v2168_v7 }
 0x322   : > { %v2232_v48 = vpop.f32.mrf.mxu2  ;;  %v2297_v34 = vpop.f32.mrf.mxu3 }
 0x323   : > { %v2233_v22 = vadd.f32 %v2232_v48, %v4726_v38  ;;  %v2105_v42 = vpop.f32.mrf.mxu0  ;;  %v2170_v6 = vpop.f32.mrf.mxu1 }
 0x324   : > { %v2106_v30 = vadd.f32 %v2105_v42, %v4715_v24 }
 0x325   : > { %v2298_v11 = vadd.f32 %v2297_v34, %v2233_v22 }
 0x326   : > { %v2171_v58 = vadd.f32 %v2170_v6, %v2106_v30  ;;  %2400 = vmatmul.f32.gmra.mxu0 %v4769_v21  ;;  %2465 = vmatmul.f32.gmra.mxu1 %v4781_v41 }
 0x327   : > { %2672 = vst [vmem:[%s4950_s27 + $0x28] sm:$0xff] %v2298_v11  ;;  %2592 = vmatmul.f32.gmra.mxu3 %v2298_v11 }
 0x328   : > { %2673 = vst [vmem:[%s4950_s27 + $0x30] sm:$0xff] %v2171_v58  ;;  %2530 = vmatmul.f32.gmra.mxu2 %v2171_v58 }
 0x32a   : > { %v2235_v35 = vpop.f32.mrf.mxu2  ;;  %v2300_v46 = vpop.f32.mrf.mxu3 }
 0x32b   : > { %v2236_v0 = vadd.f32 %v2235_v35, %v4726_v38  ;;  %v2108_v36 = vpop.f32.mrf.mxu0  ;;  %v2173_v28 = vpop.f32.mrf.mxu1 }
 0x32c   : > { %v2109_v27 = vadd.f32 %v2108_v36, %v4715_v24 }
 0x32d   : > { %v2301_v62 = vadd.f32 %v2300_v46, %v2236_v0 }
 0x32e   : > { %v2174_v25 = vadd.f32 %v2173_v28, %v2109_v27  ;;  %2403 = vmatmul.f32.gmra.mxu0 %v4783_v19  ;;  %2468 = vmatmul.f32.gmra.mxu1 %v4795_v20 }
 0x32f   : > { %2674 = vst [vmem:[%s4950_s27 + $0x38] sm:$0xff] %v2301_v62  ;;  %2595 = vmatmul.f32.gmra.mxu3 %v2301_v62 }
 0x330   : > { %2675 = vst [vmem:[%s4950_s27 + $0x40] sm:$0xff] %v2174_v25  ;;  %2533 = vmatmul.f32.gmra.mxu2 %v2174_v25 }
 0x332   : > { %v2238_v21 = vpop.f32.mrf.mxu2  ;;  %v2303_v41 = vpop.f32.mrf.mxu3 }
 0x333   : > { %v2239_v31 = vadd.f32 %v2238_v21, %v4726_v38  ;;  %v2111_v51 = vpop.f32.mrf.mxu0  ;;  %v2176_v53 = vpop.f32.mrf.mxu1 }
 0x334   : > { %v2112_v43 = vadd.f32 %v2111_v51, %v4715_v24 }
 0x335   : > { %v2304_v61 = vadd.f32 %v2303_v41, %v2239_v31 }
 0x336   : > { %v2177_v49 = vadd.f32 %v2176_v53, %v2112_v43  ;;  %2406 = vmatmul.f32.gmra.mxu0 %v4797_v55  ;;  %2471 = vmatmul.f32.gmra.mxu1 %v4809_v4 }
 0x337   : > { %2676 = vst [vmem:[%s4950_s27 + $0x48] sm:$0xff] %v2304_v61  ;;  %2598 = vmatmul.f32.gmra.mxu3 %v2304_v61 }
 0x338   : > { %2677 = vst [vmem:[%s4950_s27 + $0x50] sm:$0xff] %v2177_v49  ;;  %2536 = vmatmul.f32.gmra.mxu2 %v2177_v49 }
 0x33a   : > { %v2241_v19 = vpop.f32.mrf.mxu2  ;;  %v2306_v20 = vpop.f32.mrf.mxu3 }
 0x33b   : > { %v2242_v63 = vadd.f32 %v2241_v19, %v4726_v38  ;;  %v2114_v9 = vpop.f32.mrf.mxu0  ;;  %v2179_v13 = vpop.f32.mrf.mxu1 }
 0x33c   : > { %v2115_v2 = vadd.f32 %v2114_v9, %v4715_v24 }
 0x33d   : > { %v2307_v26 = vadd.f32 %v2306_v20, %v2242_v63 }
 0x33e   : > { %v2180_v16 = vadd.f32 %v2179_v13, %v2115_v2  ;;  %2409 = vmatmul.f32.gmra.mxu0 %v4811_v47  ;;  %2474 = vmatmul.f32.gmra.mxu1 %v4823_v15 }
 0x33f   : > { %2678 = vst [vmem:[%s4950_s27 + $0x58] sm:$0xff] %v2307_v26  ;;  %2601 = vmatmul.f32.gmra.mxu3 %v2307_v26 }
 0x340   : > { %2679 = vst [vmem:[%s4950_s27 + $0x60] sm:$0xff] %v2180_v16  ;;  %2539 = vmatmul.f32.gmra.mxu2 %v2180_v16 }
 0x342   : > { %v2244_v55 = vpop.f32.mrf.mxu2  ;;  %v2309_v4 = vpop.f32.mrf.mxu3 }
 0x343   : > { %v2245_v37 = vadd.f32 %v2244_v55, %v4726_v38  ;;  %v2117_v57 = vpop.f32.mrf.mxu0  ;;  %v2182_v3 = vpop.f32.mrf.mxu1 }
 0x344   : > { %v2118_v44 = vadd.f32 %v2117_v57, %v4715_v24 }
 0x345   : > { %v2310_v39 = vadd.f32 %v2309_v4, %v2245_v37 }
 0x346   : > { %v2183_v33 = vadd.f32 %v2182_v3, %v2118_v44  ;;  %2412 = vmatmul.f32.gmra.mxu0 %v4825_v5  ;;  %2477 = vmatmul.f32.gmra.mxu1 %v4837_v1 }
 0x347   : > { %2680 = vst [vmem:[%s4950_s27 + $0x68] sm:$0xff] %v2310_v39  ;;  %2604 = vmatmul.f32.gmra.mxu3 %v2310_v39 }
 0x348   : > { %2681 = vst [vmem:[%s4950_s27 + $0x70] sm:$0xff] %v2183_v33  ;;  %2542 = vmatmul.f32.gmra.mxu2 %v2183_v33 }
 0x34a   : > { %v2247_v47 = vpop.f32.mrf.mxu2  ;;  %v2312_v15 = vpop.f32.mrf.mxu3 }
 0x34b   : > { %v2248_v29 = vadd.f32 %v2247_v47, %v4726_v38  ;;  %v2120_v7 = vpop.f32.mrf.mxu0  ;;  %v2185_v48 = vpop.f32.mrf.mxu1 }
 0x34c   : > { %v2121_v34 = vadd.f32 %v2120_v7, %v4715_v24 }
 0x34d   : > { %v2313_v22 = vadd.f32 %v2312_v15, %v2248_v29 }
 0x34e   : > { %v2186_v42 = vadd.f32 %v2185_v48, %v2121_v34  ;;  %2415 = vmatmul.f32.gmra.mxu0 %v4839_v23  ;;  %2480 = vmatmul.f32.gmra.mxu1 %v4851_v50 }
 0x34f   : > { %2682 = vst [vmem:[%s4950_s27 + $0x78] sm:$0xff] %v2313_v22  ;;  %2607 = vmatmul.f32.gmra.mxu3 %v2313_v22 }
 0x350   : > { %2683 = vst [vmem:[%s4950_s27 + $0x80] sm:$0xff] %v2186_v42  ;;  %2545 = vmatmul.f32.gmra.mxu2 %v2186_v42 }
 0x352   : > { %v2250_v5 = vpop.f32.mrf.mxu2  ;;  %v2315_v1 = vpop.f32.mrf.mxu3 }
 0x353   : > { %v2251_v6 = vadd.f32 %v2250_v5, %v4726_v38  ;;  %v2123_v30 = vpop.f32.mrf.mxu0  ;;  %v2188_v11 = vpop.f32.mrf.mxu1 }
 0x354   : > { %v2124_v58 = vadd.f32 %v2123_v30, %v4715_v24 }
 0x355   : > { %v2316_v35 = vadd.f32 %v2315_v1, %v2251_v6 }
 0x356   : > { %v2189_v46 = vadd.f32 %v2188_v11, %v2124_v58  ;;  %2418 = vmatmul.f32.gmra.mxu0 %v4853_v12  ;;  %2483 = vmatmul.f32.gmra.mxu1 %v4865_v56 }
 0x357   : > { %2684 = vst [vmem:[%s4950_s27 + $0x88] sm:$0xff] %v2316_v35  ;;  %2610 = vmatmul.f32.gmra.mxu3 %v2316_v35 }
 0x358   : > { %2685 = vst [vmem:[%s4950_s27 + $0x90] sm:$0xff] %v2189_v46  ;;  %2548 = vmatmul.f32.gmra.mxu2 %v2189_v46 }
 0x35a   : > { %v2253_v23 = vpop.f32.mrf.mxu2  ;;  %v2318_v50 = vpop.f32.mrf.mxu3 }
 0x35b   : > { %v2254_v0 = vadd.f32 %v2253_v23, %v4726_v38  ;;  %v2126_v36 = vpop.f32.mrf.mxu0  ;;  %v2191_v28 = vpop.f32.mrf.mxu1 }
 0x35c   : > { %v2127_v27 = vadd.f32 %v2126_v36, %v4715_v24 }
 0x35d   : > { %v2319_v62 = vadd.f32 %v2318_v50, %v2254_v0 }
 0x35e   : > { %v2192_v25 = vadd.f32 %v2191_v28, %v2127_v27  ;;  %2421 = vmatmul.f32.gmra.mxu0 %v4867_v52  ;;  %2486 = vmatmul.f32.gmra.mxu1 %v4879_v10 }
 0x35f   : > { %2686 = vst [vmem:[%s4950_s27 + $0x98] sm:$0xff] %v2319_v62  ;;  %2613 = vmatmul.f32.gmra.mxu3 %v2319_v62 }
 0x360   : > { %2687 = vst [vmem:[%s4950_s27 + $0xa0] sm:$0xff] %v2192_v25  ;;  %2551 = vmatmul.f32.gmra.mxu2 %v2192_v25 }
 0x362   : > { %v2256_v12 = vpop.f32.mrf.mxu2  ;;  %v2321_v56 = vpop.f32.mrf.mxu3 }
 0x363   : > { %v2257_v21 = vadd.f32 %v2256_v12, %v4726_v38  ;;  %v2129_v41 = vpop.f32.mrf.mxu0  ;;  %v2194_v31 = vpop.f32.mrf.mxu1 }
 0x364   : > { %v2130_v51 = vadd.f32 %v2129_v41, %v4715_v24 }
 0x365   : > { %v2322_v53 = vadd.f32 %v2321_v56, %v2257_v21 }
 0x366   : > { %v2195_v43 = vadd.f32 %v2194_v31, %v2130_v51  ;;  %2424 = vmatmul.f32.gmra.mxu0 %v4881_v60  ;;  %2489 = vmatmul.f32.gmra.mxu1 %v4893_v8 }
 0x367   : > { %2688 = vst [vmem:[%s4950_s27 + $0xa8] sm:$0xff] %v2322_v53  ;;  %2616 = vmatmul.f32.gmra.mxu3 %v2322_v53 }
 0x368   : > { %2689 = vst [vmem:[%s4950_s27 + $0xb0] sm:$0xff] %v2195_v43  ;;  %2554 = vmatmul.f32.gmra.mxu2 %v2195_v43 }
 0x36a   : > { %v2259_v52 = vpop.f32.mrf.mxu2  ;;  %v2324_v10 = vpop.f32.mrf.mxu3 }
 0x36b   : > { %v2260_v61 = vadd.f32 %v2259_v52, %v4726_v38  ;;  %v2132_v49 = vpop.f32.mrf.mxu0  ;;  %v2197_v19 = vpop.f32.mrf.mxu1 }
 0x36c   : > { %v2133_v20 = vadd.f32 %v2132_v49, %v4715_v24 }
 0x36d   : > { %v2325_v63 = vadd.f32 %v2324_v10, %v2260_v61 }
 0x36e   : > { %v2198_v9 = vadd.f32 %v2197_v19, %v2133_v20  ;;  %2427 = vmatmul.f32.gmra.mxu0 %v4895_v59  ;;  %2492 = vmatmul.f32.gmra.mxu1 %v4907_v45 }
 0x36f   : > { %2690 = vst [vmem:[%s4950_s27 + $0xb8] sm:$0xff] %v2325_v63  ;;  %2619 = vmatmul.f32.gmra.mxu3 %v2325_v63 }
 0x370   : > { %2691 = vst [vmem:[%s4950_s27 + $0xc0] sm:$0xff] %v2198_v9  ;;  %2557 = vmatmul.f32.gmra.mxu2 %v2198_v9 }
 0x372   : > { %v2262_v60 = vpop.f32.mrf.mxu2  ;;  %v2327_v8 = vpop.f32.mrf.mxu3 }
 0x373   : > { %v2263_v13 = vadd.f32 %v2262_v60, %v4726_v38  ;;  %v2135_v2 = vpop.f32.mrf.mxu0  ;;  %v2200_v26 = vpop.f32.mrf.mxu1 }
 0x374   : > { %v2136_v16 = vadd.f32 %v2135_v2, %v4715_v24 }
 0x375   : > { %v2328_v55 = vadd.f32 %v2327_v8, %v2263_v13 }
 0x376   : > { %v2201_v4 = vadd.f32 %v2200_v26, %v2136_v16  ;;  %2430 = vmatmul.f32.gmra.mxu0 %v4909_v18  ;;  %2495 = vmatmul.f32.gmra.mxu1 %v4921_v17 }
 0x377   : > { %2692 = vst [vmem:[%s4950_s27 + $0xc8] sm:$0xff] %v2328_v55  ;;  %2622 = vmatmul.f32.gmra.mxu3 %v2328_v55 }
 0x378   : > { %2693 = vst [vmem:[%s4950_s27 + $0xd0] sm:$0xff] %v2201_v4  ;;  %2560 = vmatmul.f32.gmra.mxu2 %v2201_v4 }
 0x37a   : > { %v2265_v59 = vpop.f32.mrf.mxu2  ;;  %v2330_v45 = vpop.f32.mrf.mxu3 }
 0x37b   : > { %v2266_v37 = vadd.f32 %v2265_v59, %v4726_v38  ;;  %v2138_v57 = vpop.f32.mrf.mxu0  ;;  %v2203_v3 = vpop.f32.mrf.mxu1 }
 0x37c   : > { %v2139_v44 = vadd.f32 %v2138_v57, %v4715_v24 }
 0x37d   : > { %v2331_v39 = vadd.f32 %v2330_v45, %v2266_v37 }
 0x37e   : > { %v2204_v33 = vadd.f32 %v2203_v3, %v2139_v44  ;;  %2433 = vmatmul.f32.gmra.mxu0 %v4923_v54  ;;  %2498 = vmatmul.f32.gmra.mxu1 %v4933_v14  ;;  %v5046_v54 = vld [vmem:[%s5238_s9] ss:$0 sm:$0xff] }
 0x37f   : > { %2694 = vst [vmem:[%s4950_s27 + $0xd8] sm:$0xff] %v2331_v39  ;;  %2625 = vmatmul.f32.gmra.mxu3 %v2331_v39 }
 0x380   : > { %2695 = vst [vmem:[%s4950_s27 + $0xe0] sm:$0xff] %v2204_v33  ;;  %2563 = vmatmul.f32.gmra.mxu2 %v2204_v33 }
 0x382   : > { %v2268_v18 = vpop.f32.mrf.mxu2  ;;  %v2333_v17 = vpop.f32.mrf.mxu3 }
 0x383   : > { %v2269_v47 = vadd.f32 %v2268_v18, %v4726_v38  ;;  %v2141_v15 = vpop.f32.mrf.mxu0  ;;  %v2206_v29 = vpop.f32.mrf.mxu1 }
 0x384   : > { %v2142_v7 = vadd.f32 %v2141_v15, %v4715_v24 }
 0x385   : > { %v2334_v48 = vadd.f32 %v2333_v17, %v2269_v47 }
 0x386   : > { %v2207_v34 = vadd.f32 %v2206_v29, %v2142_v7  ;;  %2436 = vmatmul.f32.gmra.mxu0 %v4935_v32  ;;  %2501 = vmatmul.f32.gmra.mxu1 %v4943_v40 }
 0x387   : > { %2696 = vst [vmem:[%s4950_s27 + $0xe8] sm:$0xff] %v2334_v48  ;;  %2628 = vmatmul.f32.gmra.mxu3 %v2334_v48 }
 0x388   : > { %2697 = vst [vmem:[%s4950_s27 + $0xf0] sm:$0xff] %v2207_v34  ;;  %2566 = vmatmul.f32.gmra.mxu2 %v2207_v34 }
 0x38a   : > { %v2271_v24 = vpop.f32.mrf.mxu2  ;;  %v2336_v40 = vpop.f32.mrf.mxu3 }
 0x38b   : > { %v2272_v14 = vadd.f32 %v2271_v24, %v4726_v38  ;;  %v2392_v32 = vpop.f32.mrf.mxu0  ;;  %v2457_v22 = vpop.f32.mrf.mxu1 }
 0x38c   : > { %v2393_v42 = vadd.f32 %v5046_v54, %v2392_v32 }
 0x38d   : > { %v2337_v5 = vadd.f32 %v2336_v40, %v2272_v14 }
 0x38e   : > { %v2458_v1 = vadd.f32 %v2457_v22, %v2393_v42 }
 0x38f   : > { %2698 = vst [vmem:[%s4950_s27 + $0xf8] sm:$0xff] %v2337_v5  ;;  %2631 = vmatmul.f32.gmra.mxu3 %v2337_v5 }
 0x390   : > { %2699 = vst [vmem:[%s5054_s4] sm:$0xff] %v2458_v1 }
 0x393   : > { %v2395_v38 = vpop.f32.mrf.mxu0  ;;  %v2460_v6 = vpop.f32.mrf.mxu1 }
 0x394   : > { %v2396_v30 = vadd.f32 %v5046_v54, %v2395_v38  ;;  %v2522_v11 = vpop.f32.mrf.mxu2 }
 0x396   : > { %v2461_v58 = vadd.f32 %v2460_v6, %v2396_v30 }
 0x397   : > { %3422 = shalt.err (!%p3419_p9)
}
 0x398   : > { %s3581_s30 = smov 256   ;;  %s3582_s17 = smov 16   ;;  %2700 = vst [vmem:[%s5054_s4 + $0x8] sm:$0xff] %v2461_v58  ;;  %v2523_v35 = vadd.f32 %v5046_v54, %v2522_v11 }
 0x399   : > { %3118 = dma.vmem_to_hbm [thread:$0]  (%p3753_p5), %s2779_s19, 4096, %s2781_s18, %s5067_s2, %s3581_s30, %s3581_s30, %s3582_s17  }
 0x39a   : > { %s5408_s0 = sld [smem:[#allocation75_spill]]  ;;  %s2760_s14 = sshll.u32 %s4730_s6, 4  ;;  %v2587_v46 = vpop.f32.mrf.mxu3  ;;  %s2761_s14 = int_to_ptr.vmem [resolvable:$true] %s2760_s14 }
 0x39b   : > { %v2588_v23 = vadd.f32 %v2587_v46, %v2523_v35  ;;  %v2398_v50 = vpop.f32.mrf.mxu0  ;;  %v2463_v0 = vpop.f32.mrf.mxu1  ;;  %s2732_s8 = scalar_lea.sflag [#allocation4], %s3807_s23 }
 0x3a0   : > { %s2759_s24 = scalar_lea.hbm %s5408_s0, %s3092_s10  ;;  %s3443_s6 = scalar_lea.hbm %s5408_s0, 512 }
 0x3a1   : > { %s2762_s16 = sshll.u32 %s2759_s24, 4  ;;  %s2763_s16 = int_to_ptr.hbm [resolvable:$true] %s2762_s16 }
 0x3a2   : > { %s3437_s13 = sshra.s32 %s2763_s16, 4  ;;  %s3438_s13 = int_to_ptr.hbm [resolvable:$true] %s3437_s13 }
 0x3a3   : > { %s3439_s19 = scalar_lea.hbm %s3438_s13, 256  ;;  %p3444_p3 = scmp.lt.s32.totalorder %s3438_s13, %s5408_s0 }
 0x3a4   : > { %p3440_p12 = scmp.ne.s32.totalorder %s3438_s13, %s3439_s19  ;;  %p3445_p7 = scmp.lt.s32.totalorder %s3443_s6, %s3439_s19 }
 0x3a6   : > { %p3441_p13 = pnand %p3440_p12, %p3753_p5  ;;  %p3446_p1 = por %p3445_p7, %p3444_p3 }
 0x3a8   : > { %p3442_p0 = pneg %p3441_p13 }
 0x3aa   : > { %p3447_p4 = pnand %p3446_p1, %p3442_p0 }
 0x3ac   : > { %3450 = shalt.err (!%p3447_p4)
}
 0x3ad   : > { %3117 = dma.vmem_to_hbm [thread:$0]  (%p3753_p5), %s2761_s14, 4096, %s2763_s16, %s2732_s8, %s3581_s30, %s3581_s30, %s3582_s17   ;;  %v2399_v36 = vadd.f32 %v5046_v54, %v2398_v50  ;;  %v2525_v28 = vpop.f32.mrf.mxu2  ;;  %v2590_v25 = vpop.f32.mrf.mxu3 }
 0x3ae   : > { %s5108_s27 = scalar_lea.vmem [#allocation17], %s3069_s12  ;;  %v2526_v62 = vadd.f32 %v5046_v54, %v2525_v28  ;;  %v2401_v56 = vpop.f32.mrf.mxu0  ;;  %v2466_v21 = vpop.f32.mrf.mxu1  ;;  %s3095_s12 = sshll.u32 %s3676_s29, 7 }
 0x3af   : > { %2715 = vst [vmem:[%s5108_s27] sm:$0xff] %v2588_v23  ;;  %v2464_v27 = vadd.f32 %v2463_v0, %v2399_v36  ;;  %v2402_v41 = vadd.f32 %v5046_v54, %v2401_v56  ;;  %s5409_s22 = sld [smem:[#allocation76_spill]]  ;;  %s2795_s24 = sshll.u32 %s5054_s4, 4  ;;  %s2796_s24 = int_to_ptr.vmem [resolvable:$true] %s2795_s24 }
 0x3b0   : > { %v2591_v12 = vadd.f32 %v2590_v25, %v2526_v62 }
 0x3b1   : > { %2701 = vst [vmem:[%s5054_s4 + $0x10] sm:$0xff] %v2464_v27  ;;  %v2467_v51 = vadd.f32 %v2466_v21, %v2402_v41 }
 0x3b2   : > { %2716 = vst [vmem:[%s5108_s27 + $0x8] sm:$0xff] %v2591_v12 }
 0x3b3   : > { %2702 = vst [vmem:[%s5054_s4 + $0x18] sm:$0xff] %v2467_v51 }
 0x3b5   : > { %v2528_v31 = vpop.f32.mrf.mxu2  ;;  %v2593_v43 = vpop.f32.mrf.mxu3  ;;  %s2794_s21 = scalar_lea.hbm %s5409_s22, %s3095_s12  ;;  %s3471_s18 = scalar_lea.hbm %s5409_s22, 256 }
 0x3b6   : > { %v2529_v53 = vadd.f32 %v5046_v54, %v2528_v31  ;;  %v2404_v10 = vpop.f32.mrf.mxu0  ;;  %v2469_v61 = vpop.f32.mrf.mxu1  ;;  %s2797_s14 = sshll.u32 %s2794_s21, 4  ;;  %s2798_s14 = int_to_ptr.hbm [resolvable:$true] %s2797_s14 }
 0x3b7   : > { %v2405_v49 = vadd.f32 %v5046_v54, %v2404_v10  ;;  %s3465_s16 = sshra.s32 %s2798_s14, 4  ;;  %s3466_s16 = int_to_ptr.hbm [resolvable:$true] %s3465_s16 }
 0x3b8   : > { %v2594_v52 = vadd.f32 %v2593_v43, %v2529_v53  ;;  %s3467_s8 = scalar_lea.hbm %s3466_s16, 128  ;;  %p3472_p11 = scmp.lt.s32.totalorder %s3466_s16, %s5409_s22 }
 0x3b9   : > { %v2470_v20 = vadd.f32 %v2469_v61, %v2405_v49  ;;  %p3468_p8 = scmp.ne.s32.totalorder %s3466_s16, %s3467_s8  ;;  %p3473_p9 = scmp.lt.s32.totalorder %s3471_s18, %s3467_s8 }
 0x3ba   : > { %2717 = vst [vmem:[%s5108_s27 + $0x10] sm:$0xff] %v2594_v52 }
 0x3bb   : > { %2703 = vst [vmem:[%s5054_s4 + $0x20] sm:$0xff] %v2470_v20  ;;  %p3469_p2 = pnand %p3468_p8, %p3753_p5  ;;  %p3474_p12 = por %p3473_p9, %p3472_p11 }
 0x3bd   : > { %v2531_v19 = vpop.f32.mrf.mxu2  ;;  %v2596_v9 = vpop.f32.mrf.mxu3  ;;  %p3470_p10 = pneg %p3469_p2 }
 0x3be   : > { %v2532_v63 = vadd.f32 %v5046_v54, %v2531_v19  ;;  %v2407_v8 = vpop.f32.mrf.mxu0  ;;  %v2472_v13 = vpop.f32.mrf.mxu1 }
 0x3bf   : > { %v2408_v2 = vadd.f32 %v5046_v54, %v2407_v8  ;;  %p3475_p13 = pnand %p3474_p12, %p3470_p10 }
 0x3c0   : > { %v2597_v60 = vadd.f32 %v2596_v9, %v2532_v63 }
 0x3c1   : > { %v2473_v16 = vadd.f32 %v2472_v13, %v2408_v2 }
 0x3c2   : > { %2718 = vst [vmem:[%s5108_s27 + $0x18] sm:$0xff] %v2597_v60 }
 0x3c3   : > { %2704 = vst [vmem:[%s5054_s4 + $0x28] sm:$0xff] %v2473_v16 }
 0x3c5   : > { %v2534_v26 = vpop.f32.mrf.mxu2  ;;  %v2599_v4 = vpop.f32.mrf.mxu3 }
 0x3c6   : > { %v2535_v55 = vadd.f32 %v5046_v54, %v2534_v26  ;;  %v2410_v45 = vpop.f32.mrf.mxu0  ;;  %v2475_v37 = vpop.f32.mrf.mxu1 }
 0x3c7   : > { %v2411_v57 = vadd.f32 %v5046_v54, %v2410_v45 }
 0x3c8   : > { %v2600_v59 = vadd.f32 %v2599_v4, %v2535_v55 }
 0x3c9   : > { %v2476_v44 = vadd.f32 %v2475_v37, %v2411_v57 }
 0x3ca   : > { %2719 = vst [vmem:[%s5108_s27 + $0x20] sm:$0xff] %v2600_v59 }
 0x3cb   : > { %2705 = vst [vmem:[%s5054_s4 + $0x30] sm:$0xff] %v2476_v44 }
 0x3cd   : > { %v2537_v3 = vpop.f32.mrf.mxu2  ;;  %v2602_v33 = vpop.f32.mrf.mxu3 }
 0x3ce   : > { %v2538_v39 = vadd.f32 %v5046_v54, %v2537_v3  ;;  %v2413_v17 = vpop.f32.mrf.mxu0  ;;  %v2478_v47 = vpop.f32.mrf.mxu1 }
 0x3cf   : > { %v2414_v15 = vadd.f32 %v5046_v54, %v2413_v17 }
 0x3d0   : > { %v2603_v18 = vadd.f32 %v2602_v33, %v2538_v39 }
 0x3d1   : > { %v2479_v7 = vadd.f32 %v2478_v47, %v2414_v15 }
 0x3d2   : > { %2720 = vst [vmem:[%s5108_s27 + $0x28] sm:$0xff] %v2603_v18 }
 0x3d3   : > { %2706 = vst [vmem:[%s5054_s4 + $0x38] sm:$0xff] %v2479_v7 }
 0x3d5   : > { %v2540_v29 = vpop.f32.mrf.mxu2  ;;  %v2605_v34 = vpop.f32.mrf.mxu3 }
 0x3d6   : > { %v2541_v48 = vadd.f32 %v5046_v54, %v2540_v29  ;;  %v2416_v14 = vpop.f32.mrf.mxu0  ;;  %v2481_v32 = vpop.f32.mrf.mxu1 }
 0x3d7   : > { %v2417_v22 = vadd.f32 %v5046_v54, %v2416_v14 }
 0x3d8   : > { %v2606_v24 = vadd.f32 %v2605_v34, %v2541_v48 }
 0x3d9   : > { %v2482_v42 = vadd.f32 %v2481_v32, %v2417_v22 }
 0x3da   : > { %2721 = vst [vmem:[%s5108_s27 + $0x30] sm:$0xff] %v2606_v24 }
 0x3db   : > { %2707 = vst [vmem:[%s5054_s4 + $0x40] sm:$0xff] %v2482_v42 }
 0x3dd   : > { %v2543_v40 = vpop.f32.mrf.mxu2  ;;  %v2608_v1 = vpop.f32.mrf.mxu3 }
 0x3de   : > { %v2544_v5 = vadd.f32 %v5046_v54, %v2543_v40  ;;  %v2419_v6 = vpop.f32.mrf.mxu0  ;;  %v2484_v30 = vpop.f32.mrf.mxu1 }
 0x3df   : > { %v2420_v11 = vadd.f32 %v5046_v54, %v2419_v6 }
 0x3e0   : > { %v2609_v38 = vadd.f32 %v2608_v1, %v2544_v5 }
 0x3e1   : > { %v2485_v35 = vadd.f32 %v2484_v30, %v2420_v11 }
 0x3e2   : > { %2722 = vst [vmem:[%s5108_s27 + $0x38] sm:$0xff] %v2609_v38 }
 0x3e3   : > { %2708 = vst [vmem:[%s5054_s4 + $0x48] sm:$0xff] %v2485_v35 }
 0x3e5   : > { %v2546_v58 = vpop.f32.mrf.mxu2  ;;  %v2611_v23 = vpop.f32.mrf.mxu3 }
 0x3e6   : > { %v2547_v46 = vadd.f32 %v5046_v54, %v2546_v58  ;;  %v2422_v0 = vpop.f32.mrf.mxu0  ;;  %v2487_v36 = vpop.f32.mrf.mxu1 }
 0x3e7   : > { %v2423_v28 = vadd.f32 %v5046_v54, %v2422_v0 }
 0x3e8   : > { %v2612_v50 = vadd.f32 %v2611_v23, %v2547_v46 }
 0x3e9   : > { %v2488_v62 = vadd.f32 %v2487_v36, %v2423_v28 }
 0x3ea   : > { %2723 = vst [vmem:[%s5108_s27 + $0x40] sm:$0xff] %v2612_v50 }
 0x3eb   : > { %2709 = vst [vmem:[%s5054_s4 + $0x50] sm:$0xff] %v2488_v62 }
 0x3ed   : > { %v2549_v27 = vpop.f32.mrf.mxu2  ;;  %v2614_v12 = vpop.f32.mrf.mxu3 }
 0x3ee   : > { %v2550_v25 = vadd.f32 %v5046_v54, %v2549_v27  ;;  %v2425_v21 = vpop.f32.mrf.mxu0  ;;  %v2490_v41 = vpop.f32.mrf.mxu1 }
 0x3ef   : > { %v2426_v31 = vadd.f32 %v5046_v54, %v2425_v21 }
 0x3f0   : > { %v2615_v56 = vadd.f32 %v2614_v12, %v2550_v25 }
 0x3f1   : > { %v2491_v53 = vadd.f32 %v2490_v41, %v2426_v31 }
 0x3f2   : > { %2724 = vst [vmem:[%s5108_s27 + $0x48] sm:$0xff] %v2615_v56 }
 0x3f3   : > { %2710 = vst [vmem:[%s5054_s4 + $0x58] sm:$0xff] %v2491_v53 }
 0x3f5   : > { %v2552_v51 = vpop.f32.mrf.mxu2  ;;  %v2617_v52 = vpop.f32.mrf.mxu3 }
 0x3f6   : > { %v2553_v43 = vadd.f32 %v5046_v54, %v2552_v51  ;;  %v2428_v61 = vpop.f32.mrf.mxu0  ;;  %v2493_v49 = vpop.f32.mrf.mxu1 }
 0x3f7   : > { %v2429_v19 = vadd.f32 %v5046_v54, %v2428_v61 }
 0x3f8   : > { %v2618_v10 = vadd.f32 %v2617_v52, %v2553_v43 }
 0x3f9   : > { %v2494_v63 = vadd.f32 %v2493_v49, %v2429_v19 }
 0x3fa   : > { %2725 = vst [vmem:[%s5108_s27 + $0x50] sm:$0xff] %v2618_v10 }
 0x3fb   : > { %2711 = vst [vmem:[%s5054_s4 + $0x60] sm:$0xff] %v2494_v63 }
 0x3fd   : > { %v2555_v20 = vpop.f32.mrf.mxu2  ;;  %v2620_v60 = vpop.f32.mrf.mxu3 }
 0x3fe   : > { %v2556_v9 = vadd.f32 %v5046_v54, %v2555_v20  ;;  %v2431_v13 = vpop.f32.mrf.mxu0  ;;  %v2496_v2 = vpop.f32.mrf.mxu1 }
 0x3ff   : > { %v2432_v26 = vadd.f32 %v5046_v54, %v2431_v13 }
 0x400   : > { %v2621_v8 = vadd.f32 %v2620_v60, %v2556_v9 }
 0x401   : > { %v2497_v55 = vadd.f32 %v2496_v2, %v2432_v26 }
 0x402   : > { %2726 = vst [vmem:[%s5108_s27 + $0x58] sm:$0xff] %v2621_v8 }
 0x403   : > { %2712 = vst [vmem:[%s5054_s4 + $0x68] sm:$0xff] %v2497_v55 }
 0x405   : > { %v2558_v16 = vpop.f32.mrf.mxu2  ;;  %v2623_v59 = vpop.f32.mrf.mxu3 }
 0x406   : > { %v2559_v4 = vadd.f32 %v5046_v54, %v2558_v16  ;;  %v2434_v37 = vpop.f32.mrf.mxu0  ;;  %v2499_v57 = vpop.f32.mrf.mxu1 }
 0x407   : > { %v2435_v3 = vadd.f32 %v5046_v54, %v2434_v37 }
 0x408   : > { %v2624_v45 = vadd.f32 %v2623_v59, %v2559_v4 }
 0x409   : > { %v2500_v39 = vadd.f32 %v2499_v57, %v2435_v3 }
 0x40a   : > { %2727 = vst [vmem:[%s5108_s27 + $0x60] sm:$0xff] %v2624_v45 }
 0x40b   : > { %2713 = vst [vmem:[%s5054_s4 + $0x70] sm:$0xff] %v2500_v39 }
 0x40d   : > { %v2561_v44 = vpop.f32.mrf.mxu2  ;;  %v2626_v18 = vpop.f32.mrf.mxu3 }
 0x40e   : > { %v2562_v33 = vadd.f32 %v5046_v54, %v2561_v44  ;;  %v2437_v47 = vpop.f32.mrf.mxu0  ;;  %v2502_v7 = vpop.f32.mrf.mxu1 }
 0x40f   : > { %v2438_v15 = vadd.f32 %v5046_v54, %v2437_v47 }
 0x410   : > { %v2627_v17 = vadd.f32 %v2626_v18, %v2562_v33 }
 0x411   : > { %v2503_v48 = vadd.f32 %v2502_v7, %v2438_v15 }
 0x412   : > { %2728 = vst [vmem:[%s5108_s27 + $0x68] sm:$0xff] %v2627_v17 }
 0x413   : > { %2714 = vst [vmem:[%s5054_s4 + $0x78] sm:$0xff] %v2503_v48 }
 0x415   : > { %v2564_v29 = vpop.f32.mrf.mxu2 }
 0x416   : > { %v2565_v34 = vadd.f32 %v5046_v54, %v2564_v29 }
 0x417   : > { %3478 = shalt.err (!%p3475_p13)
}
 0x418   : > { %s3583_s4 = smov 128   ;;  %s3584_s15 = smov 8   ;;  %v2629_v24 = vpop.f32.mrf.mxu3 }
 0x419   : > { %3119 = dma.vmem_to_hbm [thread:$0]  (%p3753_p5), %s2796_s24, 2048, %s2798_s14, %s5067_s2, %s3583_s4, %s3583_s4, %s3584_s15   ;;  %v2630_v14 = vadd.f32 %v2629_v24, %v2565_v34 }
 0x41a   : > { %s5410_s17 = sld [smem:[#allocation77_spill]]  ;;  %s2812_s16 = sshll.u32 %s5108_s27, 4  ;;  %s2813_s16 = int_to_ptr.vmem [resolvable:$true] %s2812_s16 }
 0x41b   : > { %2729 = vst [vmem:[%s5108_s27 + $0x70] sm:$0xff] %v2630_v14  ;;  %s2747_s2 = scalar_lea.sflag [#allocation18], %s3807_s23 }
 0x41d   : > { %v2567_v32 = vpop.f32.mrf.mxu2 }
 0x41e   : > { %v2568_v22 = vadd.f32 %v5046_v54, %v2567_v32 }
 0x420   : > { %s2811_s21 = scalar_lea.hbm %s5410_s17, %s3095_s12  ;;  %v2632_v40 = vpop.f32.mrf.mxu3  ;;  %s3499_s13 = scalar_lea.hbm %s5410_s17, 256 }
 0x421   : > { %s2814_s8 = sshll.u32 %s2811_s21, 4  ;;  %v2633_v42 = vadd.f32 %v2632_v40, %v2568_v22  ;;  %s2815_s8 = int_to_ptr.hbm [resolvable:$true] %s2814_s8 }
 0x422   : > { %s3493_s24 = sshra.s32 %s2815_s8, 4  ;;  %s3494_s24 = int_to_ptr.hbm [resolvable:$true] %s3493_s24 }
 0x423   : > { %2730 = vst [vmem:[%s5108_s27 + $0x78] sm:$0xff] %v2633_v42  ;;  %s3495_s14 = scalar_lea.hbm %s3494_s24, 128  ;;  %p3500_p1 = scmp.lt.s32.totalorder %s3494_s24, %s5410_s17 }
 0x424   : > { %p3496_p0 = scmp.ne.s32.totalorder %s3494_s24, %s3495_s14  ;;  %p3501_p4 = scmp.lt.s32.totalorder %s3499_s13, %s3495_s14 }
 0x426   : > { %p3497_p3 = pnand %p3496_p0, %p3753_p5  ;;  %p3502_p8 = por %p3501_p4, %p3500_p1 }
 0x428   : > { %p3498_p7 = pneg %p3497_p3 }
 0x42a   : > { %p3503_p2 = pnand %p3502_p8, %p3498_p7 }
 0x42c   : > { %3506 = shalt.err (!%p3503_p2)
}
 0x42d   : > { %3120 = dma.vmem_to_hbm [thread:$0]  (%p3753_p5), %s2813_s16, 2048, %s2815_s8, %s2747_s2, %s3583_s4, %s3583_s4, %s3584_s15  }
 0x42e PF: > { %s5411_s23 = sld [smem:[#allocation27_spill]]  ;;  %p5413_p10 = scmp.ge.s32.totalorder %s3569_s28, 2 }
 0x430   : > { %p3146_p11 = pnand %p5413_p10, %p3692_p6 }
 0x432   : > { %p3147_p9 = pneg %p3146_p11 }
 0x434   : > { %s2829_s10 = sand.u32 1, %s5411_s23  }
 0x435   : > { %s2830_s6 = scalar_lea.sflag [#allocation4], %s2829_s10 }
 0x436   : > { %3544 = dma.done.wait (%p3147_p9), %s2830_s6, 4096  }
 0x437   : > { %3546 = vsyncadd (%p3147_p9), %s2830_s6, 4294963200  ;;  %s5414_s20 = sadd.s32 4294967294, %s3569_s28  }
 0x438   : > { %s2839_s30 = sand.u32 1, %s5414_s20  }
 0x439   : > { %s2840_s25 = scalar_lea.sflag [#allocation15], %s2839_s30 }
 0x43a   : > { %3548 = dma.done.wait (%p3147_p9), %s2840_s25, 6144  }
 0x43b   : > { %3550 = vsyncadd (%p3147_p9), %s2840_s25, 4294961152  ;;  %s2860_s21 = scalar_lea.sflag [#allocation18], %s2829_s10 }
 0x43c   : > { %3552 = dma.done.wait (%p3147_p9), %s2860_s21, 2048  }
 0x43d   : > { %3554 = vsyncadd (%p3147_p9), %s2860_s21, 4294965248  ;;  %s5415_s28 = sld [smem:[#allocation30_spill]]  ;;  %s5418_s25 = smov %s3561_s26 }
 0x43e   : > { %s5416_s4 = sld [smem:[#allocation28_spill]] }
 0x43f   : > { %s5417_s27 = sld [smem:[#allocation31_spill]] }
 0x443   : > { %p38_p5 = scmp.ge.s32.totalorder %s5415_s28, 4  }
 0x444   : > { %s5419_s26 = smov %s5416_s4 }
 0x445   :  { %40 = sbr.rel (!%p38_p5) target bundleno = 22 (0x16), region = 183 }
 0x44a   :  { %2866 = vsyncpa [#allocation3], 1 }
 0x44b   :  { %2868 = vsyncpa [#allocation3 + $0x1], 1 }
 0x44c   :  { %2869 = vsyncpa [#allocation6], 1 }
 0x44d   :  { %2871 = vsyncpa [#allocation6 + $0x1], 1 }
 0x44e   :  { %2872 = vsyncpa [#allocation9], 1 }
 0x44f   :  { %2873 = vsyncpa [#allocation12], 1 }
 0x450   :  { %2874 = vsyncpa [#allocation4], 1 }
 0x451   :  { %2876 = vsyncpa [#allocation4 + $0x1], 1 }
 0x452   :  { %2877 = vsyncpa [#allocation15], 1 }
 0x453   :  { %2879 = vsyncpa [#allocation15 + $0x1], 1 }
 0x454   :  { %2880 = vsyncpa [#allocation18], 1 }
 0x455   :  { %2882 = vsyncpa [#allocation18 + $0x1], 1 }

</bundles_post_ra>
